<compile_context>
chip_gen: v7x
topology: tpu7x:2x2x1
jax: 0.10.0
libtpu: 0.0.40
codegen_flags: <defaults>
</compile_context>

<pallas_src>
import functools
import math

import jax
import jax.numpy as jnp
from jax.experimental import pallas as pl
from jax.experimental.pallas import tpu as pltpu

# ----------------------------- model config (small, synthetic) ---------------
B, S, H = 2, 8, 32          # batch, sequence length, hidden size
NUM_HEADS = 2
HEAD_DIM = H // NUM_HEADS
NUM_LAYERS = 2
INTERMEDIATE = 64
VOCAB = 100
MAX_POS = 16
N_CLASSES = 3
CLS_PAD = 128               # lane-dense padded classifier output width
LN_EPS = 1e-12              # BERT layernorm eps

_VMEM = pl.BlockSpec(memory_space=pltpu.MemorySpace.VMEM)
_SMEM = pl.BlockSpec(memory_space=pltpu.MemorySpace.SMEM)


# ----------------------------- in-kernel helpers ------------------------------
def _ln(x, g, b):
    mu = jnp.mean(x, axis=-1, keepdims=True)
    xc = x - mu
    var = jnp.mean(xc * xc, axis=-1, keepdims=True)
    return xc * jax.lax.rsqrt(var + LN_EPS) * g + b


def _gelu(x):
    # TODO(synk): HF BERT uses erf-GELU; tanh approximation kept (~1e-3 rel
    # difference) because lax.erf has no guaranteed Mosaic lowering here.
    return 0.5 * x * (1.0 + jnp.tanh(0.7978845608028654 * (x + 0.044715 * x * x * x)))


# ----------------------------- the single fused kernel ------------------------
def _fused_forward_kernel(*refs, nlayers, batch, seq, nheads, hdim):
    """Embedding gather + LN, all BERT layers, LSTM, classifier — one launch."""
    n_in = 6 + nlayers * 12 + 5
    assert len(refs) == n_in + 2  # + output ref + embedding scratch
    (tokens_ref, mask_ref, wemb_ref, pos_type_ref, emb_g_ref, emb_b_ref) = refs[:6]
    layer_refs = refs[6:6 + nlayers * 12]
    wih_ref, whh_ref, lstm_b_ref, wcls_ref, bcls_ref = refs[6 + nlayers * 12:n_in]
    o_ref = refs[n_in]
    emb_scratch = refs[n_in + 1]

    Hh = nheads * hdim

    # ---- embedding: in-kernel gather (token ids in SMEM, table rows in VMEM) --
    # word_emb is stored (VOCAB, 1, H): dynamic index on the leading dim is a
    # plain dynamic VMEM row read; rows land in a VMEM scratch slab.
    for b in range(batch):
        for t in range(seq):
            tok = tokens_ref[b, t]
            emb_scratch[pl.ds(b * seq + t, 1), :] = wemb_ref[tok]
    x = _ln(emb_scratch[...] + pos_type_ref[...], emb_g_ref[...], emb_b_ref[...])

    mask = mask_ref[...]                       # (B, S) additive mask

    # ---- BERT encoder layers (static python loop; everything VMEM-resident) --
    scale = 1.0 / math.sqrt(hdim)
    for l in range(nlayers):
        (wqkv_ref, bqkv_ref, wo_ref, bo_ref, ln1g_ref, ln1b_ref,
         w1_ref, b1_ref, w2_ref, b2_ref, ln2g_ref, ln2b_ref) = \
            layer_refs[l * 12:(l + 1) * 12]

        # Fused QKV projection: one MXU matmul, columns per-head contiguous
        # ([Q_h|K_h|V_h] blocks), so each head reads one contiguous lane block.
        qkv = (jnp.dot(x, wqkv_ref[...], preferred_element_type=jnp.float32)
               + bqkv_ref[...])
        wo = wo_ref[...]

        # Batch- and head-unrolled attention, all operands 2-D (no 3-D reshapes).
        rows = []
        for b in range(batch):
            r0 = b * seq                        # 8-sublane-aligned row offset
            m_b = mask[b:b + 1, :]              # (1, S)
            acc_b = None
            for h in range(nheads):
                base = 3 * hdim * h
                q = qkv[r0:r0 + seq, base:base + hdim]
                k = qkv[r0:r0 + seq, base + hdim:base + 2 * hdim]
                v = qkv[r0:r0 + seq, base + 2 * hdim:base + 3 * hdim]
                s = jax.lax.dot_general(q, k, (((1,), (1,)), ((), ())),
                                        preferred_element_type=jnp.float32) * scale
                s = s + m_b
                s = s - jnp.max(s, axis=-1, keepdims=True)
                p = jnp.exp(s)
                p = p * pl.reciprocal(jnp.sum(p, axis=-1, keepdims=True), approx=True)
                ctx = jnp.dot(p, v, preferred_element_type=jnp.float32)   # (S, dh)
                # Output projection accumulated per head against W_O row slices
                # (avoids a lane-axis concat of head contexts).
                part = jnp.dot(ctx, wo[h * hdim:(h + 1) * hdim, :],
                               preferred_element_type=jnp.float32)        # (S, H)
                acc_b = part if acc_b is None else acc_b + part
            rows.append(acc_b)
        attn_out = jnp.concatenate(rows, axis=0) + bo_ref[...]            # (B*S, H)

        x = _ln(x + attn_out, ln1g_ref[...], ln1b_ref[...])
        ffn = _gelu(jnp.dot(x, w1_ref[...], preferred_element_type=jnp.float32)
                    + b1_ref[...])
        ffn_out = (jnp.dot(ffn, w2_ref[...], preferred_element_type=jnp.float32)
                   + b2_ref[...])
        x = _ln(x + ffn_out, ln2g_ref[...], ln2b_ref[...])

    # ---- LSTM + classifier ----------------------------------------------------
    # Input projection for ALL timesteps hoisted out of the time loop:
    # one lane-dense (B*S, 4H=128) MXU matmul instead of S small ones.
    xg = (jnp.dot(x, wih_ref[...], preferred_element_type=jnp.float32)
          + lstm_b_ref[...])                    # (B*S, 4H)
    xg3 = xg.reshape(batch, seq, 4 * Hh)        # lane width stays 128 (layout-preserving)
    whh = whh_ref[...]                          # (H, 4H)

    h_t = jnp.zeros((batch, Hh), jnp.float32)
    c_t = jnp.zeros((batch, Hh), jnp.float32)
    # Fully-unrolled time loop (seq=8 static).  PyTorch gate order: i, f, g, o.
    # Step written as dot(h, Whh) + precomputed input-gate slab so the add can
    # fold into the MXU result path (MRB in-place accumulate on v7x).
    for t in range(seq):
        gates = (jnp.dot(h_t, whh, preferred_element_type=jnp.float32)
                 + xg3[:, t, :])
        i_g = jax.nn.sigmoid(gates[:, 0 * Hh:1 * Hh])
        f_g = jax.nn.sigmoid(gates[:, 1 * Hh:2 * Hh])
        g_g = jnp.tanh(gates[:, 2 * Hh:3 * Hh])
        o_g = jax.nn.sigmoid(gates[:, 3 * Hh:4 * Hh])
        c_t = f_g * c_t + i_g * g_g
        h_t = o_g * jnp.tanh(c_t)

    # Fused classifier; output padded to 128 lanes -> lane-dense store.
    o_ref[...] = (jnp.dot(h_t, wcls_ref[...], preferred_element_type=jnp.float32)
                  + bcls_ref[...])


# ----------------------------- forward pass ------------------------------------
@jax.jit
def forward(params, tokens, attention_mask):
    mask_add = (1.0 - attention_mask.astype(jnp.float32)) * -10000.0      # (B, S)

    args = [tokens.astype(jnp.int32), mask_add,
            params["word_emb3"], params["pos_type_emb"],
            params["emb_ln_g"], params["emb_ln_b"]]
    for lp in params["layers"]:
        args += [lp["wqkv"], lp["bqkv"], lp["wo"], lp["bo"],
                 lp["ln1_g"], lp["ln1_b"], lp["w1"], lp["b1"],
                 lp["w2"], lp["b2"], lp["ln2_g"], lp["ln2_b"]]
    args += [params["lstm_wih_t"], params["lstm_whh_t"], params["lstm_b2d"],
             params["cls_w_pad"], params["cls_b_pad"]]

    kern = functools.partial(_fused_forward_kernel, nlayers=NUM_LAYERS,
                             batch=B, seq=S, nheads=NUM_HEADS, hdim=HEAD_DIM)
    logits_pad = pl.pallas_call(
        kern,
        out_shape=jax.ShapeDtypeStruct((B, CLS_PAD), jnp.float32),
        in_specs=[_SMEM] + [_VMEM] * (len(args) - 1),   # tokens -> SMEM, rest -> VMEM
        out_specs=_VMEM,
        scratch_shapes=[pltpu.VMEM((B * S, H), jnp.float32)],  # gathered embeddings
    )(*args)
    return logits_pad[:, :N_CLASSES]


# ----------------------------- deterministic init ------------------------------
def init_params(key):
    def nrm(k, shape, scale=0.02):
        return (scale * jax.random.normal(k, shape)).astype(jnp.float32)

    keys = iter(jax.random.split(key, 256))
    word_emb = nrm(next(keys), (VOCAB, H))
    pos_emb = nrm(next(keys), (MAX_POS, H))
    type_emb = nrm(next(keys), (2, H))
    params = {
        # (VOCAB, 1, H): in-kernel gather indexes the leading (non-tiled) dim.
        "word_emb3": word_emb.reshape(VOCAB, 1, H),
        # position + token-type embeddings are input-independent here: pre-sum
        # and tile to (B*S, H) once at init.
        "pos_type_emb": (jnp.tile(pos_emb[:S], (B, 1)) + type_emb[0][None, :]
                         ).astype(jnp.float32),
        "emb_ln_g": jnp.ones((1, H), jnp.float32),
        "emb_ln_b": jnp.zeros((1, H), jnp.float32),
        "layers": [],
    }
    for _ in range(NUM_LAYERS):
        wq = nrm(next(keys), (H, H))
        wk = nrm(next(keys), (H, H))
        wv = nrm(next(keys), (H, H))
        # Fused QKV with per-head-contiguous columns: [Q_h0|K_h0|V_h0|Q_h1|K_h1|V_h1]
        blocks = []
        for h in range(NUM_HEADS):
            sl = slice(h * HEAD_DIM, (h + 1) * HEAD_DIM)
            blocks += [wq[:, sl], wk[:, sl], wv[:, sl]]
        params["layers"].append({
            "wqkv": jnp.concatenate(blocks, axis=1),
            "bqkv": jnp.zeros((1, 3 * H), jnp.float32),
            "wo": nrm(next(keys), (H, H)), "bo": jnp.zeros((1, H), jnp.float32),
            "ln1_g": jnp.ones((1, H), jnp.float32), "ln1_b": jnp.zeros((1, H), jnp.float32),
            "w1": nrm(next(keys), (H, INTERMEDIATE)),
            "b1": jnp.zeros((1, INTERMEDIATE), jnp.float32),
            "w2": nrm(next(keys), (INTERMEDIATE, H)),
            "b2": jnp.zeros((1, H), jnp.float32),
            "ln2_g": jnp.ones((1, H), jnp.float32), "ln2_b": jnp.zeros((1, H), jnp.float32),
        })
    # LSTM weights stored pre-transposed (H, 4H); combined bias = b_ih + b_hh.
    params["lstm_wih_t"] = nrm(next(keys), (H, 4 * H), scale=0.1)
    params["lstm_whh_t"] = nrm(next(keys), (H, 4 * H), scale=0.1)
    params["lstm_b2d"] = nrm(next(keys), (1, 4 * H), scale=0.1)
    # Classifier padded to a lane-dense 128-wide output; sliced back in wrapper.
    cls_w = nrm(next(keys), (H, N_CLASSES), scale=0.1)
    params["cls_w_pad"] = jnp.zeros((H, CLS_PAD), jnp.float32).at[:, :N_CLASSES].set(cls_w)
    params["cls_b_pad"] = jnp.zeros((1, CLS_PAD), jnp.float32)
    return params


# ----------------------------- main --------------------------------------------
if __name__ == "__main__":
    key = jax.random.PRNGKey(0)
    k_params, k_tok = jax.random.split(key)
    params = init_params(k_params)

    tokens = jax.random.randint(k_tok, (B, S), 0, VOCAB, dtype=jnp.int32)
    attention_mask = jnp.ones((B, S), jnp.float32).at[1, 6:].set(0.0)

    logits = forward(params, tokens, attention_mask)
    jax.block_until_ready(logits)
    assert logits.shape == (B, N_CLASSES) and logits.dtype == jnp.float32
    print("KERNEL_OK")
</pallas_src>

<mosaic_0001>
module attributes {stable_mosaic.version = 11 : i64} {
  func.func @_fused_forward_kernel(%arg0: memref<2x8xi32, #tpu.memory_space<smem>>, %arg1: memref<2x8xf32, #tpu.memory_space<vmem>>, %arg2: memref<100x1x32xf32, #tpu.memory_space<vmem>>, %arg3: memref<16x32xf32, #tpu.memory_space<vmem>>, %arg4: memref<1x32xf32, #tpu.memory_space<vmem>>, %arg5: memref<1x32xf32, #tpu.memory_space<vmem>>, %arg6: memref<32x96xf32, #tpu.memory_space<vmem>>, %arg7: memref<1x96xf32, #tpu.memory_space<vmem>>, %arg8: memref<32x32xf32, #tpu.memory_space<vmem>>, %arg9: memref<1x32xf32, #tpu.memory_space<vmem>>, %arg10: memref<1x32xf32, #tpu.memory_space<vmem>>, %arg11: memref<1x32xf32, #tpu.memory_space<vmem>>, %arg12: memref<32x64xf32, #tpu.memory_space<vmem>>, %arg13: memref<1x64xf32, #tpu.memory_space<vmem>>, %arg14: memref<64x32xf32, #tpu.memory_space<vmem>>, %arg15: memref<1x32xf32, #tpu.memory_space<vmem>>, %arg16: memref<1x32xf32, #tpu.memory_space<vmem>>, %arg17: memref<1x32xf32, #tpu.memory_space<vmem>>, %arg18: memref<32x96xf32, #tpu.memory_space<vmem>>, %arg19: memref<1x96xf32, #tpu.memory_space<vmem>>, %arg20: memref<32x32xf32, #tpu.memory_space<vmem>>, %arg21: memref<1x32xf32, #tpu.memory_space<vmem>>, %arg22: memref<1x32xf32, #tpu.memory_space<vmem>>, %arg23: memref<1x32xf32, #tpu.memory_space<vmem>>, %arg24: memref<32x64xf32, #tpu.memory_space<vmem>>, %arg25: memref<1x64xf32, #tpu.memory_space<vmem>>, %arg26: memref<64x32xf32, #tpu.memory_space<vmem>>, %arg27: memref<1x32xf32, #tpu.memory_space<vmem>>, %arg28: memref<1x32xf32, #tpu.memory_space<vmem>>, %arg29: memref<1x32xf32, #tpu.memory_space<vmem>>, %arg30: memref<32x128xf32, #tpu.memory_space<vmem>>, %arg31: memref<32x128xf32, #tpu.memory_space<vmem>>, %arg32: memref<1x128xf32, #tpu.memory_space<vmem>>, %arg33: memref<32x128xf32, #tpu.memory_space<vmem>>, %arg34: memref<1x128xf32, #tpu.memory_space<vmem>>, %arg35: memref<2x128xf32, #tpu.memory_space<vmem>>, %arg36: memref<16x32xf32, #tpu.memory_space<vmem>>) attributes {dimension_semantics = [], scalar_prefetch = 0 : i64, scratch_operands = 1 : i64, tpu.core_type = #tpu.core_type<tc>} {
    %c0 = arith.constant 0 : index
    %c0_0 = arith.constant 0 : index
    %0 = memref.load %arg0[%c0, %c0_0] : memref<2x8xi32, #tpu.memory_space<smem>>
    %1 = arith.index_cast %0 : i32 to index
    %c0_1 = arith.constant 0 : index
    %c0_2 = arith.constant 0 : index
    %2 = vector.load %arg2[%1, %c0_1, %c0_2] : memref<100x1x32xf32, #tpu.memory_space<vmem>>, vector<1x1x32xf32>
    %3 = vector.shape_cast %2 : vector<1x1x32xf32> to vector<1x32xf32>
    %c0_3 = arith.constant 0 : index
    %c0_4 = arith.constant 0 : index
    %4 = vector.load %arg36[%c0_3, %c0_4] : memref<16x32xf32, #tpu.memory_space<vmem>>, vector<1x32xf32>
    tpu.vector_store %arg36[%c0_3, %c0_4], %3 {strides = array<i32>} : memref<16x32xf32, #tpu.memory_space<vmem>>, vector<1x32xf32>,
    %c0_5 = arith.constant 0 : index
    %c1 = arith.constant 1 : index
    %5 = memref.load %arg0[%c0_5, %c1] : memref<2x8xi32, #tpu.memory_space<smem>>
    %6 = arith.index_cast %5 : i32 to index
    %c0_6 = arith.constant 0 : index
    %c0_7 = arith.constant 0 : index
    %7 = vector.load %arg2[%6, %c0_6, %c0_7] : memref<100x1x32xf32, #tpu.memory_space<vmem>>, vector<1x1x32xf32>
    %8 = vector.shape_cast %7 : vector<1x1x32xf32> to vector<1x32xf32>
    %c1_8 = arith.constant 1 : index
    %c0_9 = arith.constant 0 : index
    %9 = vector.load %arg36[%c1_8, %c0_9] : memref<16x32xf32, #tpu.memory_space<vmem>>, vector<1x32xf32>
    tpu.vector_store %arg36[%c1_8, %c0_9], %8 {strides = array<i32>} : memref<16x32xf32, #tpu.memory_space<vmem>>, vector<1x32xf32>,
    %c0_10 = arith.constant 0 : index
    %c2 = arith.constant 2 : index
    %10 = memref.load %arg0[%c0_10, %c2] : memref<2x8xi32, #tpu.memory_space<smem>>
    %11 = arith.index_cast %10 : i32 to index
    %c0_11 = arith.constant 0 : index
    %c0_12 = arith.constant 0 : index
    %12 = vector.load %arg2[%11, %c0_11, %c0_12] : memref<100x1x32xf32, #tpu.memory_space<vmem>>, vector<1x1x32xf32>
    %13 = vector.shape_cast %12 : vector<1x1x32xf32> to vector<1x32xf32>
    %c2_13 = arith.constant 2 : index
    %c0_14 = arith.constant 0 : index
    %14 = vector.load %arg36[%c2_13, %c0_14] : memref<16x32xf32, #tpu.memory_space<vmem>>, vector<1x32xf32>
    tpu.vector_store %arg36[%c2_13, %c0_14], %13 {strides = array<i32>} : memref<16x32xf32, #tpu.memory_space<vmem>>, vector<1x32xf32>,
    %c0_15 = arith.constant 0 : index
    %c3 = arith.constant 3 : index
    %15 = memref.load %arg0[%c0_15, %c3] : memref<2x8xi32, #tpu.memory_space<smem>>
    %16 = arith.index_cast %15 : i32 to index
    %c0_16 = arith.constant 0 : index
    %c0_17 = arith.constant 0 : index
    %17 = vector.load %arg2[%16, %c0_16, %c0_17] : memref<100x1x32xf32, #tpu.memory_space<vmem>>, vector<1x1x32xf32>
    %18 = vector.shape_cast %17 : vector<1x1x32xf32> to vector<1x32xf32>
    %c3_18 = arith.constant 3 : index
    %c0_19 = arith.constant 0 : index
    %19 = vector.load %arg36[%c3_18, %c0_19] : memref<16x32xf32, #tpu.memory_space<vmem>>, vector<1x32xf32>
    tpu.vector_store %arg36[%c3_18, %c0_19], %18 {strides = array<i32>} : memref<16x32xf32, #tpu.memory_space<vmem>>, vector<1x32xf32>,
    %c0_20 = arith.constant 0 : index
    %c4 = arith.constant 4 : index
    %20 = memref.load %arg0[%c0_20, %c4] : memref<2x8xi32, #tpu.memory_space<smem>>
    %21 = arith.index_cast %20 : i32 to index
    %c0_21 = arith.constant 0 : index
    %c0_22 = arith.constant 0 : index
    %22 = vector.load %arg2[%21, %c0_21, %c0_22] : memref<100x1x32xf32, #tpu.memory_space<vmem>>, vector<1x1x32xf32>
    %23 = vector.shape_cast %22 : vector<1x1x32xf32> to vector<1x32xf32>
    %c4_23 = arith.constant 4 : index
    %c0_24 = arith.constant 0 : index
    %24 = vector.load %arg36[%c4_23, %c0_24] : memref<16x32xf32, #tpu.memory_space<vmem>>, vector<1x32xf32>
    tpu.vector_store %arg36[%c4_23, %c0_24], %23 {strides = array<i32>} : memref<16x32xf32, #tpu.memory_space<vmem>>, vector<1x32xf32>,
    %c0_25 = arith.constant 0 : index
    %c5 = arith.constant 5 : index
    %25 = memref.load %arg0[%c0_25, %c5] : memref<2x8xi32, #tpu.memory_space<smem>>
    %26 = arith.index_cast %25 : i32 to index
    %c0_26 = arith.constant 0 : index
    %c0_27 = arith.constant 0 : index
    %27 = vector.load %arg2[%26, %c0_26, %c0_27] : memref<100x1x32xf32, #tpu.memory_space<vmem>>, vector<1x1x32xf32>
    %28 = vector.shape_cast %27 : vector<1x1x32xf32> to vector<1x32xf32>
    %c5_28 = arith.constant 5 : index
    %c0_29 = arith.constant 0 : index
    %29 = vector.load %arg36[%c5_28, %c0_29] : memref<16x32xf32, #tpu.memory_space<vmem>>, vector<1x32xf32>
    tpu.vector_store %arg36[%c5_28, %c0_29], %28 {strides = array<i32>} : memref<16x32xf32, #tpu.memory_space<vmem>>, vector<1x32xf32>,
    %c0_30 = arith.constant 0 : index
    %c6 = arith.constant 6 : index
    %30 = memref.load %arg0[%c0_30, %c6] : memref<2x8xi32, #tpu.memory_space<smem>>
    %31 = arith.index_cast %30 : i32 to index
    %c0_31 = arith.constant 0 : index
    %c0_32 = arith.constant 0 : index
    %32 = vector.load %arg2[%31, %c0_31, %c0_32] : memref<100x1x32xf32, #tpu.memory_space<vmem>>, vector<1x1x32xf32>
    %33 = vector.shape_cast %32 : vector<1x1x32xf32> to vector<1x32xf32>
    %c6_33 = arith.constant 6 : index
    %c0_34 = arith.constant 0 : index
    %34 = vector.load %arg36[%c6_33, %c0_34] : memref<16x32xf32, #tpu.memory_space<vmem>>, vector<1x32xf32>
    tpu.vector_store %arg36[%c6_33, %c0_34], %33 {strides = array<i32>} : memref<16x32xf32, #tpu.memory_space<vmem>>, vector<1x32xf32>,
    %c0_35 = arith.constant 0 : index
    %c7 = arith.constant 7 : index
    %35 = memref.load %arg0[%c0_35, %c7] : memref<2x8xi32, #tpu.memory_space<smem>>
    %36 = arith.index_cast %35 : i32 to index
    %c0_36 = arith.constant 0 : index
    %c0_37 = arith.constant 0 : index
    %37 = vector.load %arg2[%36, %c0_36, %c0_37] : memref<100x1x32xf32, #tpu.memory_space<vmem>>, vector<1x1x32xf32>
    %38 = vector.shape_cast %37 : vector<1x1x32xf32> to vector<1x32xf32>
    %c7_38 = arith.constant 7 : index
    %c0_39 = arith.constant 0 : index
    %39 = vector.load %arg36[%c7_38, %c0_39] : memref<16x32xf32, #tpu.memory_space<vmem>>, vector<1x32xf32>
    tpu.vector_store %arg36[%c7_38, %c0_39], %38 {strides = array<i32>} : memref<16x32xf32, #tpu.memory_space<vmem>>, vector<1x32xf32>,
    %c1_40 = arith.constant 1 : index
    %c0_41 = arith.constant 0 : index
    %40 = memref.load %arg0[%c1_40, %c0_41] : memref<2x8xi32, #tpu.memory_space<smem>>
    %41 = arith.index_cast %40 : i32 to index
    %c0_42 = arith.constant 0 : index
    %c0_43 = arith.constant 0 : index
    %42 = vector.load %arg2[%41, %c0_42, %c0_43] : memref<100x1x32xf32, #tpu.memory_space<vmem>>, vector<1x1x32xf32>
    %43 = vector.shape_cast %42 : vector<1x1x32xf32> to vector<1x32xf32>
    %c8 = arith.constant 8 : index
    %c0_44 = arith.constant 0 : index
    %44 = vector.load %arg36[%c8, %c0_44] : memref<16x32xf32, #tpu.memory_space<vmem>>, vector<1x32xf32>
    tpu.vector_store %arg36[%c8, %c0_44], %43 {strides = array<i32>} : memref<16x32xf32, #tpu.memory_space<vmem>>, vector<1x32xf32>,
    %c1_45 = arith.constant 1 : index
    %c1_46 = arith.constant 1 : index
    %45 = memref.load %arg0[%c1_45, %c1_46] : memref<2x8xi32, #tpu.memory_space<smem>>
    %46 = arith.index_cast %45 : i32 to index
    %c0_47 = arith.constant 0 : index
    %c0_48 = arith.constant 0 : index
    %47 = vector.load %arg2[%46, %c0_47, %c0_48] : memref<100x1x32xf32, #tpu.memory_space<vmem>>, vector<1x1x32xf32>
    %48 = vector.shape_cast %47 : vector<1x1x32xf32> to vector<1x32xf32>
    %c9 = arith.constant 9 : index
    %c0_49 = arith.constant 0 : index
    %49 = vector.load %arg36[%c9, %c0_49] : memref<16x32xf32, #tpu.memory_space<vmem>>, vector<1x32xf32>
    tpu.vector_store %arg36[%c9, %c0_49], %48 {strides = array<i32>} : memref<16x32xf32, #tpu.memory_space<vmem>>, vector<1x32xf32>,
    %c1_50 = arith.constant 1 : index
    %c2_51 = arith.constant 2 : index
    %50 = memref.load %arg0[%c1_50, %c2_51] : memref<2x8xi32, #tpu.memory_space<smem>>
    %51 = arith.index_cast %50 : i32 to index
    %c0_52 = arith.constant 0 : index
    %c0_53 = arith.constant 0 : index
    %52 = vector.load %arg2[%51, %c0_52, %c0_53] : memref<100x1x32xf32, #tpu.memory_space<vmem>>, vector<1x1x32xf32>
    %53 = vector.shape_cast %52 : vector<1x1x32xf32> to vector<1x32xf32>
    %c10 = arith.constant 10 : index
    %c0_54 = arith.constant 0 : index
    %54 = vector.load %arg36[%c10, %c0_54] : memref<16x32xf32, #tpu.memory_space<vmem>>, vector<1x32xf32>
    tpu.vector_store %arg36[%c10, %c0_54], %53 {strides = array<i32>} : memref<16x32xf32, #tpu.memory_space<vmem>>, vector<1x32xf32>,
    %c1_55 = arith.constant 1 : index
    %c3_56 = arith.constant 3 : index
    %55 = memref.load %arg0[%c1_55, %c3_56] : memref<2x8xi32, #tpu.memory_space<smem>>
    %56 = arith.index_cast %55 : i32 to index
    %c0_57 = arith.constant 0 : index
    %c0_58 = arith.constant 0 : index
    %57 = vector.load %arg2[%56, %c0_57, %c0_58] : memref<100x1x32xf32, #tpu.memory_space<vmem>>, vector<1x1x32xf32>
    %58 = vector.shape_cast %57 : vector<1x1x32xf32> to vector<1x32xf32>
    %c11 = arith.constant 11 : index
    %c0_59 = arith.constant 0 : index
    %59 = vector.load %arg36[%c11, %c0_59] : memref<16x32xf32, #tpu.memory_space<vmem>>, vector<1x32xf32>
    tpu.vector_store %arg36[%c11, %c0_59], %58 {strides = array<i32>} : memref<16x32xf32, #tpu.memory_space<vmem>>, vector<1x32xf32>,
    %c1_60 = arith.constant 1 : index
    %c4_61 = arith.constant 4 : index
    %60 = memref.load %arg0[%c1_60, %c4_61] : memref<2x8xi32, #tpu.memory_space<smem>>
    %61 = arith.index_cast %60 : i32 to index
    %c0_62 = arith.constant 0 : index
    %c0_63 = arith.constant 0 : index
    %62 = vector.load %arg2[%61, %c0_62, %c0_63] : memref<100x1x32xf32, #tpu.memory_space<vmem>>, vector<1x1x32xf32>
    %63 = vector.shape_cast %62 : vector<1x1x32xf32> to vector<1x32xf32>
    %c12 = arith.constant 12 : index
    %c0_64 = arith.constant 0 : index
    %64 = vector.load %arg36[%c12, %c0_64] : memref<16x32xf32, #tpu.memory_space<vmem>>, vector<1x32xf32>
    tpu.vector_store %arg36[%c12, %c0_64], %63 {strides = array<i32>} : memref<16x32xf32, #tpu.memory_space<vmem>>, vector<1x32xf32>,
    %c1_65 = arith.constant 1 : index
    %c5_66 = arith.constant 5 : index
    %65 = memref.load %arg0[%c1_65, %c5_66] : memref<2x8xi32, #tpu.memory_space<smem>>
    %66 = arith.index_cast %65 : i32 to index
    %c0_67 = arith.constant 0 : index
    %c0_68 = arith.constant 0 : index
    %67 = vector.load %arg2[%66, %c0_67, %c0_68] : memref<100x1x32xf32, #tpu.memory_space<vmem>>, vector<1x1x32xf32>
    %68 = vector.shape_cast %67 : vector<1x1x32xf32> to vector<1x32xf32>
    %c13 = arith.constant 13 : index
    %c0_69 = arith.constant 0 : index
    %69 = vector.load %arg36[%c13, %c0_69] : memref<16x32xf32, #tpu.memory_space<vmem>>, vector<1x32xf32>
    tpu.vector_store %arg36[%c13, %c0_69], %68 {strides = array<i32>} : memref<16x32xf32, #tpu.memory_space<vmem>>, vector<1x32xf32>,
    %c1_70 = arith.constant 1 : index
    %c6_71 = arith.constant 6 : index
    %70 = memref.load %arg0[%c1_70, %c6_71] : memref<2x8xi32, #tpu.memory_space<smem>>
    %71 = arith.index_cast %70 : i32 to index
    %c0_72 = arith.constant 0 : index
    %c0_73 = arith.constant 0 : index
    %72 = vector.load %arg2[%71, %c0_72, %c0_73] : memref<100x1x32xf32, #tpu.memory_space<vmem>>, vector<1x1x32xf32>
    %73 = vector.shape_cast %72 : vector<1x1x32xf32> to vector<1x32xf32>
    %c14 = arith.constant 14 : index
    %c0_74 = arith.constant 0 : index
    %74 = vector.load %arg36[%c14, %c0_74] : memref<16x32xf32, #tpu.memory_space<vmem>>, vector<1x32xf32>
    tpu.vector_store %arg36[%c14, %c0_74], %73 {strides = array<i32>} : memref<16x32xf32, #tpu.memory_space<vmem>>, vector<1x32xf32>,
    %c1_75 = arith.constant 1 : index
    %c7_76 = arith.constant 7 : index
    %75 = memref.load %arg0[%c1_75, %c7_76] : memref<2x8xi32, #tpu.memory_space<smem>>
    %76 = arith.index_cast %75 : i32 to index
    %c0_77 = arith.constant 0 : index
    %c0_78 = arith.constant 0 : index
    %77 = vector.load %arg2[%76, %c0_77, %c0_78] : memref<100x1x32xf32, #tpu.memory_space<vmem>>, vector<1x1x32xf32>
    %78 = vector.shape_cast %77 : vector<1x1x32xf32> to vector<1x32xf32>
    %c15 = arith.constant 15 : index
    %c0_79 = arith.constant 0 : index
    %79 = vector.load %arg36[%c15, %c0_79] : memref<16x32xf32, #tpu.memory_space<vmem>>, vector<1x32xf32>
    tpu.vector_store %arg36[%c15, %c0_79], %78 {strides = array<i32>} : memref<16x32xf32, #tpu.memory_space<vmem>>, vector<1x32xf32>,
    %c0_80 = arith.constant 0 : index
    %c0_81 = arith.constant 0 : index
    %80 = vector.load %arg36[%c0_80, %c0_81] : memref<16x32xf32, #tpu.memory_space<vmem>>, vector<16x32xf32>
    %c0_82 = arith.constant 0 : index
    %c0_83 = arith.constant 0 : index
    %81 = vector.load %arg3[%c0_82, %c0_83] : memref<16x32xf32, #tpu.memory_space<vmem>>, vector<16x32xf32>
    %82 = arith.addf %80, %81 : vector<16x32xf32>
    %c0_84 = arith.constant 0 : index
    %c0_85 = arith.constant 0 : index
    %83 = vector.load %arg4[%c0_84, %c0_85] : memref<1x32xf32, #tpu.memory_space<vmem>>, vector<1x32xf32>
    %c0_86 = arith.constant 0 : index
    %c0_87 = arith.constant 0 : index
    %84 = vector.load %arg5[%c0_86, %c0_87] : memref<1x32xf32, #tpu.memory_space<vmem>>, vector<1x32xf32>
    %cst = arith.constant dense<0.000000e+00> : vector<16xf32>
    %85 = vector.multi_reduction <add>, %82, %cst [1] : vector<16x32xf32> to vector<16xf32>
    %86 = vector.shape_cast %85 : vector<16xf32> to vector<16x1xf32>
    %cst_88 = arith.constant 3.200000e+01 : f32
    %87 = vector.broadcast %cst_88 : f32 to vector<16x1xf32>
    %88 = arith.divf %86, %87 : vector<16x1xf32>
    %89 = vector.broadcast %88 : vector<16x1xf32> to vector<16x32xf32>
    %90 = arith.subf %82, %89 : vector<16x32xf32>
    %91 = arith.mulf %90, %90 : vector<16x32xf32>
    %cst_89 = arith.constant dense<0.000000e+00> : vector<16xf32>
    %92 = vector.multi_reduction <add>, %91, %cst_89 [1] : vector<16x32xf32> to vector<16xf32>
    %93 = vector.shape_cast %92 : vector<16xf32> to vector<16x1xf32>
    %cst_90 = arith.constant 3.200000e+01 : f32
    %94 = vector.broadcast %cst_90 : f32 to vector<16x1xf32>
    %95 = arith.divf %93, %94 : vector<16x1xf32>
    %cst_91 = arith.constant 9.99999996E-13 : f32
    %96 = vector.broadcast %cst_91 : f32 to vector<16x1xf32>
    %97 = arith.addf %95, %96 : vector<16x1xf32>
    %98 = math.rsqrt %97 : vector<16x1xf32>
    %99 = vector.broadcast %98 : vector<16x1xf32> to vector<16x32xf32>
    %100 = arith.mulf %90, %99 : vector<16x32xf32>
    %101 = vector.broadcast %83 : vector<1x32xf32> to vector<16x32xf32>
    %102 = arith.mulf %100, %101 : vector<16x32xf32>
    %103 = vector.broadcast %84 : vector<1x32xf32> to vector<16x32xf32>
    %104 = arith.addf %102, %103 : vector<16x32xf32>
    %c0_92 = arith.constant 0 : index
    %c0_93 = arith.constant 0 : index
    %105 = vector.load %arg1[%c0_92, %c0_93] : memref<2x8xf32, #tpu.memory_space<vmem>>, vector<2x8xf32>
    %c0_94 = arith.constant 0 : index
    %c0_95 = arith.constant 0 : index
    %106 = vector.load %arg6[%c0_94, %c0_95] : memref<32x96xf32, #tpu.memory_space<vmem>>, vector<32x96xf32>
    %cst_96 = arith.constant dense<0.000000e+00> : vector<16x96xf32>
    %107 = tpu.matmul %104, %106, %cst_96 {dimension_numbers = #tpu.dot_dimension_numbers<[1], [0], [0], [1], [0, 0, 1, 1], [], []>} : vector<16x32xf32>, vector<32x96xf32>, vector<16x96xf32> -> vector<16x96xf32>
    %c0_97 = arith.constant 0 : index
    %c0_98 = arith.constant 0 : index
    %108 = vector.load %arg7[%c0_97, %c0_98] : memref<1x96xf32, #tpu.memory_space<vmem>>, vector<1x96xf32>
    %109 = vector.broadcast %108 : vector<1x96xf32> to vector<16x96xf32>
    %110 = arith.addf %107, %109 : vector<16x96xf32>
    %c0_99 = arith.constant 0 : index
    %c0_100 = arith.constant 0 : index
    %111 = vector.load %arg8[%c0_99, %c0_100] : memref<32x32xf32, #tpu.memory_space<vmem>>, vector<32x32xf32>
    %112 = vector.extract_strided_slice %105 {offsets = [0, 0], sizes = [1, 8], strides = [1, 1]} : vector<2x8xf32> to vector<1x8xf32>
    %113 = vector.extract_strided_slice %110 {offsets = [0, 0], sizes = [8, 16], strides = [1, 1]} : vector<16x96xf32> to vector<8x16xf32>
    %114 = vector.extract_strided_slice %110 {offsets = [0, 16], sizes = [8, 16], strides = [1, 1]} : vector<16x96xf32> to vector<8x16xf32>
    %115 = vector.extract_strided_slice %110 {offsets = [0, 32], sizes = [8, 16], strides = [1, 1]} : vector<16x96xf32> to vector<8x16xf32>
    %cst_101 = arith.constant dense<0.000000e+00> : vector<8x8xf32>
    %116 = tpu.matmul %113, %114, %cst_101 {dimension_numbers = #tpu.dot_dimension_numbers<[1], [1], [0], [0], [0, 0, 1, 0], [], []>} : vector<8x16xf32>, vector<8x16xf32>, vector<8x8xf32> -> vector<8x8xf32>
    %cst_102 = arith.constant 2.500000e-01 : f32
    %117 = vector.broadcast %cst_102 : f32 to vector<8x8xf32>
    %118 = arith.mulf %116, %117 : vector<8x8xf32>
    %119 = vector.broadcast %112 : vector<1x8xf32> to vector<8x8xf32>
    %120 = arith.addf %118, %119 : vector<8x8xf32>
    %cst_103 = arith.constant dense<0xFF800000> : vector<8xf32>
    %121 = vector.multi_reduction <maximumf>, %120, %cst_103 [1] : vector<8x8xf32> to vector<8xf32>
    %122 = vector.shape_cast %121 : vector<8xf32> to vector<8x1xf32>
    %123 = vector.broadcast %122 : vector<8x1xf32> to vector<8x8xf32>
    %124 = arith.subf %120, %123 : vector<8x8xf32>
    %125 = math.exp %124 : vector<8x8xf32>
    %cst_104 = arith.constant dense<0.000000e+00> : vector<8xf32>
    %126 = vector.multi_reduction <add>, %125, %cst_104 [1] : vector<8x8xf32> to vector<8xf32>
    %127 = vector.shape_cast %126 : vector<8xf32> to vector<8x1xf32>
    %128 = tpu.reciprocal %127 {approx = true} : vector<8x1xf32> -> vector<8x1xf32>
    %129 = vector.broadcast %128 : vector<8x1xf32> to vector<8x8xf32>
    %130 = arith.mulf %125, %129 : vector<8x8xf32>
    %cst_105 = arith.constant dense<0.000000e+00> : vector<8x16xf32>
    %131 = tpu.matmul %130, %115, %cst_105 {dimension_numbers = #tpu.dot_dimension_numbers<[1], [0], [0], [1], [0, 0, 1, 1], [], []>} : vector<8x8xf32>, vector<8x16xf32>, vector<8x16xf32> -> vector<8x16xf32>
    %132 = vector.extract_strided_slice %111 {offsets = [0, 0], sizes = [16, 32], strides = [1, 1]} : vector<32x32xf32> to vector<16x32xf32>
    %cst_106 = arith.constant dense<0.000000e+00> : vector<8x32xf32>
    %133 = tpu.matmul %131, %132, %cst_106 {dimension_numbers = #tpu.dot_dimension_numbers<[1], [0], [0], [1], [0, 0, 1, 1], [], []>} : vector<8x16xf32>, vector<16x32xf32>, vector<8x32xf32> -> vector<8x32xf32>
    %134 = vector.extract_strided_slice %110 {offsets = [0, 48], sizes = [8, 16], strides = [1, 1]} : vector<16x96xf32> to vector<8x16xf32>
    %135 = vector.extract_strided_slice %110 {offsets = [0, 64], sizes = [8, 16], strides = [1, 1]} : vector<16x96xf32> to vector<8x16xf32>
    %136 = vector.extract_strided_slice %110 {offsets = [0, 80], sizes = [8, 16], strides = [1, 1]} : vector<16x96xf32> to vector<8x16xf32>
    %cst_107 = arith.constant dense<0.000000e+00> : vector<8x8xf32>
    %137 = tpu.matmul %134, %135, %cst_107 {dimension_numbers = #tpu.dot_dimension_numbers<[1], [1], [0], [0], [0, 0, 1, 0], [], []>} : vector<8x16xf32>, vector<8x16xf32>, vector<8x8xf32> -> vector<8x8xf32>
    %cst_108 = arith.constant 2.500000e-01 : f32
    %138 = vector.broadcast %cst_108 : f32 to vector<8x8xf32>
    %139 = arith.mulf %137, %138 : vector<8x8xf32>
    %140 = vector.broadcast %112 : vector<1x8xf32> to vector<8x8xf32>
    %141 = arith.addf %139, %140 : vector<8x8xf32>
    %cst_109 = arith.constant dense<0xFF800000> : vector<8xf32>
    %142 = vector.multi_reduction <maximumf>, %141, %cst_109 [1] : vector<8x8xf32> to vector<8xf32>
    %143 = vector.shape_cast %142 : vector<8xf32> to vector<8x1xf32>
    %144 = vector.broadcast %143 : vector<8x1xf32> to vector<8x8xf32>
    %145 = arith.subf %141, %144 : vector<8x8xf32>
    %146 = math.exp %145 : vector<8x8xf32>
    %cst_110 = arith.constant dense<0.000000e+00> : vector<8xf32>
    %147 = vector.multi_reduction <add>, %146, %cst_110 [1] : vector<8x8xf32> to vector<8xf32>
    %148 = vector.shape_cast %147 : vector<8xf32> to vector<8x1xf32>
    %149 = tpu.reciprocal %148 {approx = true} : vector<8x1xf32> -> vector<8x1xf32>
    %150 = vector.broadcast %149 : vector<8x1xf32> to vector<8x8xf32>
    %151 = arith.mulf %146, %150 : vector<8x8xf32>
    %cst_111 = arith.constant dense<0.000000e+00> : vector<8x16xf32>
    %152 = tpu.matmul %151, %136, %cst_111 {dimension_numbers = #tpu.dot_dimension_numbers<[1], [0], [0], [1], [0, 0, 1, 1], [], []>} : vector<8x8xf32>, vector<8x16xf32>, vector<8x16xf32> -> vector<8x16xf32>
    %153 = vector.extract_strided_slice %111 {offsets = [16, 0], sizes = [16, 32], strides = [1, 1]} : vector<32x32xf32> to vector<16x32xf32>
    %cst_112 = arith.constant dense<0.000000e+00> : vector<8x32xf32>
    %154 = tpu.matmul %152, %153, %cst_112 {dimension_numbers = #tpu.dot_dimension_numbers<[1], [0], [0], [1], [0, 0, 1, 1], [], []>} : vector<8x16xf32>, vector<16x32xf32>, vector<8x32xf32> -> vector<8x32xf32>
    %155 = arith.addf %133, %154 : vector<8x32xf32>
    %156 = vector.extract_strided_slice %105 {offsets = [1, 0], sizes = [1, 8], strides = [1, 1]} : vector<2x8xf32> to vector<1x8xf32>
    %157 = vector.extract_strided_slice %110 {offsets = [8, 0], sizes = [8, 16], strides = [1, 1]} : vector<16x96xf32> to vector<8x16xf32>
    %158 = vector.extract_strided_slice %110 {offsets = [8, 16], sizes = [8, 16], strides = [1, 1]} : vector<16x96xf32> to vector<8x16xf32>
    %159 = vector.extract_strided_slice %110 {offsets = [8, 32], sizes = [8, 16], strides = [1, 1]} : vector<16x96xf32> to vector<8x16xf32>
    %cst_113 = arith.constant dense<0.000000e+00> : vector<8x8xf32>
    %160 = tpu.matmul %157, %158, %cst_113 {dimension_numbers = #tpu.dot_dimension_numbers<[1], [1], [0], [0], [0, 0, 1, 0], [], []>} : vector<8x16xf32>, vector<8x16xf32>, vector<8x8xf32> -> vector<8x8xf32>
    %cst_114 = arith.constant 2.500000e-01 : f32
    %161 = vector.broadcast %cst_114 : f32 to vector<8x8xf32>
    %162 = arith.mulf %160, %161 : vector<8x8xf32>
    %163 = vector.broadcast %156 : vector<1x8xf32> to vector<8x8xf32>
    %164 = arith.addf %162, %163 : vector<8x8xf32>
    %cst_115 = arith.constant dense<0xFF800000> : vector<8xf32>
    %165 = vector.multi_reduction <maximumf>, %164, %cst_115 [1] : vector<8x8xf32> to vector<8xf32>
    %166 = vector.shape_cast %165 : vector<8xf32> to vector<8x1xf32>
    %167 = vector.broadcast %166 : vector<8x1xf32> to vector<8x8xf32>
    %168 = arith.subf %164, %167 : vector<8x8xf32>
    %169 = math.exp %168 : vector<8x8xf32>
    %cst_116 = arith.constant dense<0.000000e+00> : vector<8xf32>
    %170 = vector.multi_reduction <add>, %169, %cst_116 [1] : vector<8x8xf32> to vector<8xf32>
    %171 = vector.shape_cast %170 : vector<8xf32> to vector<8x1xf32>
    %172 = tpu.reciprocal %171 {approx = true} : vector<8x1xf32> -> vector<8x1xf32>
    %173 = vector.broadcast %172 : vector<8x1xf32> to vector<8x8xf32>
    %174 = arith.mulf %169, %173 : vector<8x8xf32>
    %cst_117 = arith.constant dense<0.000000e+00> : vector<8x16xf32>
    %175 = tpu.matmul %174, %159, %cst_117 {dimension_numbers = #tpu.dot_dimension_numbers<[1], [0], [0], [1], [0, 0, 1, 1], [], []>} : vector<8x8xf32>, vector<8x16xf32>, vector<8x16xf32> -> vector<8x16xf32>
    %176 = vector.extract_strided_slice %111 {offsets = [0, 0], sizes = [16, 32], strides = [1, 1]} : vector<32x32xf32> to vector<16x32xf32>
    %cst_118 = arith.constant dense<0.000000e+00> : vector<8x32xf32>
    %177 = tpu.matmul %175, %176, %cst_118 {dimension_numbers = #tpu.dot_dimension_numbers<[1], [0], [0], [1], [0, 0, 1, 1], [], []>} : vector<8x16xf32>, vector<16x32xf32>, vector<8x32xf32> -> vector<8x32xf32>
    %178 = vector.extract_strided_slice %110 {offsets = [8, 48], sizes = [8, 16], strides = [1, 1]} : vector<16x96xf32> to vector<8x16xf32>
    %179 = vector.extract_strided_slice %110 {offsets = [8, 64], sizes = [8, 16], strides = [1, 1]} : vector<16x96xf32> to vector<8x16xf32>
    %180 = vector.extract_strided_slice %110 {offsets = [8, 80], sizes = [8, 16], strides = [1, 1]} : vector<16x96xf32> to vector<8x16xf32>
    %cst_119 = arith.constant dense<0.000000e+00> : vector<8x8xf32>
    %181 = tpu.matmul %178, %179, %cst_119 {dimension_numbers = #tpu.dot_dimension_numbers<[1], [1], [0], [0], [0, 0, 1, 0], [], []>} : vector<8x16xf32>, vector<8x16xf32>, vector<8x8xf32> -> vector<8x8xf32>
    %cst_120 = arith.constant 2.500000e-01 : f32
    %182 = vector.broadcast %cst_120 : f32 to vector<8x8xf32>
    %183 = arith.mulf %181, %182 : vector<8x8xf32>
    %184 = vector.broadcast %156 : vector<1x8xf32> to vector<8x8xf32>
    %185 = arith.addf %183, %184 : vector<8x8xf32>
    %cst_121 = arith.constant dense<0xFF800000> : vector<8xf32>
    %186 = vector.multi_reduction <maximumf>, %185, %cst_121 [1] : vector<8x8xf32> to vector<8xf32>
    %187 = vector.shape_cast %186 : vector<8xf32> to vector<8x1xf32>
    %188 = vector.broadcast %187 : vector<8x1xf32> to vector<8x8xf32>
    %189 = arith.subf %185, %188 : vector<8x8xf32>
    %190 = math.exp %189 : vector<8x8xf32>
    %cst_122 = arith.constant dense<0.000000e+00> : vector<8xf32>
    %191 = vector.multi_reduction <add>, %190, %cst_122 [1] : vector<8x8xf32> to vector<8xf32>
    %192 = vector.shape_cast %191 : vector<8xf32> to vector<8x1xf32>
    %193 = tpu.reciprocal %192 {approx = true} : vector<8x1xf32> -> vector<8x1xf32>
    %194 = vector.broadcast %193 : vector<8x1xf32> to vector<8x8xf32>
    %195 = arith.mulf %190, %194 : vector<8x8xf32>
    %cst_123 = arith.constant dense<0.000000e+00> : vector<8x16xf32>
    %196 = tpu.matmul %195, %180, %cst_123 {dimension_numbers = #tpu.dot_dimension_numbers<[1], [0], [0], [1], [0, 0, 1, 1], [], []>} : vector<8x8xf32>, vector<8x16xf32>, vector<8x16xf32> -> vector<8x16xf32>
    %197 = vector.extract_strided_slice %111 {offsets = [16, 0], sizes = [16, 32], strides = [1, 1]} : vector<32x32xf32> to vector<16x32xf32>
    %cst_124 = arith.constant dense<0.000000e+00> : vector<8x32xf32>
    %198 = tpu.matmul %196, %197, %cst_124 {dimension_numbers = #tpu.dot_dimension_numbers<[1], [0], [0], [1], [0, 0, 1, 1], [], []>} : vector<8x16xf32>, vector<16x32xf32>, vector<8x32xf32> -> vector<8x32xf32>
    %199 = arith.addf %177, %198 : vector<8x32xf32>
    %200 = tpu.concatenate %155, %199 in 0 : vector<8x32xf32>, vector<8x32xf32> -> vector<16x32xf32>
    %c0_125 = arith.constant 0 : index
    %c0_126 = arith.constant 0 : index
    %201 = vector.load %arg9[%c0_125, %c0_126] : memref<1x32xf32, #tpu.memory_space<vmem>>, vector<1x32xf32>
    %202 = vector.broadcast %201 : vector<1x32xf32> to vector<16x32xf32>
    %203 = arith.addf %200, %202 : vector<16x32xf32>
    %204 = arith.addf %104, %203 : vector<16x32xf32>
    %c0_127 = arith.constant 0 : index
    %c0_128 = arith.constant 0 : index
    %205 = vector.load %arg10[%c0_127, %c0_128] : memref<1x32xf32, #tpu.memory_space<vmem>>, vector<1x32xf32>
    %c0_129 = arith.constant 0 : index
    %c0_130 = arith.constant 0 : index
    %206 = vector.load %arg11[%c0_129, %c0_130] : memref<1x32xf32, #tpu.memory_space<vmem>>, vector<1x32xf32>
    %cst_131 = arith.constant dense<0.000000e+00> : vector<16xf32>
    %207 = vector.multi_reduction <add>, %204, %cst_131 [1] : vector<16x32xf32> to vector<16xf32>
    %208 = vector.shape_cast %207 : vector<16xf32> to vector<16x1xf32>
    %cst_132 = arith.constant 3.200000e+01 : f32
    %209 = vector.broadcast %cst_132 : f32 to vector<16x1xf32>
    %210 = arith.divf %208, %209 : vector<16x1xf32>
    %211 = vector.broadcast %210 : vector<16x1xf32> to vector<16x32xf32>
    %212 = arith.subf %204, %211 : vector<16x32xf32>
    %213 = arith.mulf %212, %212 : vector<16x32xf32>
    %cst_133 = arith.constant dense<0.000000e+00> : vector<16xf32>
    %214 = vector.multi_reduction <add>, %213, %cst_133 [1] : vector<16x32xf32> to vector<16xf32>
    %215 = vector.shape_cast %214 : vector<16xf32> to vector<16x1xf32>
    %cst_134 = arith.constant 3.200000e+01 : f32
    %216 = vector.broadcast %cst_134 : f32 to vector<16x1xf32>
    %217 = arith.divf %215, %216 : vector<16x1xf32>
    %cst_135 = arith.constant 9.99999996E-13 : f32
    %218 = vector.broadcast %cst_135 : f32 to vector<16x1xf32>
    %219 = arith.addf %217, %218 : vector<16x1xf32>
    %220 = math.rsqrt %219 : vector<16x1xf32>
    %221 = vector.broadcast %220 : vector<16x1xf32> to vector<16x32xf32>
    %222 = arith.mulf %212, %221 : vector<16x32xf32>
    %223 = vector.broadcast %205 : vector<1x32xf32> to vector<16x32xf32>
    %224 = arith.mulf %222, %223 : vector<16x32xf32>
    %225 = vector.broadcast %206 : vector<1x32xf32> to vector<16x32xf32>
    %226 = arith.addf %224, %225 : vector<16x32xf32>
    %c0_136 = arith.constant 0 : index
    %c0_137 = arith.constant 0 : index
    %227 = vector.load %arg12[%c0_136, %c0_137] : memref<32x64xf32, #tpu.memory_space<vmem>>, vector<32x64xf32>
    %cst_138 = arith.constant dense<0.000000e+00> : vector<16x64xf32>
    %228 = tpu.matmul %226, %227, %cst_138 {dimension_numbers = #tpu.dot_dimension_numbers<[1], [0], [0], [1], [0, 0, 1, 1], [], []>} : vector<16x32xf32>, vector<32x64xf32>, vector<16x64xf32> -> vector<16x64xf32>
    %c0_139 = arith.constant 0 : index
    %c0_140 = arith.constant 0 : index
    %229 = vector.load %arg13[%c0_139, %c0_140] : memref<1x64xf32, #tpu.memory_space<vmem>>, vector<1x64xf32>
    %230 = vector.broadcast %229 : vector<1x64xf32> to vector<16x64xf32>
    %231 = arith.addf %228, %230 : vector<16x64xf32>
    %cst_141 = arith.constant 5.000000e-01 : f32
    %232 = vector.broadcast %cst_141 : f32 to vector<16x64xf32>
    %233 = arith.mulf %232, %231 : vector<16x64xf32>
    %cst_142 = arith.constant 4.471500e-02 : f32
    %234 = vector.broadcast %cst_142 : f32 to vector<16x64xf32>
    %235 = arith.mulf %234, %231 : vector<16x64xf32>
    %236 = arith.mulf %235, %231 : vector<16x64xf32>
    %237 = arith.mulf %236, %231 : vector<16x64xf32>
    %238 = arith.addf %231, %237 : vector<16x64xf32>
    %cst_143 = arith.constant 0.797884583 : f32
    %239 = vector.broadcast %cst_143 : f32 to vector<16x64xf32>
    %240 = arith.mulf %239, %238 : vector<16x64xf32>
    %241 = math.tanh %240 : vector<16x64xf32>
    %cst_144 = arith.constant 1.000000e+00 : f32
    %242 = vector.broadcast %cst_144 : f32 to vector<16x64xf32>
    %243 = arith.addf %242, %241 : vector<16x64xf32>
    %244 = arith.mulf %233, %243 : vector<16x64xf32>
    %c0_145 = arith.constant 0 : index
    %c0_146 = arith.constant 0 : index
    %245 = vector.load %arg14[%c0_145, %c0_146] : memref<64x32xf32, #tpu.memory_space<vmem>>, vector<64x32xf32>
    %cst_147 = arith.constant dense<0.000000e+00> : vector<16x32xf32>
    %246 = tpu.matmul %244, %245, %cst_147 {dimension_numbers = #tpu.dot_dimension_numbers<[1], [0], [0], [1], [0, 0, 1, 1], [], []>} : vector<16x64xf32>, vector<64x32xf32>, vector<16x32xf32> -> vector<16x32xf32>
    %c0_148 = arith.constant 0 : index
    %c0_149 = arith.constant 0 : index
    %247 = vector.load %arg15[%c0_148, %c0_149] : memref<1x32xf32, #tpu.memory_space<vmem>>, vector<1x32xf32>
    %248 = vector.broadcast %247 : vector<1x32xf32> to vector<16x32xf32>
    %249 = arith.addf %246, %248 : vector<16x32xf32>
    %250 = arith.addf %226, %249 : vector<16x32xf32>
    %c0_150 = arith.constant 0 : index
    %c0_151 = arith.constant 0 : index
    %251 = vector.load %arg16[%c0_150, %c0_151] : memref<1x32xf32, #tpu.memory_space<vmem>>, vector<1x32xf32>
    %c0_152 = arith.constant 0 : index
    %c0_153 = arith.constant 0 : index
    %252 = vector.load %arg17[%c0_152, %c0_153] : memref<1x32xf32, #tpu.memory_space<vmem>>, vector<1x32xf32>
    %cst_154 = arith.constant dense<0.000000e+00> : vector<16xf32>
    %253 = vector.multi_reduction <add>, %250, %cst_154 [1] : vector<16x32xf32> to vector<16xf32>
    %254 = vector.shape_cast %253 : vector<16xf32> to vector<16x1xf32>
    %cst_155 = arith.constant 3.200000e+01 : f32
    %255 = vector.broadcast %cst_155 : f32 to vector<16x1xf32>
    %256 = arith.divf %254, %255 : vector<16x1xf32>
    %257 = vector.broadcast %256 : vector<16x1xf32> to vector<16x32xf32>
    %258 = arith.subf %250, %257 : vector<16x32xf32>
    %259 = arith.mulf %258, %258 : vector<16x32xf32>
    %cst_156 = arith.constant dense<0.000000e+00> : vector<16xf32>
    %260 = vector.multi_reduction <add>, %259, %cst_156 [1] : vector<16x32xf32> to vector<16xf32>
    %261 = vector.shape_cast %260 : vector<16xf32> to vector<16x1xf32>
    %cst_157 = arith.constant 3.200000e+01 : f32
    %262 = vector.broadcast %cst_157 : f32 to vector<16x1xf32>
    %263 = arith.divf %261, %262 : vector<16x1xf32>
    %cst_158 = arith.constant 9.99999996E-13 : f32
    %264 = vector.broadcast %cst_158 : f32 to vector<16x1xf32>
    %265 = arith.addf %263, %264 : vector<16x1xf32>
    %266 = math.rsqrt %265 : vector<16x1xf32>
    %267 = vector.broadcast %266 : vector<16x1xf32> to vector<16x32xf32>
    %268 = arith.mulf %258, %267 : vector<16x32xf32>
    %269 = vector.broadcast %251 : vector<1x32xf32> to vector<16x32xf32>
    %270 = arith.mulf %268, %269 : vector<16x32xf32>
    %271 = vector.broadcast %252 : vector<1x32xf32> to vector<16x32xf32>
    %272 = arith.addf %270, %271 : vector<16x32xf32>
    %c0_159 = arith.constant 0 : index
    %c0_160 = arith.constant 0 : index
    %273 = vector.load %arg18[%c0_159, %c0_160] : memref<32x96xf32, #tpu.memory_space<vmem>>, vector<32x96xf32>
    %cst_161 = arith.constant dense<0.000000e+00> : vector<16x96xf32>
    %274 = tpu.matmul %272, %273, %cst_161 {dimension_numbers = #tpu.dot_dimension_numbers<[1], [0], [0], [1], [0, 0, 1, 1], [], []>} : vector<16x32xf32>, vector<32x96xf32>, vector<16x96xf32> -> vector<16x96xf32>
    %c0_162 = arith.constant 0 : index
    %c0_163 = arith.constant 0 : index
    %275 = vector.load %arg19[%c0_162, %c0_163] : memref<1x96xf32, #tpu.memory_space<vmem>>, vector<1x96xf32>
    %276 = vector.broadcast %275 : vector<1x96xf32> to vector<16x96xf32>
    %277 = arith.addf %274, %276 : vector<16x96xf32>
    %c0_164 = arith.constant 0 : index
    %c0_165 = arith.constant 0 : index
    %278 = vector.load %arg20[%c0_164, %c0_165] : memref<32x32xf32, #tpu.memory_space<vmem>>, vector<32x32xf32>
    %279 = vector.extract_strided_slice %105 {offsets = [0, 0], sizes = [1, 8], strides = [1, 1]} : vector<2x8xf32> to vector<1x8xf32>
    %280 = vector.extract_strided_slice %277 {offsets = [0, 0], sizes = [8, 16], strides = [1, 1]} : vector<16x96xf32> to vector<8x16xf32>
    %281 = vector.extract_strided_slice %277 {offsets = [0, 16], sizes = [8, 16], strides = [1, 1]} : vector<16x96xf32> to vector<8x16xf32>
    %282 = vector.extract_strided_slice %277 {offsets = [0, 32], sizes = [8, 16], strides = [1, 1]} : vector<16x96xf32> to vector<8x16xf32>
    %cst_166 = arith.constant dense<0.000000e+00> : vector<8x8xf32>
    %283 = tpu.matmul %280, %281, %cst_166 {dimension_numbers = #tpu.dot_dimension_numbers<[1], [1], [0], [0], [0, 0, 1, 0], [], []>} : vector<8x16xf32>, vector<8x16xf32>, vector<8x8xf32> -> vector<8x8xf32>
    %cst_167 = arith.constant 2.500000e-01 : f32
    %284 = vector.broadcast %cst_167 : f32 to vector<8x8xf32>
    %285 = arith.mulf %283, %284 : vector<8x8xf32>
    %286 = vector.broadcast %279 : vector<1x8xf32> to vector<8x8xf32>
    %287 = arith.addf %285, %286 : vector<8x8xf32>
    %cst_168 = arith.constant dense<0xFF800000> : vector<8xf32>
    %288 = vector.multi_reduction <maximumf>, %287, %cst_168 [1] : vector<8x8xf32> to vector<8xf32>
    %289 = vector.shape_cast %288 : vector<8xf32> to vector<8x1xf32>
    %290 = vector.broadcast %289 : vector<8x1xf32> to vector<8x8xf32>
    %291 = arith.subf %287, %290 : vector<8x8xf32>
    %292 = math.exp %291 : vector<8x8xf32>
    %cst_169 = arith.constant dense<0.000000e+00> : vector<8xf32>
    %293 = vector.multi_reduction <add>, %292, %cst_169 [1] : vector<8x8xf32> to vector<8xf32>
    %294 = vector.shape_cast %293 : vector<8xf32> to vector<8x1xf32>
    %295 = tpu.reciprocal %294 {approx = true} : vector<8x1xf32> -> vector<8x1xf32>
    %296 = vector.broadcast %295 : vector<8x1xf32> to vector<8x8xf32>
    %297 = arith.mulf %292, %296 : vector<8x8xf32>
    %cst_170 = arith.constant dense<0.000000e+00> : vector<8x16xf32>
    %298 = tpu.matmul %297, %282, %cst_170 {dimension_numbers = #tpu.dot_dimension_numbers<[1], [0], [0], [1], [0, 0, 1, 1], [], []>} : vector<8x8xf32>, vector<8x16xf32>, vector<8x16xf32> -> vector<8x16xf32>
    %299 = vector.extract_strided_slice %278 {offsets = [0, 0], sizes = [16, 32], strides = [1, 1]} : vector<32x32xf32> to vector<16x32xf32>
    %cst_171 = arith.constant dense<0.000000e+00> : vector<8x32xf32>
    %300 = tpu.matmul %298, %299, %cst_171 {dimension_numbers = #tpu.dot_dimension_numbers<[1], [0], [0], [1], [0, 0, 1, 1], [], []>} : vector<8x16xf32>, vector<16x32xf32>, vector<8x32xf32> -> vector<8x32xf32>
    %301 = vector.extract_strided_slice %277 {offsets = [0, 48], sizes = [8, 16], strides = [1, 1]} : vector<16x96xf32> to vector<8x16xf32>
    %302 = vector.extract_strided_slice %277 {offsets = [0, 64], sizes = [8, 16], strides = [1, 1]} : vector<16x96xf32> to vector<8x16xf32>
    %303 = vector.extract_strided_slice %277 {offsets = [0, 80], sizes = [8, 16], strides = [1, 1]} : vector<16x96xf32> to vector<8x16xf32>
    %cst_172 = arith.constant dense<0.000000e+00> : vector<8x8xf32>
    %304 = tpu.matmul %301, %302, %cst_172 {dimension_numbers = #tpu.dot_dimension_numbers<[1], [1], [0], [0], [0, 0, 1, 0], [], []>} : vector<8x16xf32>, vector<8x16xf32>, vector<8x8xf32> -> vector<8x8xf32>
    %cst_173 = arith.constant 2.500000e-01 : f32
    %305 = vector.broadcast %cst_173 : f32 to vector<8x8xf32>
    %306 = arith.mulf %304, %305 : vector<8x8xf32>
    %307 = vector.broadcast %279 : vector<1x8xf32> to vector<8x8xf32>
    %308 = arith.addf %306, %307 : vector<8x8xf32>
    %cst_174 = arith.constant dense<0xFF800000> : vector<8xf32>
    %309 = vector.multi_reduction <maximumf>, %308, %cst_174 [1] : vector<8x8xf32> to vector<8xf32>
    %310 = vector.shape_cast %309 : vector<8xf32> to vector<8x1xf32>
    %311 = vector.broadcast %310 : vector<8x1xf32> to vector<8x8xf32>
    %312 = arith.subf %308, %311 : vector<8x8xf32>
    %313 = math.exp %312 : vector<8x8xf32>
    %cst_175 = arith.constant dense<0.000000e+00> : vector<8xf32>
    %314 = vector.multi_reduction <add>, %313, %cst_175 [1] : vector<8x8xf32> to vector<8xf32>
    %315 = vector.shape_cast %314 : vector<8xf32> to vector<8x1xf32>
    %316 = tpu.reciprocal %315 {approx = true} : vector<8x1xf32> -> vector<8x1xf32>
    %317 = vector.broadcast %316 : vector<8x1xf32> to vector<8x8xf32>
    %318 = arith.mulf %313, %317 : vector<8x8xf32>
    %cst_176 = arith.constant dense<0.000000e+00> : vector<8x16xf32>
    %319 = tpu.matmul %318, %303, %cst_176 {dimension_numbers = #tpu.dot_dimension_numbers<[1], [0], [0], [1], [0, 0, 1, 1], [], []>} : vector<8x8xf32>, vector<8x16xf32>, vector<8x16xf32> -> vector<8x16xf32>
    %320 = vector.extract_strided_slice %278 {offsets = [16, 0], sizes = [16, 32], strides = [1, 1]} : vector<32x32xf32> to vector<16x32xf32>
    %cst_177 = arith.constant dense<0.000000e+00> : vector<8x32xf32>
    %321 = tpu.matmul %319, %320, %cst_177 {dimension_numbers = #tpu.dot_dimension_numbers<[1], [0], [0], [1], [0, 0, 1, 1], [], []>} : vector<8x16xf32>, vector<16x32xf32>, vector<8x32xf32> -> vector<8x32xf32>
    %322 = arith.addf %300, %321 : vector<8x32xf32>
    %323 = vector.extract_strided_slice %105 {offsets = [1, 0], sizes = [1, 8], strides = [1, 1]} : vector<2x8xf32> to vector<1x8xf32>
    %324 = vector.extract_strided_slice %277 {offsets = [8, 0], sizes = [8, 16], strides = [1, 1]} : vector<16x96xf32> to vector<8x16xf32>
    %325 = vector.extract_strided_slice %277 {offsets = [8, 16], sizes = [8, 16], strides = [1, 1]} : vector<16x96xf32> to vector<8x16xf32>
    %326 = vector.extract_strided_slice %277 {offsets = [8, 32], sizes = [8, 16], strides = [1, 1]} : vector<16x96xf32> to vector<8x16xf32>
    %cst_178 = arith.constant dense<0.000000e+00> : vector<8x8xf32>
    %327 = tpu.matmul %324, %325, %cst_178 {dimension_numbers = #tpu.dot_dimension_numbers<[1], [1], [0], [0], [0, 0, 1, 0], [], []>} : vector<8x16xf32>, vector<8x16xf32>, vector<8x8xf32> -> vector<8x8xf32>
    %cst_179 = arith.constant 2.500000e-01 : f32
    %328 = vector.broadcast %cst_179 : f32 to vector<8x8xf32>
    %329 = arith.mulf %327, %328 : vector<8x8xf32>
    %330 = vector.broadcast %323 : vector<1x8xf32> to vector<8x8xf32>
    %331 = arith.addf %329, %330 : vector<8x8xf32>
    %cst_180 = arith.constant dense<0xFF800000> : vector<8xf32>
    %332 = vector.multi_reduction <maximumf>, %331, %cst_180 [1] : vector<8x8xf32> to vector<8xf32>
    %333 = vector.shape_cast %332 : vector<8xf32> to vector<8x1xf32>
    %334 = vector.broadcast %333 : vector<8x1xf32> to vector<8x8xf32>
    %335 = arith.subf %331, %334 : vector<8x8xf32>
    %336 = math.exp %335 : vector<8x8xf32>
    %cst_181 = arith.constant dense<0.000000e+00> : vector<8xf32>
    %337 = vector.multi_reduction <add>, %336, %cst_181 [1] : vector<8x8xf32> to vector<8xf32>
    %338 = vector.shape_cast %337 : vector<8xf32> to vector<8x1xf32>
    %339 = tpu.reciprocal %338 {approx = true} : vector<8x1xf32> -> vector<8x1xf32>
    %340 = vector.broadcast %339 : vector<8x1xf32> to vector<8x8xf32>
    %341 = arith.mulf %336, %340 : vector<8x8xf32>
    %cst_182 = arith.constant dense<0.000000e+00> : vector<8x16xf32>
    %342 = tpu.matmul %341, %326, %cst_182 {dimension_numbers = #tpu.dot_dimension_numbers<[1], [0], [0], [1], [0, 0, 1, 1], [], []>} : vector<8x8xf32>, vector<8x16xf32>, vector<8x16xf32> -> vector<8x16xf32>
    %343 = vector.extract_strided_slice %278 {offsets = [0, 0], sizes = [16, 32], strides = [1, 1]} : vector<32x32xf32> to vector<16x32xf32>
    %cst_183 = arith.constant dense<0.000000e+00> : vector<8x32xf32>
    %344 = tpu.matmul %342, %343, %cst_183 {dimension_numbers = #tpu.dot_dimension_numbers<[1], [0], [0], [1], [0, 0, 1, 1], [], []>} : vector<8x16xf32>, vector<16x32xf32>, vector<8x32xf32> -> vector<8x32xf32>
    %345 = vector.extract_strided_slice %277 {offsets = [8, 48], sizes = [8, 16], strides = [1, 1]} : vector<16x96xf32> to vector<8x16xf32>
    %346 = vector.extract_strided_slice %277 {offsets = [8, 64], sizes = [8, 16], strides = [1, 1]} : vector<16x96xf32> to vector<8x16xf32>
    %347 = vector.extract_strided_slice %277 {offsets = [8, 80], sizes = [8, 16], strides = [1, 1]} : vector<16x96xf32> to vector<8x16xf32>
    %cst_184 = arith.constant dense<0.000000e+00> : vector<8x8xf32>
    %348 = tpu.matmul %345, %346, %cst_184 {dimension_numbers = #tpu.dot_dimension_numbers<[1], [1], [0], [0], [0, 0, 1, 0], [], []>} : vector<8x16xf32>, vector<8x16xf32>, vector<8x8xf32> -> vector<8x8xf32>
    %cst_185 = arith.constant 2.500000e-01 : f32
    %349 = vector.broadcast %cst_185 : f32 to vector<8x8xf32>
    %350 = arith.mulf %348, %349 : vector<8x8xf32>
    %351 = vector.broadcast %323 : vector<1x8xf32> to vector<8x8xf32>
    %352 = arith.addf %350, %351 : vector<8x8xf32>
    %cst_186 = arith.constant dense<0xFF800000> : vector<8xf32>
    %353 = vector.multi_reduction <maximumf>, %352, %cst_186 [1] : vector<8x8xf32> to vector<8xf32>
    %354 = vector.shape_cast %353 : vector<8xf32> to vector<8x1xf32>
    %355 = vector.broadcast %354 : vector<8x1xf32> to vector<8x8xf32>
    %356 = arith.subf %352, %355 : vector<8x8xf32>
    %357 = math.exp %356 : vector<8x8xf32>
    %cst_187 = arith.constant dense<0.000000e+00> : vector<8xf32>
    %358 = vector.multi_reduction <add>, %357, %cst_187 [1] : vector<8x8xf32> to vector<8xf32>
    %359 = vector.shape_cast %358 : vector<8xf32> to vector<8x1xf32>
    %360 = tpu.reciprocal %359 {approx = true} : vector<8x1xf32> -> vector<8x1xf32>
    %361 = vector.broadcast %360 : vector<8x1xf32> to vector<8x8xf32>
    %362 = arith.mulf %357, %361 : vector<8x8xf32>
    %cst_188 = arith.constant dense<0.000000e+00> : vector<8x16xf32>
    %363 = tpu.matmul %362, %347, %cst_188 {dimension_numbers = #tpu.dot_dimension_numbers<[1], [0], [0], [1], [0, 0, 1, 1], [], []>} : vector<8x8xf32>, vector<8x16xf32>, vector<8x16xf32> -> vector<8x16xf32>
    %364 = vector.extract_strided_slice %278 {offsets = [16, 0], sizes = [16, 32], strides = [1, 1]} : vector<32x32xf32> to vector<16x32xf32>
    %cst_189 = arith.constant dense<0.000000e+00> : vector<8x32xf32>
    %365 = tpu.matmul %363, %364, %cst_189 {dimension_numbers = #tpu.dot_dimension_numbers<[1], [0], [0], [1], [0, 0, 1, 1], [], []>} : vector<8x16xf32>, vector<16x32xf32>, vector<8x32xf32> -> vector<8x32xf32>
    %366 = arith.addf %344, %365 : vector<8x32xf32>
    %367 = tpu.concatenate %322, %366 in 0 : vector<8x32xf32>, vector<8x32xf32> -> vector<16x32xf32>
    %c0_190 = arith.constant 0 : index
    %c0_191 = arith.constant 0 : index
    %368 = vector.load %arg21[%c0_190, %c0_191] : memref<1x32xf32, #tpu.memory_space<vmem>>, vector<1x32xf32>
    %369 = vector.broadcast %368 : vector<1x32xf32> to vector<16x32xf32>
    %370 = arith.addf %367, %369 : vector<16x32xf32>
    %371 = arith.addf %272, %370 : vector<16x32xf32>
    %c0_192 = arith.constant 0 : index
    %c0_193 = arith.constant 0 : index
    %372 = vector.load %arg22[%c0_192, %c0_193] : memref<1x32xf32, #tpu.memory_space<vmem>>, vector<1x32xf32>
    %c0_194 = arith.constant 0 : index
    %c0_195 = arith.constant 0 : index
    %373 = vector.load %arg23[%c0_194, %c0_195] : memref<1x32xf32, #tpu.memory_space<vmem>>, vector<1x32xf32>
    %cst_196 = arith.constant dense<0.000000e+00> : vector<16xf32>
    %374 = vector.multi_reduction <add>, %371, %cst_196 [1] : vector<16x32xf32> to vector<16xf32>
    %375 = vector.shape_cast %374 : vector<16xf32> to vector<16x1xf32>
    %cst_197 = arith.constant 3.200000e+01 : f32
    %376 = vector.broadcast %cst_197 : f32 to vector<16x1xf32>
    %377 = arith.divf %375, %376 : vector<16x1xf32>
    %378 = vector.broadcast %377 : vector<16x1xf32> to vector<16x32xf32>
    %379 = arith.subf %371, %378 : vector<16x32xf32>
    %380 = arith.mulf %379, %379 : vector<16x32xf32>
    %cst_198 = arith.constant dense<0.000000e+00> : vector<16xf32>
    %381 = vector.multi_reduction <add>, %380, %cst_198 [1] : vector<16x32xf32> to vector<16xf32>
    %382 = vector.shape_cast %381 : vector<16xf32> to vector<16x1xf32>
    %cst_199 = arith.constant 3.200000e+01 : f32
    %383 = vector.broadcast %cst_199 : f32 to vector<16x1xf32>
    %384 = arith.divf %382, %383 : vector<16x1xf32>
    %cst_200 = arith.constant 9.99999996E-13 : f32
    %385 = vector.broadcast %cst_200 : f32 to vector<16x1xf32>
    %386 = arith.addf %384, %385 : vector<16x1xf32>
    %387 = math.rsqrt %386 : vector<16x1xf32>
    %388 = vector.broadcast %387 : vector<16x1xf32> to vector<16x32xf32>
    %389 = arith.mulf %379, %388 : vector<16x32xf32>
    %390 = vector.broadcast %372 : vector<1x32xf32> to vector<16x32xf32>
    %391 = arith.mulf %389, %390 : vector<16x32xf32>
    %392 = vector.broadcast %373 : vector<1x32xf32> to vector<16x32xf32>
    %393 = arith.addf %391, %392 : vector<16x32xf32>
    %c0_201 = arith.constant 0 : index
    %c0_202 = arith.constant 0 : index
    %394 = vector.load %arg24[%c0_201, %c0_202] : memref<32x64xf32, #tpu.memory_space<vmem>>, vector<32x64xf32>
    %cst_203 = arith.constant dense<0.000000e+00> : vector<16x64xf32>
    %395 = tpu.matmul %393, %394, %cst_203 {dimension_numbers = #tpu.dot_dimension_numbers<[1], [0], [0], [1], [0, 0, 1, 1], [], []>} : vector<16x32xf32>, vector<32x64xf32>, vector<16x64xf32> -> vector<16x64xf32>
    %c0_204 = arith.constant 0 : index
    %c0_205 = arith.constant 0 : index
    %396 = vector.load %arg25[%c0_204, %c0_205] : memref<1x64xf32, #tpu.memory_space<vmem>>, vector<1x64xf32>
    %397 = vector.broadcast %396 : vector<1x64xf32> to vector<16x64xf32>
    %398 = arith.addf %395, %397 : vector<16x64xf32>
    %cst_206 = arith.constant 5.000000e-01 : f32
    %399 = vector.broadcast %cst_206 : f32 to vector<16x64xf32>
    %400 = arith.mulf %399, %398 : vector<16x64xf32>
    %cst_207 = arith.constant 4.471500e-02 : f32
    %401 = vector.broadcast %cst_207 : f32 to vector<16x64xf32>
    %402 = arith.mulf %401, %398 : vector<16x64xf32>
    %403 = arith.mulf %402, %398 : vector<16x64xf32>
    %404 = arith.mulf %403, %398 : vector<16x64xf32>
    %405 = arith.addf %398, %404 : vector<16x64xf32>
    %cst_208 = arith.constant 0.797884583 : f32
    %406 = vector.broadcast %cst_208 : f32 to vector<16x64xf32>
    %407 = arith.mulf %406, %405 : vector<16x64xf32>
    %408 = math.tanh %407 : vector<16x64xf32>
    %cst_209 = arith.constant 1.000000e+00 : f32
    %409 = vector.broadcast %cst_209 : f32 to vector<16x64xf32>
    %410 = arith.addf %409, %408 : vector<16x64xf32>
    %411 = arith.mulf %400, %410 : vector<16x64xf32>
    %c0_210 = arith.constant 0 : index
    %c0_211 = arith.constant 0 : index
    %412 = vector.load %arg26[%c0_210, %c0_211] : memref<64x32xf32, #tpu.memory_space<vmem>>, vector<64x32xf32>
    %cst_212 = arith.constant dense<0.000000e+00> : vector<16x32xf32>
    %413 = tpu.matmul %411, %412, %cst_212 {dimension_numbers = #tpu.dot_dimension_numbers<[1], [0], [0], [1], [0, 0, 1, 1], [], []>} : vector<16x64xf32>, vector<64x32xf32>, vector<16x32xf32> -> vector<16x32xf32>
    %c0_213 = arith.constant 0 : index
    %c0_214 = arith.constant 0 : index
    %414 = vector.load %arg27[%c0_213, %c0_214] : memref<1x32xf32, #tpu.memory_space<vmem>>, vector<1x32xf32>
    %415 = vector.broadcast %414 : vector<1x32xf32> to vector<16x32xf32>
    %416 = arith.addf %413, %415 : vector<16x32xf32>
    %417 = arith.addf %393, %416 : vector<16x32xf32>
    %c0_215 = arith.constant 0 : index
    %c0_216 = arith.constant 0 : index
    %418 = vector.load %arg28[%c0_215, %c0_216] : memref<1x32xf32, #tpu.memory_space<vmem>>, vector<1x32xf32>
    %c0_217 = arith.constant 0 : index
    %c0_218 = arith.constant 0 : index
    %419 = vector.load %arg29[%c0_217, %c0_218] : memref<1x32xf32, #tpu.memory_space<vmem>>, vector<1x32xf32>
    %cst_219 = arith.constant dense<0.000000e+00> : vector<16xf32>
    %420 = vector.multi_reduction <add>, %417, %cst_219 [1] : vector<16x32xf32> to vector<16xf32>
    %421 = vector.shape_cast %420 : vector<16xf32> to vector<16x1xf32>
    %cst_220 = arith.constant 3.200000e+01 : f32
    %422 = vector.broadcast %cst_220 : f32 to vector<16x1xf32>
    %423 = arith.divf %421, %422 : vector<16x1xf32>
    %424 = vector.broadcast %423 : vector<16x1xf32> to vector<16x32xf32>
    %425 = arith.subf %417, %424 : vector<16x32xf32>
    %426 = arith.mulf %425, %425 : vector<16x32xf32>
    %cst_221 = arith.constant dense<0.000000e+00> : vector<16xf32>
    %427 = vector.multi_reduction <add>, %426, %cst_221 [1] : vector<16x32xf32> to vector<16xf32>
    %428 = vector.shape_cast %427 : vector<16xf32> to vector<16x1xf32>
    %cst_222 = arith.constant 3.200000e+01 : f32
    %429 = vector.broadcast %cst_222 : f32 to vector<16x1xf32>
    %430 = arith.divf %428, %429 : vector<16x1xf32>
    %cst_223 = arith.constant 9.99999996E-13 : f32
    %431 = vector.broadcast %cst_223 : f32 to vector<16x1xf32>
    %432 = arith.addf %430, %431 : vector<16x1xf32>
    %433 = math.rsqrt %432 : vector<16x1xf32>
    %434 = vector.broadcast %433 : vector<16x1xf32> to vector<16x32xf32>
    %435 = arith.mulf %425, %434 : vector<16x32xf32>
    %436 = vector.broadcast %418 : vector<1x32xf32> to vector<16x32xf32>
    %437 = arith.mulf %435, %436 : vector<16x32xf32>
    %438 = vector.broadcast %419 : vector<1x32xf32> to vector<16x32xf32>
    %439 = arith.addf %437, %438 : vector<16x32xf32>
    %c0_224 = arith.constant 0 : index
    %c0_225 = arith.constant 0 : index
    %440 = vector.load %arg30[%c0_224, %c0_225] : memref<32x128xf32, #tpu.memory_space<vmem>>, vector<32x128xf32>
    %cst_226 = arith.constant dense<0.000000e+00> : vector<16x128xf32>
    %441 = tpu.matmul %439, %440, %cst_226 {dimension_numbers = #tpu.dot_dimension_numbers<[1], [0], [0], [1], [0, 0, 1, 1], [], []>} : vector<16x32xf32>, vector<32x128xf32>, vector<16x128xf32> -> vector<16x128xf32>
    %c0_227 = arith.constant 0 : index
    %c0_228 = arith.constant 0 : index
    %442 = vector.load %arg32[%c0_227, %c0_228] : memref<1x128xf32, #tpu.memory_space<vmem>>, vector<1x128xf32>
    %443 = vector.broadcast %442 : vector<1x128xf32> to vector<16x128xf32>
    %444 = arith.addf %441, %443 : vector<16x128xf32>
    %445 = vector.shape_cast %444 : vector<16x128xf32> to vector<2x8x128xf32>
    %c0_229 = arith.constant 0 : index
    %c0_230 = arith.constant 0 : index
    %446 = vector.load %arg31[%c0_229, %c0_230] : memref<32x128xf32, #tpu.memory_space<vmem>>, vector<32x128xf32>
    %cst_231 = arith.constant 0.000000e+00 : f32
    %447 = vector.broadcast %cst_231 : f32 to vector<2x32xf32>
    %cst_232 = arith.constant 0.000000e+00 : f32
    %448 = vector.broadcast %cst_232 : f32 to vector<2x32xf32>
    %cst_233 = arith.constant dense<0.000000e+00> : vector<2x128xf32>
    %449 = tpu.matmul %447, %446, %cst_233 {dimension_numbers = #tpu.dot_dimension_numbers<[1], [0], [0], [1], [0, 0, 1, 1], [], []>} : vector<2x32xf32>, vector<32x128xf32>, vector<2x128xf32> -> vector<2x128xf32>
    %450 = vector.extract_strided_slice %445 {offsets = [0, 0, 0], sizes = [2, 1, 128], strides = [1, 1, 1]} : vector<2x8x128xf32> to vector<2x1x128xf32>
    %451 = vector.shape_cast %450 : vector<2x1x128xf32> to vector<2x128xf32>
    %452 = arith.addf %449, %451 : vector<2x128xf32>
    %453 = vector.extract_strided_slice %452 {offsets = [0, 0], sizes = [2, 32], strides = [1, 1]} : vector<2x128xf32> to vector<2x32xf32>
    %454 = arith.negf %453 : vector<2x32xf32>
    %455 = math.exp %454 : vector<2x32xf32>
    %cst_234 = arith.constant 1.000000e+00 : f32
    %456 = vector.broadcast %cst_234 : f32 to vector<2x32xf32>
    %457 = arith.addf %456, %455 : vector<2x32xf32>
    %458 = arith.divf %456, %457 : vector<2x32xf32>
    %459 = vector.extract_strided_slice %452 {offsets = [0, 32], sizes = [2, 32], strides = [1, 1]} : vector<2x128xf32> to vector<2x32xf32>
    %460 = arith.negf %459 : vector<2x32xf32>
    %461 = math.exp %460 : vector<2x32xf32>
    %cst_235 = arith.constant 1.000000e+00 : f32
    %462 = vector.broadcast %cst_235 : f32 to vector<2x32xf32>
    %463 = arith.addf %462, %461 : vector<2x32xf32>
    %464 = arith.divf %462, %463 : vector<2x32xf32>
    %465 = vector.extract_strided_slice %452 {offsets = [0, 64], sizes = [2, 32], strides = [1, 1]} : vector<2x128xf32> to vector<2x32xf32>
    %466 = math.tanh %465 : vector<2x32xf32>
    %467 = vector.extract_strided_slice %452 {offsets = [0, 96], sizes = [2, 32], strides = [1, 1]} : vector<2x128xf32> to vector<2x32xf32>
    %468 = arith.negf %467 : vector<2x32xf32>
    %469 = math.exp %468 : vector<2x32xf32>
    %cst_236 = arith.constant 1.000000e+00 : f32
    %470 = vector.broadcast %cst_236 : f32 to vector<2x32xf32>
    %471 = arith.addf %470, %469 : vector<2x32xf32>
    %472 = arith.divf %470, %471 : vector<2x32xf32>
    %473 = arith.mulf %464, %448 : vector<2x32xf32>
    %474 = arith.mulf %458, %466 : vector<2x32xf32>
    %475 = arith.addf %473, %474 : vector<2x32xf32>
    %476 = math.tanh %475 : vector<2x32xf32>
    %477 = arith.mulf %472, %476 : vector<2x32xf32>
    %cst_237 = arith.constant dense<0.000000e+00> : vector<2x128xf32>
    %478 = tpu.matmul %477, %446, %cst_237 {dimension_numbers = #tpu.dot_dimension_numbers<[1], [0], [0], [1], [0, 0, 1, 1], [], []>} : vector<2x32xf32>, vector<32x128xf32>, vector<2x128xf32> -> vector<2x128xf32>
    %479 = vector.extract_strided_slice %445 {offsets = [0, 1, 0], sizes = [2, 1, 128], strides = [1, 1, 1]} : vector<2x8x128xf32> to vector<2x1x128xf32>
    %480 = vector.shape_cast %479 : vector<2x1x128xf32> to vector<2x128xf32>
    %481 = arith.addf %478, %480 : vector<2x128xf32>
    %482 = vector.extract_strided_slice %481 {offsets = [0, 0], sizes = [2, 32], strides = [1, 1]} : vector<2x128xf32> to vector<2x32xf32>
    %483 = arith.negf %482 : vector<2x32xf32>
    %484 = math.exp %483 : vector<2x32xf32>
    %cst_238 = arith.constant 1.000000e+00 : f32
    %485 = vector.broadcast %cst_238 : f32 to vector<2x32xf32>
    %486 = arith.addf %485, %484 : vector<2x32xf32>
    %487 = arith.divf %485, %486 : vector<2x32xf32>
    %488 = vector.extract_strided_slice %481 {offsets = [0, 32], sizes = [2, 32], strides = [1, 1]} : vector<2x128xf32> to vector<2x32xf32>
    %489 = arith.negf %488 : vector<2x32xf32>
    %490 = math.exp %489 : vector<2x32xf32>
    %cst_239 = arith.constant 1.000000e+00 : f32
    %491 = vector.broadcast %cst_239 : f32 to vector<2x32xf32>
    %492 = arith.addf %491, %490 : vector<2x32xf32>
    %493 = arith.divf %491, %492 : vector<2x32xf32>
    %494 = vector.extract_strided_slice %481 {offsets = [0, 64], sizes = [2, 32], strides = [1, 1]} : vector<2x128xf32> to vector<2x32xf32>
    %495 = math.tanh %494 : vector<2x32xf32>
    %496 = vector.extract_strided_slice %481 {offsets = [0, 96], sizes = [2, 32], strides = [1, 1]} : vector<2x128xf32> to vector<2x32xf32>
    %497 = arith.negf %496 : vector<2x32xf32>
    %498 = math.exp %497 : vector<2x32xf32>
    %cst_240 = arith.constant 1.000000e+00 : f32
    %499 = vector.broadcast %cst_240 : f32 to vector<2x32xf32>
    %500 = arith.addf %499, %498 : vector<2x32xf32>
    %501 = arith.divf %499, %500 : vector<2x32xf32>
    %502 = arith.mulf %493, %475 : vector<2x32xf32>
    %503 = arith.mulf %487, %495 : vector<2x32xf32>
    %504 = arith.addf %502, %503 : vector<2x32xf32>
    %505 = math.tanh %504 : vector<2x32xf32>
    %506 = arith.mulf %501, %505 : vector<2x32xf32>
    %cst_241 = arith.constant dense<0.000000e+00> : vector<2x128xf32>
    %507 = tpu.matmul %506, %446, %cst_241 {dimension_numbers = #tpu.dot_dimension_numbers<[1], [0], [0], [1], [0, 0, 1, 1], [], []>} : vector<2x32xf32>, vector<32x128xf32>, vector<2x128xf32> -> vector<2x128xf32>
    %508 = vector.extract_strided_slice %445 {offsets = [0, 2, 0], sizes = [2, 1, 128], strides = [1, 1, 1]} : vector<2x8x128xf32> to vector<2x1x128xf32>
    %509 = vector.shape_cast %508 : vector<2x1x128xf32> to vector<2x128xf32>
    %510 = arith.addf %507, %509 : vector<2x128xf32>
    %511 = vector.extract_strided_slice %510 {offsets = [0, 0], sizes = [2, 32], strides = [1, 1]} : vector<2x128xf32> to vector<2x32xf32>
    %512 = arith.negf %511 : vector<2x32xf32>
    %513 = math.exp %512 : vector<2x32xf32>
    %cst_242 = arith.constant 1.000000e+00 : f32
    %514 = vector.broadcast %cst_242 : f32 to vector<2x32xf32>
    %515 = arith.addf %514, %513 : vector<2x32xf32>
    %516 = arith.divf %514, %515 : vector<2x32xf32>
    %517 = vector.extract_strided_slice %510 {offsets = [0, 32], sizes = [2, 32], strides = [1, 1]} : vector<2x128xf32> to vector<2x32xf32>
    %518 = arith.negf %517 : vector<2x32xf32>
    %519 = math.exp %518 : vector<2x32xf32>
    %cst_243 = arith.constant 1.000000e+00 : f32
    %520 = vector.broadcast %cst_243 : f32 to vector<2x32xf32>
    %521 = arith.addf %520, %519 : vector<2x32xf32>
    %522 = arith.divf %520, %521 : vector<2x32xf32>
    %523 = vector.extract_strided_slice %510 {offsets = [0, 64], sizes = [2, 32], strides = [1, 1]} : vector<2x128xf32> to vector<2x32xf32>
    %524 = math.tanh %523 : vector<2x32xf32>
    %525 = vector.extract_strided_slice %510 {offsets = [0, 96], sizes = [2, 32], strides = [1, 1]} : vector<2x128xf32> to vector<2x32xf32>
    %526 = arith.negf %525 : vector<2x32xf32>
    %527 = math.exp %526 : vector<2x32xf32>
    %cst_244 = arith.constant 1.000000e+00 : f32
    %528 = vector.broadcast %cst_244 : f32 to vector<2x32xf32>
    %529 = arith.addf %528, %527 : vector<2x32xf32>
    %530 = arith.divf %528, %529 : vector<2x32xf32>
    %531 = arith.mulf %522, %504 : vector<2x32xf32>
    %532 = arith.mulf %516, %524 : vector<2x32xf32>
    %533 = arith.addf %531, %532 : vector<2x32xf32>
    %534 = math.tanh %533 : vector<2x32xf32>
    %535 = arith.mulf %530, %534 : vector<2x32xf32>
    %cst_245 = arith.constant dense<0.000000e+00> : vector<2x128xf32>
    %536 = tpu.matmul %535, %446, %cst_245 {dimension_numbers = #tpu.dot_dimension_numbers<[1], [0], [0], [1], [0, 0, 1, 1], [], []>} : vector<2x32xf32>, vector<32x128xf32>, vector<2x128xf32> -> vector<2x128xf32>
    %537 = vector.extract_strided_slice %445 {offsets = [0, 3, 0], sizes = [2, 1, 128], strides = [1, 1, 1]} : vector<2x8x128xf32> to vector<2x1x128xf32>
    %538 = vector.shape_cast %537 : vector<2x1x128xf32> to vector<2x128xf32>
    %539 = arith.addf %536, %538 : vector<2x128xf32>
    %540 = vector.extract_strided_slice %539 {offsets = [0, 0], sizes = [2, 32], strides = [1, 1]} : vector<2x128xf32> to vector<2x32xf32>
    %541 = arith.negf %540 : vector<2x32xf32>
    %542 = math.exp %541 : vector<2x32xf32>
    %cst_246 = arith.constant 1.000000e+00 : f32
    %543 = vector.broadcast %cst_246 : f32 to vector<2x32xf32>
    %544 = arith.addf %543, %542 : vector<2x32xf32>
    %545 = arith.divf %543, %544 : vector<2x32xf32>
    %546 = vector.extract_strided_slice %539 {offsets = [0, 32], sizes = [2, 32], strides = [1, 1]} : vector<2x128xf32> to vector<2x32xf32>
    %547 = arith.negf %546 : vector<2x32xf32>
    %548 = math.exp %547 : vector<2x32xf32>
    %cst_247 = arith.constant 1.000000e+00 : f32
    %549 = vector.broadcast %cst_247 : f32 to vector<2x32xf32>
    %550 = arith.addf %549, %548 : vector<2x32xf32>
    %551 = arith.divf %549, %550 : vector<2x32xf32>
    %552 = vector.extract_strided_slice %539 {offsets = [0, 64], sizes = [2, 32], strides = [1, 1]} : vector<2x128xf32> to vector<2x32xf32>
    %553 = math.tanh %552 : vector<2x32xf32>
    %554 = vector.extract_strided_slice %539 {offsets = [0, 96], sizes = [2, 32], strides = [1, 1]} : vector<2x128xf32> to vector<2x32xf32>
    %555 = arith.negf %554 : vector<2x32xf32>
    %556 = math.exp %555 : vector<2x32xf32>
    %cst_248 = arith.constant 1.000000e+00 : f32
    %557 = vector.broadcast %cst_248 : f32 to vector<2x32xf32>
    %558 = arith.addf %557, %556 : vector<2x32xf32>
    %559 = arith.divf %557, %558 : vector<2x32xf32>
    %560 = arith.mulf %551, %533 : vector<2x32xf32>
    %561 = arith.mulf %545, %553 : vector<2x32xf32>
    %562 = arith.addf %560, %561 : vector<2x32xf32>
    %563 = math.tanh %562 : vector<2x32xf32>
    %564 = arith.mulf %559, %563 : vector<2x32xf32>
    %cst_249 = arith.constant dense<0.000000e+00> : vector<2x128xf32>
    %565 = tpu.matmul %564, %446, %cst_249 {dimension_numbers = #tpu.dot_dimension_numbers<[1], [0], [0], [1], [0, 0, 1, 1], [], []>} : vector<2x32xf32>, vector<32x128xf32>, vector<2x128xf32> -> vector<2x128xf32>
    %566 = vector.extract_strided_slice %445 {offsets = [0, 4, 0], sizes = [2, 1, 128], strides = [1, 1, 1]} : vector<2x8x128xf32> to vector<2x1x128xf32>
    %567 = vector.shape_cast %566 : vector<2x1x128xf32> to vector<2x128xf32>
    %568 = arith.addf %565, %567 : vector<2x128xf32>
    %569 = vector.extract_strided_slice %568 {offsets = [0, 0], sizes = [2, 32], strides = [1, 1]} : vector<2x128xf32> to vector<2x32xf32>
    %570 = arith.negf %569 : vector<2x32xf32>
    %571 = math.exp %570 : vector<2x32xf32>
    %cst_250 = arith.constant 1.000000e+00 : f32
    %572 = vector.broadcast %cst_250 : f32 to vector<2x32xf32>
    %573 = arith.addf %572, %571 : vector<2x32xf32>
    %574 = arith.divf %572, %573 : vector<2x32xf32>
    %575 = vector.extract_strided_slice %568 {offsets = [0, 32], sizes = [2, 32], strides = [1, 1]} : vector<2x128xf32> to vector<2x32xf32>
    %576 = arith.negf %575 : vector<2x32xf32>
    %577 = math.exp %576 : vector<2x32xf32>
    %cst_251 = arith.constant 1.000000e+00 : f32
    %578 = vector.broadcast %cst_251 : f32 to vector<2x32xf32>
    %579 = arith.addf %578, %577 : vector<2x32xf32>
    %580 = arith.divf %578, %579 : vector<2x32xf32>
    %581 = vector.extract_strided_slice %568 {offsets = [0, 64], sizes = [2, 32], strides = [1, 1]} : vector<2x128xf32> to vector<2x32xf32>
    %582 = math.tanh %581 : vector<2x32xf32>
    %583 = vector.extract_strided_slice %568 {offsets = [0, 96], sizes = [2, 32], strides = [1, 1]} : vector<2x128xf32> to vector<2x32xf32>
    %584 = arith.negf %583 : vector<2x32xf32>
    %585 = math.exp %584 : vector<2x32xf32>
    %cst_252 = arith.constant 1.000000e+00 : f32
    %586 = vector.broadcast %cst_252 : f32 to vector<2x32xf32>
    %587 = arith.addf %586, %585 : vector<2x32xf32>
    %588 = arith.divf %586, %587 : vector<2x32xf32>
    %589 = arith.mulf %580, %562 : vector<2x32xf32>
    %590 = arith.mulf %574, %582 : vector<2x32xf32>
    %591 = arith.addf %589, %590 : vector<2x32xf32>
    %592 = math.tanh %591 : vector<2x32xf32>
    %593 = arith.mulf %588, %592 : vector<2x32xf32>
    %cst_253 = arith.constant dense<0.000000e+00> : vector<2x128xf32>
    %594 = tpu.matmul %593, %446, %cst_253 {dimension_numbers = #tpu.dot_dimension_numbers<[1], [0], [0], [1], [0, 0, 1, 1], [], []>} : vector<2x32xf32>, vector<32x128xf32>, vector<2x128xf32> -> vector<2x128xf32>
    %595 = vector.extract_strided_slice %445 {offsets = [0, 5, 0], sizes = [2, 1, 128], strides = [1, 1, 1]} : vector<2x8x128xf32> to vector<2x1x128xf32>
    %596 = vector.shape_cast %595 : vector<2x1x128xf32> to vector<2x128xf32>
    %597 = arith.addf %594, %596 : vector<2x128xf32>
    %598 = vector.extract_strided_slice %597 {offsets = [0, 0], sizes = [2, 32], strides = [1, 1]} : vector<2x128xf32> to vector<2x32xf32>
    %599 = arith.negf %598 : vector<2x32xf32>
    %600 = math.exp %599 : vector<2x32xf32>
    %cst_254 = arith.constant 1.000000e+00 : f32
    %601 = vector.broadcast %cst_254 : f32 to vector<2x32xf32>
    %602 = arith.addf %601, %600 : vector<2x32xf32>
    %603 = arith.divf %601, %602 : vector<2x32xf32>
    %604 = vector.extract_strided_slice %597 {offsets = [0, 32], sizes = [2, 32], strides = [1, 1]} : vector<2x128xf32> to vector<2x32xf32>
    %605 = arith.negf %604 : vector<2x32xf32>
    %606 = math.exp %605 : vector<2x32xf32>
    %cst_255 = arith.constant 1.000000e+00 : f32
    %607 = vector.broadcast %cst_255 : f32 to vector<2x32xf32>
    %608 = arith.addf %607, %606 : vector<2x32xf32>
    %609 = arith.divf %607, %608 : vector<2x32xf32>
    %610 = vector.extract_strided_slice %597 {offsets = [0, 64], sizes = [2, 32], strides = [1, 1]} : vector<2x128xf32> to vector<2x32xf32>
    %611 = math.tanh %610 : vector<2x32xf32>
    %612 = vector.extract_strided_slice %597 {offsets = [0, 96], sizes = [2, 32], strides = [1, 1]} : vector<2x128xf32> to vector<2x32xf32>
    %613 = arith.negf %612 : vector<2x32xf32>
    %614 = math.exp %613 : vector<2x32xf32>
    %cst_256 = arith.constant 1.000000e+00 : f32
    %615 = vector.broadcast %cst_256 : f32 to vector<2x32xf32>
    %616 = arith.addf %615, %614 : vector<2x32xf32>
    %617 = arith.divf %615, %616 : vector<2x32xf32>
    %618 = arith.mulf %609, %591 : vector<2x32xf32>
    %619 = arith.mulf %603, %611 : vector<2x32xf32>
    %620 = arith.addf %618, %619 : vector<2x32xf32>
    %621 = math.tanh %620 : vector<2x32xf32>
    %622 = arith.mulf %617, %621 : vector<2x32xf32>
    %cst_257 = arith.constant dense<0.000000e+00> : vector<2x128xf32>
    %623 = tpu.matmul %622, %446, %cst_257 {dimension_numbers = #tpu.dot_dimension_numbers<[1], [0], [0], [1], [0, 0, 1, 1], [], []>} : vector<2x32xf32>, vector<32x128xf32>, vector<2x128xf32> -> vector<2x128xf32>
    %624 = vector.extract_strided_slice %445 {offsets = [0, 6, 0], sizes = [2, 1, 128], strides = [1, 1, 1]} : vector<2x8x128xf32> to vector<2x1x128xf32>
    %625 = vector.shape_cast %624 : vector<2x1x128xf32> to vector<2x128xf32>
    %626 = arith.addf %623, %625 : vector<2x128xf32>
    %627 = vector.extract_strided_slice %626 {offsets = [0, 0], sizes = [2, 32], strides = [1, 1]} : vector<2x128xf32> to vector<2x32xf32>
    %628 = arith.negf %627 : vector<2x32xf32>
    %629 = math.exp %628 : vector<2x32xf32>
    %cst_258 = arith.constant 1.000000e+00 : f32
    %630 = vector.broadcast %cst_258 : f32 to vector<2x32xf32>
    %631 = arith.addf %630, %629 : vector<2x32xf32>
    %632 = arith.divf %630, %631 : vector<2x32xf32>
    %633 = vector.extract_strided_slice %626 {offsets = [0, 32], sizes = [2, 32], strides = [1, 1]} : vector<2x128xf32> to vector<2x32xf32>
    %634 = arith.negf %633 : vector<2x32xf32>
    %635 = math.exp %634 : vector<2x32xf32>
    %cst_259 = arith.constant 1.000000e+00 : f32
    %636 = vector.broadcast %cst_259 : f32 to vector<2x32xf32>
    %637 = arith.addf %636, %635 : vector<2x32xf32>
    %638 = arith.divf %636, %637 : vector<2x32xf32>
    %639 = vector.extract_strided_slice %626 {offsets = [0, 64], sizes = [2, 32], strides = [1, 1]} : vector<2x128xf32> to vector<2x32xf32>
    %640 = math.tanh %639 : vector<2x32xf32>
    %641 = vector.extract_strided_slice %626 {offsets = [0, 96], sizes = [2, 32], strides = [1, 1]} : vector<2x128xf32> to vector<2x32xf32>
    %642 = arith.negf %641 : vector<2x32xf32>
    %643 = math.exp %642 : vector<2x32xf32>
    %cst_260 = arith.constant 1.000000e+00 : f32
    %644 = vector.broadcast %cst_260 : f32 to vector<2x32xf32>
    %645 = arith.addf %644, %643 : vector<2x32xf32>
    %646 = arith.divf %644, %645 : vector<2x32xf32>
    %647 = arith.mulf %638, %620 : vector<2x32xf32>
    %648 = arith.mulf %632, %640 : vector<2x32xf32>
    %649 = arith.addf %647, %648 : vector<2x32xf32>
    %650 = math.tanh %649 : vector<2x32xf32>
    %651 = arith.mulf %646, %650 : vector<2x32xf32>
    %cst_261 = arith.constant dense<0.000000e+00> : vector<2x128xf32>
    %652 = tpu.matmul %651, %446, %cst_261 {dimension_numbers = #tpu.dot_dimension_numbers<[1], [0], [0], [1], [0, 0, 1, 1], [], []>} : vector<2x32xf32>, vector<32x128xf32>, vector<2x128xf32> -> vector<2x128xf32>
    %653 = vector.extract_strided_slice %445 {offsets = [0, 7, 0], sizes = [2, 1, 128], strides = [1, 1, 1]} : vector<2x8x128xf32> to vector<2x1x128xf32>
    %654 = vector.shape_cast %653 : vector<2x1x128xf32> to vector<2x128xf32>
    %655 = arith.addf %652, %654 : vector<2x128xf32>
    %656 = vector.extract_strided_slice %655 {offsets = [0, 0], sizes = [2, 32], strides = [1, 1]} : vector<2x128xf32> to vector<2x32xf32>
    %657 = arith.negf %656 : vector<2x32xf32>
    %658 = math.exp %657 : vector<2x32xf32>
    %cst_262 = arith.constant 1.000000e+00 : f32
    %659 = vector.broadcast %cst_262 : f32 to vector<2x32xf32>
    %660 = arith.addf %659, %658 : vector<2x32xf32>
    %661 = arith.divf %659, %660 : vector<2x32xf32>
    %662 = vector.extract_strided_slice %655 {offsets = [0, 32], sizes = [2, 32], strides = [1, 1]} : vector<2x128xf32> to vector<2x32xf32>
    %663 = arith.negf %662 : vector<2x32xf32>
    %664 = math.exp %663 : vector<2x32xf32>
    %cst_263 = arith.constant 1.000000e+00 : f32
    %665 = vector.broadcast %cst_263 : f32 to vector<2x32xf32>
    %666 = arith.addf %665, %664 : vector<2x32xf32>
    %667 = arith.divf %665, %666 : vector<2x32xf32>
    %668 = vector.extract_strided_slice %655 {offsets = [0, 64], sizes = [2, 32], strides = [1, 1]} : vector<2x128xf32> to vector<2x32xf32>
    %669 = math.tanh %668 : vector<2x32xf32>
    %670 = vector.extract_strided_slice %655 {offsets = [0, 96], sizes = [2, 32], strides = [1, 1]} : vector<2x128xf32> to vector<2x32xf32>
    %671 = arith.negf %670 : vector<2x32xf32>
    %672 = math.exp %671 : vector<2x32xf32>
    %cst_264 = arith.constant 1.000000e+00 : f32
    %673 = vector.broadcast %cst_264 : f32 to vector<2x32xf32>
    %674 = arith.addf %673, %672 : vector<2x32xf32>
    %675 = arith.divf %673, %674 : vector<2x32xf32>
    %676 = arith.mulf %667, %649 : vector<2x32xf32>
    %677 = arith.mulf %661, %669 : vector<2x32xf32>
    %678 = arith.addf %676, %677 : vector<2x32xf32>
    %679 = math.tanh %678 : vector<2x32xf32>
    %680 = arith.mulf %675, %679 : vector<2x32xf32>
    %c0_265 = arith.constant 0 : index
    %c0_266 = arith.constant 0 : index
    %681 = vector.load %arg33[%c0_265, %c0_266] : memref<32x128xf32, #tpu.memory_space<vmem>>, vector<32x128xf32>
    %cst_267 = arith.constant dense<0.000000e+00> : vector<2x128xf32>
    %682 = tpu.matmul %680, %681, %cst_267 {dimension_numbers = #tpu.dot_dimension_numbers<[1], [0], [0], [1], [0, 0, 1, 1], [], []>} : vector<2x32xf32>, vector<32x128xf32>, vector<2x128xf32> -> vector<2x128xf32>
    %c0_268 = arith.constant 0 : index
    %c0_269 = arith.constant 0 : index
    %683 = vector.load %arg34[%c0_268, %c0_269] : memref<1x128xf32, #tpu.memory_space<vmem>>, vector<1x128xf32>
    %684 = vector.broadcast %683 : vector<1x128xf32> to vector<2x128xf32>
    %685 = arith.addf %682, %684 : vector<2x128xf32>
    %c0_270 = arith.constant 0 : index
    %c0_271 = arith.constant 0 : index
    %686 = vector.load %arg35[%c0_270, %c0_271] : memref<2x128xf32, #tpu.memory_space<vmem>>, vector<2x128xf32>
    tpu.vector_store %arg35[%c0_270, %c0_271], %685 {strides = array<i32>} : memref<2x128xf32, #tpu.memory_space<vmem>>, vector<2x128xf32>,
    return
  }
}

</mosaic_0001>

<bundles_post_ra>
// kernel: forward.1
= control target key start
LH: loop header
LB: loop body
LE: loop exit
PB: predicated region body
PF: predicated region fallthrough
CT: control target
= control target key end

     0   :  { %s5559_s6 = smov 1   ;;  %s5560_s10 = smov 2   ;;  %s6339_s0 = inlined_call_operand.smem [shape: u32[36], index: -1, kind: input, shape index: {}] }
   0x1   :  { %s5628_s5 = sld [smem:[%s6339_s0]]   ;;  %s5561_s14 = smov 3  }
   0x2   :  { %s5633_s9 = sld [smem:[%s6339_s0 + %s5559_s6]]   ;;  %s5562_s18 = smov 4  }
   0x3   :  { %s5638_s13 = sld [smem:[%s6339_s0 + %s5560_s10]]   ;;  %s5563_s22 = smov 5  }
   0x4   :  { %s5643_s17 = sld [smem:[%s6339_s0 + %s5561_s14]]   ;;  %s5564_s26 = smov 6  }
   0x5   :  { %s5648_s21 = sld [smem:[%s6339_s0 + %s5562_s18]]   ;;  %s5565_s30 = smov 7  }
   0x6   :  { %s5653_s25 = sld [smem:[%s6339_s0 + %s5563_s22]]   ;;  %s5566_s4 = smov 8  }
   0x7   :  { %s5658_s29 = sld [smem:[%s6339_s0 + %s5564_s26]]   ;;  %s5567_s10 = smov 9  }
   0x8   :  { %6353 = sst [smem:[#allocation40_spill]] %s5633_s9  ;;  %s5568_s15 = smov 10  }
   0x9   :  { %6354 = sst [smem:[#allocation41_spill]] %s5638_s13  ;;  %s5569_s20 = smov 11  }
   0xa   :  { %6355 = sst [smem:[#allocation42_spill]] %s5643_s17  ;;  %s5570_s26 = smov 12  }
   0xb   :  { %6356 = sst [smem:[#allocation43_spill]] %s5648_s21  ;;  %s5571_s1 = smov 13  }
   0xc   :  { %6357 = sst [smem:[#allocation44_spill]] %s5653_s25  ;;  %s5572_s7 = smov 14  }
   0xd   :  { %6358 = sst [smem:[#allocation45_spill]] %s5658_s29  ;;  %s5574_s22 = smov 16  }
   0xe   :  { %s5663_s3 = sld [smem:[%s6339_s0 + %s5565_s30]]   ;;  %s5575_s28 = smov 17  }
   0xf   :  { %s5668_s8 = sld [smem:[%s6339_s0 + %s5566_s4]]  }
  0x10   :  { %s5673_s14 = sld [smem:[%s6339_s0 + %s5567_s10]]  }
  0x11   :  { %s5678_s19 = sld [smem:[%s6339_s0 + %s5568_s15]]   ;;  %s5573_s15 = smov 15  }
  0x12   :  { %s5683_s24 = sld [smem:[%s6339_s0 + %s5569_s20]]  }
  0x13   :  { %s5688_s30 = sld [smem:[%s6339_s0 + %s5570_s26]]  }
  0x14   :  { %s5693_s6 = sld [smem:[%s6339_s0 + %s5571_s1]]  }
  0x15   :  { %6359 = sst [smem:[#allocation46_spill]] %s5668_s8 }
  0x16   :  { %s5698_s12 = sld [smem:[%s6339_s0 + %s5572_s7]]   ;;  %s5576_s7 = smov 18  }
  0x17   :  { %s5703_s20 = sld [smem:[%s6339_s0 + %s5573_s15]]   ;;  %s5577_s15 = smov 19  }
  0x18   :  { %s5708_s27 = sld [smem:[%s6339_s0 + %s5574_s22]]   ;;  %s5578_s22 = smov 20  }
  0x19   :  { %6360 = sst [smem:[#allocation47_spill]] %s5688_s30 }
  0x1a   :  { %s5713_s4 = sld [smem:[%s6339_s0 + %s5575_s28]]   ;;  %s5579_s28 = smov 21  }
  0x1b   :  { %s5723_s30 = sld [smem:[%s6339_s0 + %s5577_s15]]   ;;  %s5581_s15 = smov 23  }
  0x1c   :  { %6361 = sst [smem:[#allocation48_spill]] %s5698_s12 }
  0x1d   :  { %s5718_s12 = sld [smem:[%s6339_s0 + %s5576_s7]]   ;;  %s5580_s7 = smov 22  }
  0x1e   :  { %s5728_s8 = sld [smem:[%s6339_s0 + %s5578_s22]]   ;;  %s5582_s22 = smov 24  }
  0x1f   :  { %s5733_s9 = sld [smem:[%s6339_s0 + %s5579_s28]]   ;;  %s5583_s28 = smov 25  }
  0x20   :  { %s5753_s25 = sld [smem:[%s6339_s0 + %s5583_s28]]   ;;  %s5587_s28 = smov 29  }
  0x21   :  { %6363 = sst [smem:[#allocation50_spill]] %s5723_s30 }
  0x22   :  { %s5743_s30 = sld [smem:[%s6339_s0 + %s5581_s15]]   ;;  %s5585_s15 = smov 27  }
  0x23   :  { %6362 = sst [smem:[#allocation49_spill]] %s5718_s12 }
  0x24   :  { %6364 = sst [smem:[#allocation51_spill]] %s5728_s8 }
  0x25   :  { %s5738_s12 = sld [smem:[%s6339_s0 + %s5580_s7]]   ;;  %s5584_s7 = smov 26  }
  0x26   :  { %s5748_s8 = sld [smem:[%s6339_s0 + %s5582_s22]]   ;;  %s5586_s22 = smov 28  }
  0x27   :  { %s5758_s21 = sld [smem:[%s6339_s0 + %s5584_s7]]   ;;  %s5588_s7 = smov 30  }
  0x28   :  { %s5763_s29 = sld [smem:[%s6339_s0 + %s5585_s15]]   ;;  %s5589_s15 = smov 31  }
  0x29   :  { %s5773_s17 = sld [smem:[%s6339_s0 + %s5587_s28]]   ;;  %s5591_s28 = smov 33  }
  0x2a   :  { %s5783_s13 = sld [smem:[%s6339_s0 + %s5589_s15]]   ;;  %s5593_s15 = smov 35  }
  0x2c   :  { %6365 = sst [smem:[#allocation52_spill]] %s5748_s8 }
  0x2d   :  { %6366 = sst [smem:[#allocation53_spill]] %s5758_s21 }
  0x2e   :  { %6367 = sst [smem:[#allocation54_spill]] %s5763_s29 }
  0x2f   :  { %s5768_s8 = sld [smem:[%s6339_s0 + %s5586_s22]]   ;;  %s5590_s22 = smov 32  }
  0x30   :  { %s5778_s21 = sld [smem:[%s6339_s0 + %s5588_s7]]   ;;  %s5592_s7 = smov 34  }
  0x31   :  { %6370 = sst [smem:[#allocation57_spill]] %s5783_s13 }
  0x32   :  { %s5793_s29 = sld [smem:[%s6339_s0 + %s5591_s28]]  }
  0x33   :  { %s5803_s13 = sld [smem:[%s6339_s0 + %s5593_s15]]  }
  0x35   :  { %6368 = sst [smem:[#allocation55_spill]] %s5768_s8 }
  0x36   :  { %6369 = sst [smem:[#allocation56_spill]] %s5778_s21 }
  0x37   :  { %s5788_s8 = sld [smem:[%s6339_s0 + %s5590_s22]]  }
  0x38   :  { %s5798_s21 = sld [smem:[%s6339_s0 + %s5592_s7]]  }
  0x39   :  { %76 = vsyncpa [#allocation6], 0 }
  0x3a   :  { %77 = vsyncpa [#allocation4], 0 }
  0x3b   :  { %78 = vsyncpa [#allocation9], 0 }
  0x3c   :  { %79 = vsyncpa [#allocation12], 0 }
  0x3d   :  { %80 = vsyncpa [#allocation15], 0 }
  0x3e   :  { %81 = vsyncpa [#allocation18], 0 }
  0x3f   :  { %82 = vsyncpa [#allocation21], 0 }
  0x40   :  { %83 = vsyncpa [#allocation24], 0 }
  0x41   :  { %84 = vsyncpa [#allocation27], 0 }
  0x42   :  { %85 = vsyncpa [#allocation5], 0  ;;  %s5594_s22 = smov [#allocation8]   ;;  %s5595_s26 = smov [#allocation11]  }
  0x43   :  { %s126_s23 = sshll.u32 %s5594_s22, 4  ;;  %s146_s28 = sshll.u32 %s5595_s26, 4  ;;  %s127_s23 = int_to_ptr.vmem [resolvable:$true] %s126_s23  ;;  %s147_s28 = int_to_ptr.vmem [resolvable:$true] %s146_s28 }
  0x44   :  { %s5175_s0 = scalar_lea.hbm %s5673_s14, 16 }
  0x45   :  { %p5176_p0 = scmp.ne.s32.totalorder %s5673_s14, %s5175_s0  ;;  %p5179_p1 = scmp.lt.u32.totalorder %s5175_s0, %s5673_s14 }
  0x47   :  { %p5181_p2 = pnand %p5179_p1, %p5176_p0 }
  0x49   :  { %5184 = shalt.err (!%p5181_p2)
}
  0x4a   :  { %s5185_s1 = scalar_lea.vmem %s127_s23, 16  ;;  %s5189_s2 = scalar_lea.vmem %s127_s23, 32 }
  0x4b   :  { %p5186_p3 = scmp.ne.s32.totalorder %s127_s23, %s5185_s1  ;;  %p5190_p4 = scmp.lt.s32.totalorder %s127_s23, %s127_s23 }
  0x4c   :  { %p5191_p5 = scmp.lt.s32.totalorder %s5189_s2, %s5185_s1 }
  0x4e   :  { %p5192_p6 = por %p5191_p5, %p5190_p4 }
  0x50   :  { %p5193_p7 = pnand %p5192_p6, %p5186_p3 }
  0x52   :  { %5196 = shalt.err (!%p5193_p7)
}
  0x53   :  { %129 = dma.hbm_to_vmem [thread:$0]  %s5673_s14, 16, %s127_s23, [#allocation9]  }
  0x54   :  { %s5197_s7 = scalar_lea.hbm %s5683_s24, 16 }
  0x55   :  { %p5198_p8 = scmp.ne.s32.totalorder %s5683_s24, %s5197_s7  ;;  %p5201_p9 = scmp.lt.u32.totalorder %s5197_s7, %s5683_s24 }
  0x57   :  { %p5203_p10 = pnand %p5201_p9, %p5198_p8 }
  0x59   :  { %5206 = shalt.err (!%p5203_p10)
}
  0x5a   :  { %s5207_s10 = scalar_lea.vmem %s147_s28, 16  ;;  %s5211_s11 = scalar_lea.vmem %s147_s28, 32 }
  0x5b   :  { %p5208_p11 = scmp.ne.s32.totalorder %s147_s28, %s5207_s10  ;;  %p5212_p12 = scmp.lt.s32.totalorder %s147_s28, %s147_s28 }
  0x5c   :  { %p5213_p13 = scmp.lt.s32.totalorder %s5211_s11, %s5207_s10 }
  0x5e   :  { %p5214_p0 = por %p5213_p13, %p5212_p12 }
  0x60   :  { %p5215_p1 = pnand %p5214_p0, %p5208_p11 }
  0x62   :  { %5218 = shalt.err (!%p5215_p1)
}
  0x63   :  { %149 = dma.hbm_to_vmem [thread:$0]  %s5683_s24, 16, %s147_s28, [#allocation12]  }
  0x64   :  { %s5596_s15 = smov [#allocation14]   ;;  %s5597_s16 = smov [#allocation17]  }
  0x65   :  { %s170_s14 = sshll.u32 %s5596_s15, 4  ;;  %s190_s18 = sshll.u32 %s5597_s16, 4  ;;  %s171_s14 = int_to_ptr.vmem [resolvable:$true] %s170_s14  ;;  %s191_s18 = int_to_ptr.vmem [resolvable:$true] %s190_s18 }
  0x66   :  { %s5219_s22 = scalar_lea.hbm %s5703_s20, 16 }
  0x67   :  { %p5220_p2 = scmp.ne.s32.totalorder %s5703_s20, %s5219_s22  ;;  %p5223_p3 = scmp.lt.u32.totalorder %s5219_s22, %s5703_s20 }
  0x69   :  { %p5225_p4 = pnand %p5223_p3, %p5220_p2 }
  0x6b   :  { %5228 = shalt.err (!%p5225_p4)
}
  0x6c   :  { %s5229_s23 = scalar_lea.vmem %s171_s14, 16  ;;  %s5233_s26 = scalar_lea.vmem %s171_s14, 32 }
  0x6d   :  { %p5230_p5 = scmp.ne.s32.totalorder %s171_s14, %s5229_s23  ;;  %p5234_p6 = scmp.lt.s32.totalorder %s171_s14, %s171_s14 }
  0x6e   :  { %p5235_p7 = scmp.lt.s32.totalorder %s5233_s26, %s5229_s23 }
  0x70   :  { %p5236_p8 = por %p5235_p7, %p5234_p6 }
  0x72   :  { %p5237_p9 = pnand %p5236_p8, %p5230_p5 }
  0x74   :  { %5240 = shalt.err (!%p5237_p9)
}
  0x75   :  { %173 = dma.hbm_to_vmem [thread:$0]  %s5703_s20, 16, %s171_s14, [#allocation15]  }
  0x76   :  { %s5241_s24 = scalar_lea.hbm %s5713_s4, 16 }
  0x77   :  { %p5242_p10 = scmp.ne.s32.totalorder %s5713_s4, %s5241_s24  ;;  %p5245_p11 = scmp.lt.u32.totalorder %s5241_s24, %s5713_s4 }
  0x79   :  { %p5247_p12 = pnand %p5245_p11, %p5242_p10 }
  0x7b   :  { %5250 = shalt.err (!%p5247_p12)
}
  0x7c   :  { %s5251_s28 = scalar_lea.vmem %s191_s18, 16  ;;  %s5255_s0 = scalar_lea.vmem %s191_s18, 32 }
  0x7d   :  { %p5252_p13 = scmp.ne.s32.totalorder %s191_s18, %s5251_s28  ;;  %p5256_p0 = scmp.lt.s32.totalorder %s191_s18, %s191_s18 }
  0x7e   :  { %p5257_p1 = scmp.lt.s32.totalorder %s5255_s0, %s5251_s28 }
  0x80   :  { %p5258_p2 = por %p5257_p1, %p5256_p0 }
  0x82   :  { %p5259_p3 = pnand %p5258_p2, %p5252_p13 }
  0x84   :  { %5262 = shalt.err (!%p5259_p3)
}
  0x85   :  { %193 = dma.hbm_to_vmem [thread:$0]  %s5713_s4, 16, %s191_s18, [#allocation18]  }
  0x86   :  { %s5598_s1 = smov [#allocation20]   ;;  %s5599_s2 = smov [#allocation23]  }
  0x87   :  { %s216_s20 = sshll.u32 %s5598_s1, 4  ;;  %s238_s7 = sshll.u32 %s5599_s2, 4  ;;  %s217_s20 = int_to_ptr.vmem [resolvable:$true] %s216_s20  ;;  %s239_s7 = int_to_ptr.vmem [resolvable:$true] %s238_s7 }
  0x88   :  { %s5263_s10 = scalar_lea.hbm %s5738_s12, 16 }
  0x89   :  { %p5264_p4 = scmp.ne.s32.totalorder %s5738_s12, %s5263_s10  ;;  %p5267_p5 = scmp.lt.u32.totalorder %s5263_s10, %s5738_s12 }
  0x8b   :  { %p5269_p6 = pnand %p5267_p5, %p5264_p4 }
  0x8d   :  { %5272 = shalt.err (!%p5269_p6)
}
  0x8e   :  { %s5273_s11 = scalar_lea.vmem %s217_s20, 16  ;;  %s5277_s15 = scalar_lea.vmem %s217_s20, 32 }
  0x8f   :  { %p5274_p7 = scmp.ne.s32.totalorder %s217_s20, %s5273_s11  ;;  %p5278_p8 = scmp.lt.s32.totalorder %s217_s20, %s217_s20 }
  0x90   :  { %p5279_p9 = scmp.lt.s32.totalorder %s5277_s15, %s5273_s11 }
  0x92   :  { %p5280_p10 = por %p5279_p9, %p5278_p8 }
  0x94   :  { %p5281_p11 = pnand %p5280_p10, %p5274_p7 }
  0x96   :  { %5284 = shalt.err (!%p5281_p11)
}
  0x97   :  { %219 = dma.hbm_to_vmem [thread:$0]  %s5738_s12, 16, %s217_s20, [#allocation21]  }
  0x98   :  { %s5285_s4 = scalar_lea.hbm %s5753_s25, 16 }
  0x99   :  { %p5286_p12 = scmp.ne.s32.totalorder %s5753_s25, %s5285_s4  ;;  %p5289_p13 = scmp.lt.u32.totalorder %s5285_s4, %s5753_s25 }
  0x9b   :  { %p5291_p0 = pnand %p5289_p13, %p5286_p12 }
  0x9d   :  { %5294 = shalt.err (!%p5291_p0)
}
  0x9e   :  { %s5295_s14 = scalar_lea.vmem %s239_s7, 16  ;;  %s5299_s16 = scalar_lea.vmem %s239_s7, 32 }
  0x9f   :  { %p5296_p1 = scmp.ne.s32.totalorder %s239_s7, %s5295_s14  ;;  %p5300_p2 = scmp.lt.s32.totalorder %s239_s7, %s239_s7 }
  0xa0   :  { %p5301_p3 = scmp.lt.s32.totalorder %s5299_s16, %s5295_s14 }
  0xa2   :  { %p5302_p4 = por %p5301_p3, %p5300_p2 }
  0xa4   :  { %p5303_p5 = pnand %p5302_p4, %p5296_p1 }
  0xa6   :  { %5306 = shalt.err (!%p5303_p5)
}
  0xa7   :  { %241 = dma.hbm_to_vmem [thread:$0]  %s5753_s25, 16, %s239_s7, [#allocation24]  }
  0xa8   :  { %s92_s12 = sshll.u32 %s5628_s5, 4  ;;  %s5600_s18 = smov [#allocation26]   ;;  %s93_s12 = int_to_ptr.vmem [resolvable:$true] %s92_s12 }
  0xa9   :  { %s262_s22 = sshll.u32 %s5600_s18, 4  ;;  %s5307_s23 = scalar_lea.hbm %s5773_s17, 16  ;;  %s263_s22 = int_to_ptr.vmem [resolvable:$true] %s262_s22 }
  0xaa   :  { %p5308_p6 = scmp.ne.s32.totalorder %s5773_s17, %s5307_s23  ;;  %p5311_p7 = scmp.lt.u32.totalorder %s5307_s23, %s5773_s17 }
  0xac   :  { %p5313_p8 = pnand %p5311_p7, %p5308_p6 }
  0xae   :  { %5316 = shalt.err (!%p5313_p8)
}
  0xaf   :  { %s5317_s26 = scalar_lea.vmem %s263_s22, 16  ;;  %s5321_s24 = scalar_lea.vmem %s263_s22, 32 }
  0xb0   :  { %p5318_p9 = scmp.ne.s32.totalorder %s263_s22, %s5317_s26  ;;  %p5322_p10 = scmp.lt.s32.totalorder %s263_s22, %s263_s22 }
  0xb1   :  { %p5323_p11 = scmp.lt.s32.totalorder %s5321_s24, %s5317_s26 }
  0xb3   :  { %p5324_p12 = por %p5323_p11, %p5322_p10 }
  0xb5   :  { %p5325_p13 = pnand %p5324_p12, %p5318_p9 }
  0xb7   :  { %5328 = shalt.err (!%p5325_p13)
}
  0xb8   :  { %265 = dma.hbm_to_vmem [thread:$0]  %s5773_s17, 16, %s263_s22, [#allocation27]  }
  0xb9   :  { %s5329_s5 = scalar_lea.vmem %s93_s12, 32  ;;  %p5334_p1 = scmp.lt.s32.totalorder %s93_s12, %s93_s12 }
  0xba   :  { %p5330_p0 = scmp.ne.s32.totalorder %s93_s12, %s5329_s5  ;;  %p5335_p2 = scmp.lt.s32.totalorder %s5329_s5, %s5329_s5 }
  0xbc   :  { %p5336_p3 = por %p5335_p2, %p5334_p1 }
  0xbe   :  { %p5337_p4 = pnand %p5336_p3, %p5330_p0 }
  0xc0   :  { %5340 = shalt.err (!%p5337_p4)
}
  0xc1   :  { %s5601_s25 = smov [#allocation3]   ;;  %s5602_s28 = smov [#allocation7]  }
  0xc2   :  { %95 = dma.vmem_to_smem %s93_s12, 32, %s5601_s25, [#allocation6]  }
  0xc3   :  { %s114_s0 = sshll.u32 %s5602_s28, 4  ;;  %s5603_s1 = smov [#allocation10]   ;;  %s115_s0 = int_to_ptr.vmem [resolvable:$true] %s114_s0 }
  0xc4   :  { %s136_s20 = sshll.u32 %s5603_s1, 4  ;;  %s5341_s2 = scalar_lea.hbm %s5663_s3, 16  ;;  %s137_s20 = int_to_ptr.vmem [resolvable:$true] %s136_s20 }
  0xc5   :  { %p5342_p5 = scmp.ne.s32.totalorder %s5663_s3, %s5341_s2  ;;  %p5345_p6 = scmp.lt.u32.totalorder %s5341_s2, %s5663_s3 }
  0xc7   :  { %p5347_p7 = pnand %p5345_p6, %p5342_p5 }
  0xc9   :  { %5350 = shalt.err (!%p5347_p7)
}
  0xca   :  { %s5351_s17 = scalar_lea.vmem %s115_s0, 16  ;;  %s5355_s7 = scalar_lea.vmem %s115_s0, 32 }
  0xcb   :  { %p5352_p8 = scmp.ne.s32.totalorder %s115_s0, %s5351_s17  ;;  %p5356_p9 = scmp.lt.s32.totalorder %s115_s0, %s115_s0 }
  0xcc   :  { %p5357_p10 = scmp.lt.s32.totalorder %s5355_s7, %s5351_s17 }
  0xce   :  { %p5358_p11 = por %p5357_p10, %p5356_p9 }
  0xd0   :  { %p5359_p12 = pnand %p5358_p11, %p5352_p8 }
  0xd2   :  { %5362 = shalt.err (!%p5359_p12)
}
  0xd3   :  { %117 = dma.hbm_to_vmem [thread:$0]  %s5663_s3, 16, %s115_s0, [#allocation4]  }
  0xd4   :  { %s5363_s10 = scalar_lea.hbm %s5678_s19, 16 }
  0xd5   :  { %p5364_p13 = scmp.ne.s32.totalorder %s5678_s19, %s5363_s10  ;;  %p5367_p0 = scmp.lt.u32.totalorder %s5363_s10, %s5678_s19 }
  0xd7   :  { %p5369_p1 = pnand %p5367_p0, %p5364_p13 }
  0xd9   :  { %5372 = shalt.err (!%p5369_p1)
}
  0xda   :  { %s5373_s11 = scalar_lea.vmem %s137_s20, 16  ;;  %s5377_s15 = scalar_lea.vmem %s137_s20, 32 }
  0xdb   :  { %p5374_p2 = scmp.ne.s32.totalorder %s137_s20, %s5373_s11  ;;  %p5378_p3 = scmp.lt.s32.totalorder %s137_s20, %s137_s20 }
  0xdc   :  { %p5379_p4 = scmp.lt.s32.totalorder %s5377_s15, %s5373_s11 }
  0xde   :  { %p5380_p5 = por %p5379_p4, %p5378_p3 }
  0xe0   :  { %p5381_p6 = pnand %p5380_p5, %p5374_p2 }
  0xe2   :  { %5384 = shalt.err (!%p5381_p6)
}
  0xe3   :  { %139 = dma.hbm_to_vmem [thread:$0]  %s5678_s19, 16, %s137_s20, [#allocation9]  }
  0xe4   :  { %s5604_s4 = smov [#allocation13]   ;;  %s5605_s14 = smov [#allocation16]  }
  0xe5   :  { %s158_s3 = sshll.u32 %s5604_s4, 4  ;;  %s180_s16 = sshll.u32 %s5605_s14, 4  ;;  %s159_s3 = int_to_ptr.vmem [resolvable:$true] %s158_s3  ;;  %s181_s16 = int_to_ptr.vmem [resolvable:$true] %s180_s16 }
  0xe6   :  { %s5385_s12 = scalar_lea.hbm %s5693_s6, 16 }
  0xe7   :  { %p5386_p7 = scmp.ne.s32.totalorder %s5693_s6, %s5385_s12  ;;  %p5389_p8 = scmp.lt.u32.totalorder %s5385_s12, %s5693_s6 }
  0xe9   :  { %p5391_p9 = pnand %p5389_p8, %p5386_p7 }
  0xeb   :  { %5394 = shalt.err (!%p5391_p9)
}
  0xec   :  { %s5395_s18 = scalar_lea.vmem %s159_s3, 16  ;;  %s5399_s22 = scalar_lea.vmem %s159_s3, 32 }
  0xed   :  { %p5396_p10 = scmp.ne.s32.totalorder %s159_s3, %s5395_s18  ;;  %p5400_p11 = scmp.lt.s32.totalorder %s159_s3, %s159_s3 }
  0xee   :  { %p5401_p12 = scmp.lt.s32.totalorder %s5399_s22, %s5395_s18 }
  0xf0   :  { %p5402_p13 = por %p5401_p12, %p5400_p11 }
  0xf2   :  { %p5403_p0 = pnand %p5402_p13, %p5396_p10 }
  0xf4   :  { %5406 = shalt.err (!%p5403_p0)
}
  0xf5   :  { %161 = dma.hbm_to_vmem [thread:$0]  %s5693_s6, 16, %s159_s3, [#allocation12]  }
  0xf6   :  { %s5407_s19 = scalar_lea.hbm %s5708_s27, 16 }
  0xf7   :  { %p5408_p1 = scmp.ne.s32.totalorder %s5708_s27, %s5407_s19  ;;  %p5411_p2 = scmp.lt.u32.totalorder %s5407_s19, %s5708_s27 }
  0xf9   :  { %p5413_p3 = pnand %p5411_p2, %p5408_p1 }
  0xfb   :  { %5416 = shalt.err (!%p5413_p3)
}
  0xfc   :  { %s5417_s23 = scalar_lea.vmem %s181_s16, 16  ;;  %s5421_s26 = scalar_lea.vmem %s181_s16, 32 }
  0xfd   :  { %p5418_p4 = scmp.ne.s32.totalorder %s181_s16, %s5417_s23  ;;  %p5422_p5 = scmp.lt.s32.totalorder %s181_s16, %s181_s16 }
  0xfe   :  { %p5423_p6 = scmp.lt.s32.totalorder %s5421_s26, %s5417_s23 }
 0x100   :  { %p5424_p7 = por %p5423_p6, %p5422_p5 }
 0x102   :  { %p5425_p8 = pnand %p5424_p7, %p5418_p4 }
 0x104   :  { %5428 = shalt.err (!%p5425_p8)
}
 0x105   :  { %183 = dma.hbm_to_vmem [thread:$0]  %s5708_s27, 16, %s181_s16, [#allocation15]  }
 0x106   :  { %s5606_s24 = smov [#allocation19]   ;;  %s5607_s5 = smov [#allocation22]  }
 0x107   :  { %s206_s6 = sshll.u32 %s5606_s24, 4  ;;  %s226_s25 = sshll.u32 %s5607_s5, 4  ;;  %s207_s6 = int_to_ptr.vmem [resolvable:$true] %s206_s6  ;;  %s227_s25 = int_to_ptr.vmem [resolvable:$true] %s226_s25 }
 0x108   :  { %s5429_s28 = scalar_lea.hbm %s5733_s9, 16 }
 0x109   :  { %p5430_p9 = scmp.ne.s32.totalorder %s5733_s9, %s5429_s28  ;;  %p5433_p10 = scmp.lt.u32.totalorder %s5429_s28, %s5733_s9 }
 0x10b   :  { %p5435_p11 = pnand %p5433_p10, %p5430_p9 }
 0x10d   :  { %5438 = shalt.err (!%p5435_p11)
}
 0x10e   :  { %s5439_s0 = scalar_lea.vmem %s207_s6, 16  ;;  %s5443_s1 = scalar_lea.vmem %s207_s6, 32 }
 0x10f   :  { %p5440_p12 = scmp.ne.s32.totalorder %s207_s6, %s5439_s0  ;;  %p5444_p13 = scmp.lt.s32.totalorder %s207_s6, %s207_s6 }
 0x110   :  { %p5445_p0 = scmp.lt.s32.totalorder %s5443_s1, %s5439_s0 }
 0x112   :  { %p5446_p1 = por %p5445_p0, %p5444_p13 }
 0x114   :  { %p5447_p2 = pnand %p5446_p1, %p5440_p12 }
 0x116   :  { %5450 = shalt.err (!%p5447_p2)
}
 0x117   :  { %209 = dma.hbm_to_vmem [thread:$0]  %s5733_s9, 16, %s207_s6, [#allocation18]  }
 0x118   :  { %s5451_s27 = scalar_lea.hbm %s5743_s30, 16 }
 0x119   :  { %p5452_p3 = scmp.ne.s32.totalorder %s5743_s30, %s5451_s27  ;;  %p5455_p4 = scmp.lt.u32.totalorder %s5451_s27, %s5743_s30 }
 0x11b   :  { %p5457_p5 = pnand %p5455_p4, %p5452_p3 }
 0x11d   :  { %5460 = shalt.err (!%p5457_p5)
}
 0x11e   :  { %s5461_s20 = scalar_lea.vmem %s227_s25, 16  ;;  %s5465_s2 = scalar_lea.vmem %s227_s25, 32 }
 0x11f   :  { %p5462_p6 = scmp.ne.s32.totalorder %s227_s25, %s5461_s20  ;;  %p5466_p7 = scmp.lt.s32.totalorder %s227_s25, %s227_s25 }
 0x120   :  { %p5467_p8 = scmp.lt.s32.totalorder %s5465_s2, %s5461_s20 }
 0x122   :  { %p5468_p9 = por %p5467_p8, %p5466_p7 }
 0x124   :  { %p5469_p10 = pnand %p5468_p9, %p5462_p6 }
 0x126   :  { %5472 = shalt.err (!%p5469_p10)
}
 0x127   :  { %s6371_s17 = sld [smem:[#allocation54_spill]]  ;;  %s5608_s7 = smov [#allocation25]  }
 0x128   :  { %229 = dma.hbm_to_vmem [thread:$0]  %s5743_s30, 16, %s227_s25, [#allocation21]  }
 0x129   :  { %s250_s9 = sshll.u32 %s5608_s7, 4  ;;  %s5609_s10 = smov [#allocation28]   ;;  %s251_s9 = int_to_ptr.vmem [resolvable:$true] %s250_s9 }
 0x12a   :  { %s280_s11 = sshll.u32 %s5609_s10, 4  ;;  %s281_s11 = int_to_ptr.vmem [resolvable:$true] %s280_s11 }
 0x12d   :  { %s5473_s15 = scalar_lea.hbm %s6371_s17, 16 }
 0x12e   :  { %p5474_p11 = scmp.ne.s32.totalorder %s6371_s17, %s5473_s15  ;;  %p5477_p12 = scmp.lt.u32.totalorder %s5473_s15, %s6371_s17 }
 0x130   :  { %p5479_p13 = pnand %p5477_p12, %p5474_p11 }
 0x132   :  { %5482 = shalt.err (!%p5479_p13)
}
 0x133   :  { %s5483_s4 = scalar_lea.vmem %s251_s9, 16  ;;  %s5487_s3 = scalar_lea.vmem %s251_s9, 32 }
 0x134   :  { %p5484_p0 = scmp.ne.s32.totalorder %s251_s9, %s5483_s4  ;;  %p5488_p1 = scmp.lt.s32.totalorder %s251_s9, %s251_s9 }
 0x135   :  { %p5489_p2 = scmp.lt.s32.totalorder %s5487_s3, %s5483_s4 }
 0x137   :  { %p5490_p3 = por %p5489_p2, %p5488_p1 }
 0x139   :  { %p5491_p4 = pnand %p5490_p3, %p5484_p0 }
 0x13b   :  { %5494 = shalt.err (!%p5491_p4)
}
 0x13c   :  { %253 = dma.hbm_to_vmem [thread:$0]  %s6371_s17, 16, %s251_s9, [#allocation24]  }
 0x13d   :  { %s5495_s30 = scalar_lea.hbm %s5798_s21, 16 }
 0x13e   :  { %p5496_p5 = scmp.ne.s32.totalorder %s5798_s21, %s5495_s30  ;;  %p5499_p6 = scmp.lt.u32.totalorder %s5495_s30, %s5798_s21 }
 0x140   :  { %p5501_p7 = pnand %p5499_p6, %p5496_p5 }
 0x142   :  { %5504 = shalt.err (!%p5501_p7)
}
 0x143   :  { %s5505_s14 = scalar_lea.vmem %s281_s11, 16  ;;  %s5509_s16 = scalar_lea.vmem %s281_s11, 32 }
 0x144   :  { %p5506_p8 = scmp.ne.s32.totalorder %s281_s11, %s5505_s14  ;;  %p5510_p9 = scmp.lt.s32.totalorder %s281_s11, %s281_s11 }
 0x145   :  { %p5511_p10 = scmp.lt.s32.totalorder %s5509_s16, %s5505_s14 }
 0x147   :  { %p5512_p11 = por %p5511_p10, %p5510_p9 }
 0x149   :  { %p5513_p12 = pnand %p5512_p11, %p5506_p8 }
 0x14b   :  { %5516 = shalt.err (!%p5513_p12)
}
 0x14c   :  { %283 = dma.hbm_to_vmem [thread:$0]  %s5798_s21, 16, %s281_s11, [#allocation27]  }
 0x14d   :  { %5539 = dma.done.wait [#allocation6], 32  }
 0x14e   :  { %5540 = vsyncadd [#allocation6], 4294967264 }
 0x14f   :  { %5541 = dma.done.wait [#allocation4], 16  }
 0x150   :  { %5542 = vsyncadd [#allocation4], 4294967280 }
 0x151   :  { %5543 = dma.done.wait [#allocation9], 32  }
 0x152   :  { %5544 = vsyncadd [#allocation9], 4294967264 }
 0x153   :  { %5545 = dma.done.wait [#allocation12], 32  }
 0x154   :  { %5546 = vsyncadd [#allocation12], 4294967264 }
 0x155   :  { %5547 = dma.done.wait [#allocation15], 32  }
 0x156   :  { %5548 = vsyncadd [#allocation15], 4294967264 }
 0x157   :  { %5549 = dma.done.wait [#allocation18], 32  }
 0x158   :  { %5550 = vsyncadd [#allocation18], 4294967264 }
 0x159   :  { %5551 = dma.done.wait [#allocation21], 32  }
 0x15a   :  { %5552 = vsyncadd [#allocation21], 4294967264 }
 0x15b   :  { %5553 = dma.done.wait [#allocation24], 32  }
 0x15c   :  { %5554 = vsyncadd [#allocation24], 4294967264 }
 0x15d   :  { %5555 = dma.done.wait [#allocation27], 32  }
 0x15e   :  { %5556 = vsyncadd [#allocation27], 4294967264 }
 0x15f   :  { %332 = sfence }
 0x160   :  { %s333_s21 = sld [smem:[#allocation3]]  ;;  %s6372_s12 = sld [smem:[#allocation41_spill]]  ;;  %vm336_vm0 = vcmask 253952   ;;  %vm406_vm1 = vcmask 261120   ;;  %v5610_v56 = vmov 0.0   ;;  %vm5611_vm2 = vmmov 0  }
 0x161   :  { %s4264_s18 = sld [smem:[#allocation3 + $0x1]]  ;;  %s4265_s22 = sld [smem:[#allocation3 + $0x2]]  ;;  %4523 = vmatprep.subr.mxu1 %v5610_v56  ;;  %4525 = vmatprep.mubr.msk.f32.mxu1 %vm5611_vm2, %v5610_v56  ;;  %v4281_v57 = vld [vmem:[#allocation7] ss:$0 sm:$0xff]  ;;  %vm550_vm3 = vcmask 130048   ;;  %v626_v63 = vlaneseq  ;;  %vm631_vm4 = vcmask 64512  }
 0x162   :  { %s4266_s19 = sld [smem:[#allocation3 + $0x3]]  ;;  %s4267_s23 = sld [smem:[#allocation3 + $0x4]]  ;;  %vm1695_vm5 = vcmask 523264   ;;  %vm3283_vm6 = vcmask 1041409  }
 0x163   :  { %s4268_s26 = sld [smem:[#allocation3 + $0x5]]  ;;  %s4269_s24 = sld [smem:[#allocation3 + $0x6]] }
 0x164   :  { %s4270_s6 = sld [smem:[#allocation3 + $0x7]]  ;;  %s5866_s5 = sld [smem:[#allocation3 + $0x80]] }
 0x165   :  { %s5868_s25 = sld [smem:[#allocation3 + $0x81]]  ;;  %s5870_s28 = sld [smem:[#allocation3 + $0x82]] }
 0x166   :  { %s5872_s0 = sld [smem:[#allocation3 + $0x83]]  ;;  %s334_s1 = scalar_lea.vmem %s6372_s12, %s333_s21 }
 0x167   :  { %s339_s27 = scalar_lea.vmem %s6372_s12, %s4264_s18  ;;  %v335_v0 = vld [vmem:[%s334_s1] sm:$0x1]  ;;  %s343_s20 = scalar_lea.vmem %s6372_s12, %s4265_s22 }
 0x168   :  { %v340_v1 = vld [vmem:[%s339_s27] sm:$0x1]  ;;  %s347_s2 = scalar_lea.vmem %s6372_s12, %s4266_s19  ;;  %337 = vst.msk [vmem:[#allocation2] sm:$0x1] %vm336_vm0, %v335_v0  ;;  %s351_s17 = scalar_lea.vmem %s6372_s12, %s4267_s23  ;;  %v5944_v0 = vshrl.u32 %v626_v63, 7 }
 0x169   :  { %341 = vst.msk [vmem:[#allocation2 + $0x1] sm:$0x1] %vm336_vm0, %v340_v1  ;;  %v344_v2 = vld [vmem:[%s343_s20] sm:$0x1]  ;;  %s355_s7 = scalar_lea.vmem %s6372_s12, %s4268_s26  ;;  %s359_s9 = scalar_lea.vmem %s6372_s12, %s4269_s24 }
 0x16a   :  { %v348_v3 = vld [vmem:[%s347_s2] sm:$0x1]  ;;  %345 = vst.msk [vmem:[#allocation2 + $0x2] sm:$0x1] %vm336_vm0, %v344_v2  ;;  %s363_s10 = scalar_lea.vmem %s6372_s12, %s4270_s6  ;;  %s367_s11 = scalar_lea.vmem %s6372_s12, %s5866_s5  ;;  %v628_v1 = vsub.s32 0, %v5944_v0 }
 0x16b   :  { %349 = vst.msk [vmem:[#allocation2 + $0x3] sm:$0x1] %vm336_vm0, %v348_v3  ;;  %v352_v4 = vld [vmem:[%s351_s17] sm:$0x1]  ;;  %s371_s15 = scalar_lea.vmem %s6372_s12, %s5868_s25  ;;  %s6373_s4 = sld [smem:[#allocation42_spill]] }
 0x16c   :  { %v356_v5 = vld [vmem:[%s355_s7] sm:$0x1]  ;;  %353 = vst.msk [vmem:[#allocation2 + $0x4] sm:$0x1] %vm336_vm0, %v352_v4  ;;  %s375_s3 = scalar_lea.vmem %s6372_s12, %s5870_s28  ;;  %s379_s30 = scalar_lea.vmem %s6372_s12, %s5872_s0 }
 0x16d   :  { %357 = vst.msk [vmem:[#allocation2 + $0x5] sm:$0x1] %vm336_vm0, %v356_v5  ;;  %v360_v6 = vld [vmem:[%s359_s9] sm:$0x1]  ;;  %s4275_s14 = sld [smem:[#allocation3 + $0x84]]  ;;  %s4276_s16 = sld [smem:[#allocation3 + $0x85]] }
 0x16e   :  { %v364_v7 = vld [vmem:[%s363_s10] sm:$0x1]  ;;  %361 = vst.msk [vmem:[#allocation2 + $0x6] sm:$0x1] %vm336_vm0, %v360_v6  ;;  %s4277_s21 = sld [smem:[#allocation3 + $0x86]]  ;;  %s4278_s18 = sld [smem:[#allocation3 + $0x87]] }
 0x16f   :  { %365 = vst.msk [vmem:[#allocation2 + $0x7] sm:$0x1] %vm336_vm0, %v364_v7  ;;  %v368_v8 = vld [vmem:[%s367_s11] sm:$0x1]  ;;  %s6374_s24 = sld [smem:[#allocation45_spill]]  ;;  %s6376_s6 = sld [smem:[#allocation44_spill]] }
 0x170   :  { %v372_v9 = vld [vmem:[%s371_s15] sm:$0x1]  ;;  %369 = vst.msk [vmem:[#allocation2 + $0x8] sm:$0x1] %vm336_vm0, %v368_v8  ;;  %s6377_s5 = sld [smem:[#allocation40_spill]]  ;;  %s5612_s25 = smov 112  }
 0x171   :  { %373 = vst.msk [vmem:[#allocation2 + $0x9] sm:$0x1] %vm336_vm0, %v372_v9  ;;  %v376_v10 = vld [vmem:[%s375_s3] sm:$0x1]  ;;  %v401_v20 = vld [vmem:[%s6373_s4 + $0x8] sm:$0xff]  ;;  %s5613_s28 = smov 64  }
 0x172   :  { %v380_v11 = vld [vmem:[%s379_s30] sm:$0x1]  ;;  %377 = vst.msk [vmem:[#allocation2 + $0xa] sm:$0x1] %vm336_vm0, %v376_v10  ;;  %s5614_s0 = smov 96   ;;  %s5615_s1 = smov 80  }
 0x173   :  { %381 = vst.msk [vmem:[#allocation2 + $0xb] sm:$0x1] %vm336_vm0, %v380_v11  ;;  %v400_v12 = vld [vmem:[%s6373_s4] sm:$0xff]  ;;  %s383_s22 = scalar_lea.vmem %s6372_s12, %s4275_s14  ;;  %s387_s19 = scalar_lea.vmem %s6372_s12, %s4276_s16 }
 0x174   :  { %v384_v15 = vld [vmem:[%s383_s22] sm:$0x1]  ;;  %s391_s23 = scalar_lea.vmem %s6372_s12, %s4277_s21  ;;  %s395_s26 = scalar_lea.vmem %s6372_s12, %s4278_s18 }
 0x175   :  { %385 = vst.msk [vmem:[#allocation2 + $0xc] sm:$0x1] %vm336_vm0, %v384_v15  ;;  %v388_v16 = vld [vmem:[%s387_s19] sm:$0x1]  ;;  %v452_v35 = vld [vmem:[%s6374_s24 + $0x8] sm:$0xff]  ;;  %v453_v36 = vld [vmem:[%s6374_s24 + $0x10] sm:$0xff] }
 0x176   :  { %v398_v13 = vld [vmem:[#allocation2] sm:$0xff]  ;;  %389 = vst.msk [vmem:[#allocation2 + $0xd] sm:$0x1] %vm336_vm0, %v388_v16  ;;  %s6375_s12 = sld [smem:[#allocation43_spill]]  ;;  %v454_v38 = vld [vmem:[%s6374_s24 + $0x18] sm:$0xff]  ;;  %s5616_s27 = smov 48  }
 0x177   :  { %v402_v14 = vadd.f32 %v400_v12, %v398_v13  ;;  %v392_v17 = vld [vmem:[%s391_s23] sm:$0x1]  ;;  %v4844_v39 = vpack.c.bf16 %v454_v38, %v453_v36  ;;  %s6378_s20 = sld [smem:[#allocation46_spill]]  ;;  %s6379_s2 = sld [smem:[#allocation47_spill]] }
 0x178   :  { %393 = vst.msk [vmem:[#allocation2 + $0xe] sm:$0x1] %vm336_vm0, %v392_v17  ;;  %v396_v19 = vld [vmem:[%s395_s26] sm:$0x1]  ;;  %s6380_s17 = sld [smem:[#allocation48_spill]]  ;;  %s6381_s7 = sld [smem:[#allocation49_spill]] }
 0x179   :  { %v407_v18 = vsel %vm406_vm1, %v402_v14, 0.0  ;;  %397 = vst.msk [vmem:[#allocation2 + $0xf] sm:$0x1] %vm336_vm0, %v396_v19  ;;  %v451_v34 = vld [vmem:[%s6374_s24] sm:$0xff]  ;;  %s6382_s9 = sld [smem:[#allocation50_spill]]  ;;  %s6383_s10 = sld [smem:[#allocation51_spill]] }
 0x17a   :  { %408 = vadd.xlane.f32.xlu0 %v407_v18  ;;  %v4840_v37 = vpack.c.bf16 %v452_v35, %v451_v34  ;;  %v4280_v49 = vld [vmem:[%s6376_s6] ss:$0 sm:$0xff]  ;;  %s6384_s11 = sld [smem:[#allocation52_spill]]  ;;  %s6385_s15 = sld [smem:[#allocation53_spill]] }
 0x17b   :  { %v5948_v2 = vld [vmem:[%s6377_s5] sm:$0x3]  ;;  %s6386_s4 = sld [smem:[#allocation56_spill]]  ;;  %s6387_s3 = sld [smem:[#allocation57_spill]] }
 0x17c   :  { %4841 = vmatprep.subr.bf16.mxu0 %v4840_v37  ;;  %v4279_v47 = vld [vmem:[%s6375_s12] ss:$0 sm:$0xff]  ;;  %v5951_v3 = vrot.slane %v5948_v2, %v628_v1  ;;  %s6388_s30 = sld [smem:[#allocation55_spill]]  ;;  %s5619_s14 = smov [#allocation29]  }
 0x17d   :  { %4843 = vmatpush3.bf16.msra.mxu0 %v4840_v37  ;;  %v545_v34 = vld [vmem:[%s6378_s20 + $0x10] sm:$0xff]  ;;  %v546_v35 = vld [vmem:[%s6378_s20 + $0x18] sm:$0xff]  ;;  %v543_v38 = vld [vmem:[%s6378_s20] sm:$0xff]  ;;  %s4196_s16 = sshll.u32 %s5619_s14, 4  ;;  %s4197_s16 = int_to_ptr.vmem [resolvable:$true] %s4196_s16 }
 0x17e   :  { %4845 = vmatprep.subr.bf16.mxu0 %v4844_v39  ;;  %v4849_v36 = vpack.c.bf16 %v546_v35, %v545_v34  ;;  %p5522_p0 = scmp.lt.s32.totalorder %s4197_s16, %s4197_s16 }
 0x180   :  { %v399_v21 = vld [vmem:[#allocation2 + $0x8] sm:$0xff] }
 0x181   :  { %v403_v22 = vadd.f32 %v401_v20, %v399_v21  ;;  %4847 = vmatpush3.bf16.msra.mxu0 %v4844_v39  ;;  %v544_v39 = vld [vmem:[%s6378_s20 + $0x8] sm:$0xff] }
 0x183   :  { %v410_v23 = vsel %vm406_vm1, %v403_v22, 0.0 }
 0x184   :  { %411 = vadd.xlane.f32.xlu0 %v410_v23 }
 0x207   :  { %v409_v24 = vpop.xlane.xlu0 %408 }
 0x208   :  { %v414_v25 = vmul.f32 0.03125, %v409_v24 }
 0x20a   :  { %v416_v26 = vsub.f32 %v402_v14, %v414_v25 }
 0x20c   :  { %v418_v27 = vmul.f32 %v416_v26, %v416_v26 }
 0x20e   :  { %v420_v28 = vsel %vm406_vm1, %v418_v27, 0.0 }
 0x20f   :  { %421 = vadd.xlane.f32.xlu1 %v420_v28 }
 0x211   :  { %v412_v29 = vpop.xlane.xlu0 %411 }
 0x212   :  { %v415_v30 = vmul.f32 0.03125, %v412_v29 }
 0x214   :  { %v417_v31 = vsub.f32 %v403_v22, %v415_v30 }
 0x216   :  { %v419_v32 = vmul.f32 %v417_v31, %v417_v31 }
 0x218   :  { %v423_v33 = vsel %vm406_vm1, %v419_v32, 0.0 }
 0x219   :  { %424 = vadd.xlane.f32.xlu1 %v423_v33  ;;  %v5617_v33 = vmov 0.0|0.0  }
 0x21a   :  { %4848 = vmatprep.subr.bf16.mxu0 %v5617_v33 }
 0x29c   :  { %v422_v40 = vpop.xlane.xlu1 %421 }
 0x29d   :  { %v426_v41 = vmul.f32 0.03125, %v422_v40 }
 0x29f   :  { %v428_v42 = vadd.f32 1e-12, %v426_v41  ;;  %v5984_v41 = vpack.c.bf16 %v544_v39, %v543_v38 }
 0x2a1   :  { %5051 = vrsqrt.f32 %v428_v42 }
 0x2a6   :  { %v425_v43 = vpop.xlane.xlu1 %424 }
 0x2a7   :  { %v427_v44 = vmul.f32 0.03125, %v425_v43 }
 0x2a9   :  { %v429_v45 = vadd.f32 1e-12, %v427_v44 }
 0x2ab   :  { %v5052_v46 = vpop.eup %5051  ;;  %5053 = vrsqrt.f32 %v429_v45 }
 0x2ac   :  { %v432_v48 = vmul.f32 %v5052_v46, %v416_v26 }
 0x2ae   :  { %v440_v50 = vmul.f32 %v4279_v47, %v432_v48 }
 0x2b0   :  { %v5922_v51 = vadd.f32 %v4280_v49, %v440_v50  ;;  %v1112_v50 = vsub.s32 1, %v5944_v0 }
 0x2b2   :  { %4520 = vmatprep.mubr.msk.f32.mxu0 %vm406_vm1, %v5922_v51 }
 0x2b5   :  { %v5054_v52 = vpop.eup %5053 }
 0x2b6   :  { %v433_v53 = vmul.f32 %v5054_v52, %v417_v31 }
 0x2b8   :  { %v441_v54 = vmul.f32 %v4279_v47, %v433_v53 }
 0x2ba   :  { %v5926_v55 = vadd.f32 %v4280_v49, %v441_v54 }
 0x2bc   :  { %4521 = vmatmul.mubr.msk.f32.vlgmr.msra.gmra.mrb[0].mxu0 %vm406_vm1, %v5926_v55 }
 0x2bd   :  { %4547 = vmatprep.mubr.msk.f32.mxu0 %vm5611_vm2, %v5610_v56  ;;  %4850 = vmatpush3.bf16.msra.mxu0 %v4849_v36 }
 0x2be   :  { %4557 = vmatprep.subr.mxu0 %v5610_v56 }
 0x38f   :  { %v4522_v58 = vpop.f32.mrb[0].mxu0 }
 0x390   :  { %v5935_v59 = vadd.f32 %v4522_v58, %v4281_v57  ;;  %v534_v60 = vpop.f32.mrb[1].mxu0 }
 0x391   :  { %v535_v61 = vadd.f32 %v4281_v57, %v534_v60  ;;  %v6010_v57 = vrot.slane %v5948_v2, %v1112_v50  ;;  %v4300_v2 = vld [vmem:[#allocation8] ss:$0 sm:$0xff] }
 0x393   :  { %548 = vrot.lane.b32.xlu0 %v535_v61, %s5612_s25 }
 0x397   :  { %721 = vrot.lane.b32.xlu0 %v535_v61, %s5613_s28 }
 0x405   :  { %v549_v62 = vpop.permute.xlu0 %548 }
 0x406   :  { %4524 = vmatpush3.xpose.msk.msra.mxu1 %vm550_vm3, %v549_v62 }
 0x407   :  { %4528 = vmatprep.subr.mxu1 %v5610_v56 }
 0x409   :  { %4526 = vmatmul.mubr.msk.f32.vlgmr.msra.gmra.mrb[0].mxu1 %vm550_vm3, %v535_v61  ;;  %v722_v18 = vpop.permute.xlu0 %721 }
 0x40a   :  { %4530 = vmatprep.mubr.msk.f32.mxu1 %vm5611_vm2, %v5610_v56 }
 0x4dc   :  { %v621_v4 = vpop.f32.mrb[0].mxu1 }
 0x4dd   :  { %v625_v5 = vmul.f32 0.25, %v621_v4  ;;  %v4527_v6 = vpop.f32.mrb[1].mxu1 }
 0x4df   :  { %v630_v7 = vadd.f32 %v5951_v3, %v625_v5 }
 0x4e1   :  { %v632_v8 = vsel %vm631_vm4, %v630_v7, -inf }
 0x4e2   :  { %633 = vmax.xlane.f32.xlu1 %v632_v8 }
 0x4f3   :  { %643 = vrot.lane.b32.xlu1 %v535_v61, %s5614_s0 }
 0x56f   :  { %v634_v9 = vpop.xlane.xlu1 %633 }
 0x570   :  { %v635_v10 = vsub.f32 %v630_v7, %v634_v9 }
 0x572   :  { %v636_v11 = vmul.f32 1.442695, %v635_v10 }
 0x573   :  { %v644_v12 = vpop.permute.xlu1 %643 }
 0x574   :  { %5055 = vpow2.f32 %v636_v11  ;;  %4529 = vmatpush3.msra.mxu1 %v644_v12 }
 0x575   :  { %4533 = vmatprep.subr.mxu1 %v5610_v56 }
 0x57e   :  { %v5056_v13 = vpop.eup %5055 }
 0x57f   :  { %v638_v14 = vsel %vm631_vm4, %v5056_v13, 0.0 }
 0x580   :  { %639 = vadd.xlane.f32.xlu1 %v638_v14 }
 0x591   :  { %719 = vrot.lane.b32.xlu1 %v535_v61, %s5615_s1 }
 0x60d   :  { %v640_v15 = vpop.xlane.xlu1 %639 }
 0x60e   :  { %5057 = vrcp.f32 %v640_v15 }
 0x611   :  { %v720_v19 = vpop.permute.xlu1 %719 }
 0x618   :  { %v5058_v16 = vpop.eup %5057 }
 0x619   :  { %v642_v17 = vmul.f32 %v5058_v16, %v5056_v13 }
 0x61b   :  { %4531 = vmatmul.mubr.msk.f32.vlgmr.msra.gmra.mrb[2].mxu1 %vm631_vm4, %v642_v17 }
 0x61c   :  { %4534 = vmatpush3.xpose.msk.msra.mxu1 %vm550_vm3, %v722_v18  ;;  %4535 = vmatprep.mubr.msk.f32.mxu1 %vm5611_vm2, %v5610_v56 }
 0x61d   :  { %4538 = vmatprep.subr.mxu1 %v5610_v56 }
 0x61f   :  { %4536 = vmatmul.mubr.msk.f32.vlgmr.msra.gmra.mrb[4].mxu1 %vm550_vm3, %v720_v19 }
 0x620   :  { %4540 = vmatprep.mubr.msk.f32.mxu1 %vm5611_vm2, %v5610_v56 }
 0x6ee   :  { %v715_v20 = vpop.f32.mrb[2].mxu1 }
 0x6ef   :  { %v4532_v21 = vpop.f32.mrb[3].mxu1 }
 0x6f2   :  { %v793_v22 = vpop.f32.mrb[4].mxu1 }
 0x6f3   :  { %v797_v23 = vmul.f32 0.25, %v793_v22  ;;  %v4537_v24 = vpop.f32.mrb[5].mxu1 }
 0x6f5   :  { %v798_v25 = vadd.f32 %v797_v23, %v5951_v3 }
 0x6f7   :  { %v799_v26 = vsel %vm631_vm4, %v798_v25, -inf }
 0x6f8   :  { %800 = vmax.xlane.f32.xlu0 %v799_v26 }
 0x70e   :  { %810 = vrot.lane.b32.xlu0 %v535_v61, %s5616_s27 }
 0x712   :  { %1204 = vrot.lane.b32.xlu0 %v5935_v59, %s5613_s28 }
 0x785   :  { %v801_v27 = vpop.xlane.xlu0 %800 }
 0x786   :  { %v802_v28 = vsub.f32 %v798_v25, %v801_v27 }
 0x788   :  { %v803_v29 = vmul.f32 1.442695, %v802_v28 }
 0x789   :  { %v811_v30 = vpop.permute.xlu0 %810 }
 0x78a   :  { %5059 = vpow2.f32 %v803_v29  ;;  %4539 = vmatpush3.msra.mxu1 %v811_v30 }
 0x78b   :  { %4851 = vmatprep.subr.bf16.mxu1 %v5617_v33 }
 0x78d   :  { %v1205_v47 = vpop.permute.xlu0 %1204 }
 0x794   :  { %v5060_v31 = vpop.eup %5059 }
 0x795   :  { %v805_v32 = vsel %vm631_vm4, %v5060_v31, 0.0 }
 0x796   :  { %806 = vadd.xlane.f32.xlu1 %v805_v32 }
 0x7a7   :  { %1033 = vrot.lane.b32.xlu1 %v5935_v59, %s5612_s25 }
 0x7ab   :  { %1202 = vrot.lane.b32.xlu1 %v5935_v59, %s5615_s1 }
 0x823   :  { %v807_v37 = vpop.xlane.xlu1 %806 }
 0x824   :  { %5061 = vrcp.f32 %v807_v37 }
 0x827   :  { %v1034_v44 = vpop.permute.xlu1 %1033 }
 0x82b   :  { %v1203_v49 = vpop.permute.xlu1 %1202 }
 0x82e   :  { %v5062_v40 = vpop.eup %5061 }
 0x82f   :  { %v809_v42 = vmul.f32 %v5062_v40, %v5060_v31 }
 0x831   :  { %4541 = vmatmul.mubr.msk.f32.vlgmr.msra.gmra.mrb[6].mxu1 %vm631_vm4, %v809_v42 }
 0x832   :  { %4853 = vmatpush3.bf16.msra.mxu1 %v5984_v41  ;;  %4554 = vmatprep.mubr.msk.f32.mxu1 %vm5611_vm2, %v5610_v56 }
 0x833   :  { %4562 = vmatprep.subr.mxu1 %v5610_v56 }
 0x835   :  { %4555 = vmatmul.mubr.msk.f32.vlgmr.msra.gmra.mrb[8].mxu1 %vm550_vm3, %v715_v20 }
 0x836   :  { %4564 = vmatprep.mubr.msk.f32.mxu1 %vm5611_vm2, %v5610_v56 }
 0x904   :  { %v882_v43 = vpop.f32.mrb[6].mxu1 }
 0x905   :  { %v4542_v45 = vpop.f32.mrb[7].mxu1  ;;  %4548 = vmatmul.mubr.msk.f32.vlgmr.msra.gmra.mrb[2].mxu0 %vm550_vm3, %v882_v43 }
 0x906   :  { %4558 = vmatpush3.xpose.msk.msra.mxu0 %vm550_vm3, %v1034_v44  ;;  %4559 = vmatprep.mubr.msk.f32.mxu0 %vm5611_vm2, %v5610_v56 }
 0x907   :  { %4567 = vmatprep.subr.mxu0 %v5610_v56 }
 0x908   :  { %v1028_v46 = vpop.f32.mrb[8].mxu1 }
 0x909   :  { %v4556_v48 = vpop.f32.mrb[9].mxu1  ;;  %4560 = vmatmul.mubr.msk.f32.vlgmr.msra.gmra.mrb[4].mxu0 %vm550_vm3, %v5935_v59 }
 0x90a   :  { %4568 = vmatpush3.xpose.msk.msra.mxu0 %vm550_vm3, %v1205_v47  ;;  %4569 = vmatprep.mubr.msk.f32.mxu0 %vm5611_vm2, %v5610_v56 }
 0x90b   :  { %4854 = vmatprep.subr.bf16.mxu0 %v5617_v33 }
 0x90d   :  { %4570 = vmatmul.mubr.msk.f32.vlgmr.msra.gmra.mrb[6].mxu0 %vm550_vm3, %v1203_v49 }
 0x90e   :  { %4856 = vmatpush3.bf16.msra.mxu0 %v4849_v36  ;;  %4581 = vmatprep.mubr.msk.f32.mxu0 %vm5611_vm2, %v5610_v56 }
 0x9d8   :  { %v955_v52 = vpop.f32.mrb[2].mxu0 }
 0x9d9   :  { %v1029_v53 = vadd.f32 %v1028_v46, %v955_v52  ;;  %v4549_v54 = vpop.f32.mrb[3].mxu0 }
 0x9db   :  { %v1522_v7 = vadd.f32 %v4300_v2, %v1029_v53  ;;  %v4301_v53 = vld [vmem:[#allocation10] ss:$0 sm:$0xff] }
 0x9dc   :  { %v1105_v58 = vpop.f32.mrb[4].mxu0 }
 0x9dd   :  { %v1109_v60 = vmul.f32 0.25, %v1105_v58  ;;  %v4561_v61 = vpop.f32.mrb[5].mxu0  ;;  %v1524_v8 = vadd.f32 %v1522_v7, %v5922_v51  ;;  %v4302_v58 = vld [vmem:[#allocation11] ss:$0 sm:$0xff] }
 0x9df   :  { %v1114_v62 = vadd.f32 %v6010_v57, %v1109_v60  ;;  %v1528_v9 = vsel %vm406_vm1, %v1524_v8, 0.0 }
 0x9e0   :  { %v1276_v63 = vpop.f32.mrb[6].mxu0 }
 0x9e1   :  { %v1280_v1 = vmul.f32 0.25, %v1276_v63  ;;  %v4571_v4 = vpop.f32.mrb[7].mxu0  ;;  %v1115_v5 = vsel %vm631_vm4, %v1114_v62, -inf  ;;  %v1571_v63 = vld [vmem:[%s6379_s2 + $0x8] sm:$0xff] }
 0x9e2   :  { %1116 = vmax.xlane.f32.xlu0 %v1115_v5  ;;  %v1572_v4 = vld [vmem:[%s6379_s2 + $0x10] sm:$0xff]  ;;  %v1573_v5 = vld [vmem:[%s6379_s2 + $0x18] sm:$0xff] }
 0x9e3   :  { %v1281_v6 = vadd.f32 %v1280_v1, %v6010_v57 }
 0x9e5   :  { %v1282_v0 = vsel %vm631_vm4, %v1281_v6, -inf }
 0x9e6   :  { %1283 = vmax.xlane.f32.xlu1 %v1282_v0 }
 0x9f7   :  { %1293 = vrot.lane.b32.xlu1 %v5935_v59, %s5616_s27 }
 0xa1b   :  { %1529 = vadd.xlane.f32.xlu1 %v1528_v9 }
 0xa6f   :  { %v1117_v10 = vpop.xlane.xlu0 %1116 }
 0xa70   :  { %v1118_v11 = vsub.f32 %v1114_v62, %v1117_v10  ;;  %v1570_v62 = vld [vmem:[%s6379_s2] sm:$0xff] }
 0xa71   :  { %v4860_v1 = vpack.c.bf16 %v1571_v63, %v1570_v62 }
 0xa72   :  { %v1119_v12 = vmul.f32 1.442695, %v1118_v11 }
 0xa73   :  { %v1284_v13 = vpop.xlane.xlu1 %1283  ;;  %4861 = vmatprep.subr.bf16.mxu0 %v4860_v1 }
 0xa74   :  { %5063 = vpow2.f32 %v1119_v12  ;;  %v1285_v14 = vsub.f32 %v1281_v6, %v1284_v13  ;;  %v4864_v6 = vpack.c.bf16 %v1573_v5, %v1572_v4  ;;  %v1680_v12 = vld [vmem:[%s6380_s17] sm:$0xff]  ;;  %v1681_v13 = vld [vmem:[%s6380_s17 + $0x8] sm:$0xff] }
 0xa76   :  { %v1286_v15 = vmul.f32 1.442695, %v1285_v14  ;;  %v4868_v14 = vpack.c.bf16 %v1681_v13, %v1680_v12 }
 0xa77   :  { %v1294_v24 = vpop.permute.xlu1 %1293 }
 0xa78   :  { %5065 = vpow2.f32 %v1286_v15  ;;  %v1682_v15 = vld [vmem:[%s6380_s17 + $0x10] sm:$0xff] }
 0xa7e   :  { %v5064_v16 = vpop.eup %5063 }
 0xa7f   :  { %v1121_v17 = vsel %vm631_vm4, %v5064_v16, 0.0 }
 0xa80   :  { %1122 = vadd.xlane.f32.xlu0 %v1121_v17 }
 0xa82   :  { %v5066_v18 = vpop.eup %5065 }
 0xa83   :  { %v1288_v19 = vsel %vm631_vm4, %v5066_v18, 0.0 }
 0xa84   :  { %1289 = vadd.xlane.f32.xlu0 %v1288_v19  ;;  %v1685_v19 = vld [vmem:[%s6380_s17 + $0x28] sm:$0xff] }
 0xa9a   :  { %1126 = vrot.lane.b32.xlu0 %v5935_v59, %s5614_s0 }
 0xaa8   :  { %v1530_v30 = vpop.xlane.xlu1 %1529 }
 0xaa9   :  { %v1534_v34 = vmul.f32 0.03125, %v1530_v30 }
 0xaab   :  { %v1536_v38 = vsub.f32 %v1524_v8, %v1534_v34 }
 0xaad   :  { %v1538_v42 = vmul.f32 %v1536_v38, %v1536_v38 }
 0xaaf   :  { %v1540_v43 = vsel %vm406_vm1, %v1538_v42, 0.0 }
 0xb0d   :  { %v1123_v51 = vpop.xlane.xlu0 %1122 }
 0xb0e   :  { %5067 = vrcp.f32 %v1123_v51 }
 0xb11   :  { %v1290_v20 = vpop.xlane.xlu0 %1289 }
 0xb12   :  { %5069 = vrcp.f32 %v1290_v20  ;;  %v1686_v20 = vld [vmem:[%s6380_s17 + $0x30] sm:$0xff] }
 0xb15   :  { %v1127_v21 = vpop.permute.xlu0 %1126 }
 0xb16   :  { %4563 = vmatpush3.msra.mxu1 %v1127_v21  ;;  %v1687_v21 = vld [vmem:[%s6380_s17 + $0x38] sm:$0xff] }
 0xb17   :  { %4572 = vmatprep.subr.mxu1 %v5610_v56 }
 0xb18   :  { %v5068_v22 = vpop.eup %5067 }
 0xb19   :  { %v1125_v23 = vmul.f32 %v5068_v22, %v5064_v16  ;;  %v1683_v16 = vld [vmem:[%s6380_s17 + $0x18] sm:$0xff]  ;;  %v4880_v22 = vpack.c.bf16 %v1687_v21, %v1686_v20 }
 0xb1a   :  { %v4872_v17 = vpack.c.bf16 %v1683_v16, %v1682_v15 }
 0xb1b   :  { %4565 = vmatmul.mubr.msk.f32.vlgmr.msra.gmra.mrb[10].mxu1 %vm631_vm4, %v1125_v23  ;;  %v4303_v23 = vld [vmem:[#allocation13] ss:$0 sm:$0xff] }
 0xb1c   :  { %v5070_v25 = vpop.eup %5069  ;;  %4573 = vmatpush3.msra.mxu1 %v1294_v24  ;;  %4574 = vmatprep.mubr.msk.f32.mxu1 %vm5611_vm2, %v5610_v56 }
 0xb1d   :  { %v1292_v26 = vmul.f32 %v5070_v25, %v5066_v18  ;;  %4857 = vmatprep.subr.bf16.mxu1 %v5617_v33  ;;  %v1684_v18 = vld [vmem:[%s6380_s17 + $0x20] sm:$0xff] }
 0xb1e   :  { %v4876_v51 = vpack.c.bf16 %v1685_v19, %v1684_v18  ;;  %v4309_v19 = vld [vmem:[#allocation16] ss:$0 sm:$0xff] }
 0xb1f   :  { %4575 = vmatmul.mubr.msk.f32.vlgmr.msra.gmra.mrb[12].mxu1 %vm631_vm4, %v1292_v26 }
 0xb20   :  { %4859 = vmatpush3.bf16.msra.mxu1 %v5984_v41  ;;  %4588 = vmatprep.mubr.msk.f32.mxu1 %vm5611_vm2, %v5610_v56 }
 0xb21   :  { %4869 = vmatprep.subr.bf16.mxu1 %v4868_v14 }
 0xbee   :  { %v1198_v59 = vpop.f32.mrb[10].mxu1 }
 0xbef   :  { %v4566_v27 = vpop.f32.mrb[11].mxu1  ;;  %4589 = vmatmul.mubr.msk.f32.vlgmr.msra.gmra.mrb[14].mxu1 %vm550_vm3, %v1198_v59 }
 0xbf0   :  { %4871 = vmatpush3.bf16.msra.mxu1 %v4868_v14 }
 0xbf1   :  { %4873 = vmatprep.subr.bf16.mxu1 %v4872_v17 }
 0xbf2   :  { %v1365_v28 = vpop.f32.mrb[12].mxu1 }
 0xbf3   :  { %v4576_v29 = vpop.f32.mrb[13].mxu1  ;;  %4582 = vmatmul.mubr.msk.f32.vlgmr.msra.gmra.mrb[8].mxu0 %vm550_vm3, %v1365_v28 }
 0xbf4   :  { %4863 = vmatpush3.bf16.msra.mxu0 %v4860_v1  ;;  %4875 = vmatpush3.bf16.msra.mxu1 %v4872_v17 }
 0xbf5   :  { %4865 = vmatprep.subr.bf16.mxu0 %v4864_v6  ;;  %4877 = vmatprep.subr.bf16.mxu1 %v4876_v51 }
 0xbf8   :  { %4867 = vmatpush3.bf16.msra.mxu0 %v4864_v6  ;;  %4879 = vmatpush3.bf16.msra.mxu1 %v4876_v51 }
 0xbf9   :  { %4881 = vmatprep.subr.bf16.mxu1 %v4880_v22 }
 0xbfc   :  { %4883 = vmatpush3.bf16.msra.mxu1 %v4880_v22  ;;  %v4310_v22 = vld [vmem:[#allocation17] ss:$0 sm:$0xff] }
 0xbfd   :  { %4637 = vmatprep.subr.mxu1 %v5610_v56 }
 0xcc2   :  { %v1511_v31 = vpop.f32.mrb[14].mxu1 }
 0xcc3   :  { %v4590_v32 = vpop.f32.mrb[15].mxu1 }
 0xcc6   :  { %v1438_v35 = vpop.f32.mrb[8].mxu0 }
 0xcc7   :  { %v1512_v36 = vadd.f32 %v1511_v31, %v1438_v35  ;;  %v4583_v37 = vpop.f32.mrb[9].mxu0 }
 0xcc9   :  { %v1523_v39 = vadd.f32 %v4300_v2, %v1512_v36 }
 0xccb   :  { %v1525_v40 = vadd.f32 %v1523_v39, %v5926_v55 }
 0xccd   :  { %v1531_v41 = vsel %vm406_vm1, %v1525_v40, 0.0 }
 0xcce   :  { %1532 = vadd.xlane.f32.xlu0 %v1531_v41 }
 0xcd2   :  { %1541 = vadd.xlane.f32.xlu0 %v1540_v43 }
 0xd5b   :  { %v1533_v44 = vpop.xlane.xlu0 %1532 }
 0xd5c   :  { %v1535_v45 = vmul.f32 0.03125, %v1533_v44 }
 0xd5e   :  { %v1537_v46 = vsub.f32 %v1525_v40, %v1535_v45 }
 0xd5f   :  { %v1542_v47 = vpop.xlane.xlu0 %1541 }
 0xd60   :  { %v1546_v48 = vmul.f32 0.03125, %v1542_v47  ;;  %v1539_v49 = vmul.f32 %v1537_v46, %v1537_v46 }
 0xd62   :  { %v1548_v50 = vadd.f32 1e-12, %v1546_v48  ;;  %v1543_v52 = vsel %vm406_vm1, %v1539_v49, 0.0 }
 0xd63   :  { %1544 = vadd.xlane.f32.xlu1 %v1543_v52 }
 0xd64   :  { %5071 = vrsqrt.f32 %v1548_v50 }
 0xd6e   :  { %v5072_v55 = vpop.eup %5071 }
 0xd6f   :  { %v1552_v54 = vmul.f32 %v5072_v55, %v1536_v38 }
 0xd71   :  { %v1560_v60 = vmul.f32 %v4301_v53, %v1552_v54 }
 0xd73   :  { %v6039_v61 = vadd.f32 %v4302_v58, %v1560_v60 }
 0xd75   :  { %4599 = vmatprep.mubr.msk.f32.mxu0 %vm406_vm1, %v6039_v61 }
 0xdf0   :  { %v1545_v0 = vpop.xlane.xlu1 %1544 }
 0xdf1   :  { %v1547_v2 = vmul.f32 0.03125, %v1545_v0 }
 0xdf3   :  { %v1549_v7 = vadd.f32 1e-12, %v1547_v2  ;;  %v1823_v2 = vld [vmem:[%s6381_s7] sm:$0xff] }
 0xdf5   :  { %5073 = vrsqrt.f32 %v1549_v7  ;;  %v1824_v7 = vld [vmem:[%s6381_s7 + $0x8] sm:$0xff] }
 0xdff   :  { %v5074_v8 = vpop.eup %5073 }
 0xe00   :  { %v1553_v9 = vmul.f32 %v5074_v8, %v1537_v46  ;;  %v4306_v46 = vld [vmem:[#allocation14] ss:$0 sm:$0xff]  ;;  %v4884_v8 = vpack.c.bf16 %v1824_v7, %v1823_v2 }
 0xe02   :  { %v1561_v10 = vmul.f32 %v4301_v53, %v1553_v9  ;;  %v1825_v9 = vld [vmem:[%s6381_s7 + $0x10] sm:$0xff]  ;;  %4885 = vmatprep.subr.bf16.mxu0 %v4884_v8 }
 0xe04   :  { %v1569_v11 = vadd.f32 %v4302_v58, %v1561_v10  ;;  %v1826_v10 = vld [vmem:[%s6381_s7 + $0x18] sm:$0xff] }
 0xe06   :  { %4600 = vmatmul.mubr.msk.f32.vlgmr.msra.gmra.mrb[10].mxu0 %vm406_vm1, %v1569_v11 }
 0xe07   :  { %4887 = vmatpush3.bf16.msra.mxu0 %v4884_v8 }
 0xed9   :  { %v4601_v24 = vpop.f32.mrb[10].mxu0 }
 0xeda   :  { %v1659_v25 = vadd.f32 %v4601_v24, %v4303_v23  ;;  %v1653_v26 = vpop.f32.mrb[11].mxu0 }
 0xedb   :  { %v1654_v59 = vadd.f32 %v4303_v23, %v1653_v26 }
 0xedc   :  { %v1665_v27 = vmul.f32 0.044715, %v1659_v25  ;;  %v1663_v43 = vmul.f32 0.5, %v1659_v25 }
 0xedd   :  { %v1664_v28 = vmul.f32 0.044715, %v1654_v59  ;;  %v1662_v41 = vmul.f32 0.5, %v1654_v59 }
 0xede   :  { %v1667_v29 = vmul.f32 %v1665_v27, %v1659_v25 }
 0xedf   :  { %v1666_v30 = vmul.f32 %v1664_v28, %v1654_v59 }
 0xee0   :  { %v1669_v31 = vmul.f32 %v1667_v29, %v1659_v25 }
 0xee1   :  { %v1668_v32 = vmul.f32 %v1666_v30, %v1654_v59 }
 0xee2   :  { %v1671_v34 = vadd.f32 %v1669_v31, %v1659_v25 }
 0xee3   :  { %v1670_v35 = vadd.f32 %v1668_v32, %v1654_v59  ;;  %v4311_v59 = vld [vmem:[%s6382_s9] ss:$0 sm:$0xff] }
 0xee4   :  { %v1673_v36 = vmul.f32 0.7978846, %v1671_v34 }
 0xee5   :  { %v1672_v37 = vmul.f32 0.7978846, %v1670_v35 }
 0xee6   :  { %5075 = vtanh.f32 %v1673_v36 }
 0xee7   :  { %5077 = vtanh.f32 %v1672_v37 }
 0xef0   :  { %v5076_v38 = vpop.eup %5075 }
 0xef1   :  { %v5078_v39 = vpop.eup %5077  ;;  %v1677_v40 = vadd.f32 1.0, %v5076_v38 }
 0xef2   :  { %v1676_v42 = vadd.f32 1.0, %v5078_v39 }
 0xef3   :  { %v1679_v45 = vmul.f32 %v1677_v40, %v1663_v43 }
 0xef4   :  { %v1678_v44 = vmul.f32 %v1676_v42, %v1662_v41 }
 0xef6   :  { %4618 = vmatprep.mubr.msk.f32.mxu1 %vm1695_vm5, %v1678_v44 }
 0xef7   :  { %4619 = vmatmul.mubr.msk.f32.vlgmr.msra.gmra.mrb[16].mxu1 %vm1695_vm5, %v1679_v45 }
 0xef8   :  { %4639 = vmatprep.mubr.msk.f32.mxu1 %vm5611_vm2, %v5610_v56 }
 0xfca   :  { %v4620_v47 = vpop.f32.mrb[16].mxu1 }
 0xfcb   :  { %v1774_v48 = vadd.f32 %v4620_v47, %v4306_v46  ;;  %v1768_v49 = vpop.f32.mrb[17].mxu1 }
 0xfcc   :  { %v1769_v50 = vadd.f32 %v4306_v46, %v1768_v49 }
 0xfcd   :  { %v1778_v52 = vadd.f32 %v1774_v48, %v1569_v11  ;;  %v4888_v11 = vpack.c.bf16 %v1826_v10, %v1825_v9 }
 0xfce   :  { %v1777_v55 = vadd.f32 %v1769_v50, %v6039_v61 }
 0xfcf   :  { %v1784_v53 = vsel %vm406_vm1, %v1778_v52, 0.0  ;;  %4889 = vmatprep.subr.bf16.mxu0 %v4888_v11 }
 0xfd0   :  { %1785 = vadd.xlane.f32.xlu1 %v1784_v53  ;;  %v1781_v54 = vsel %vm406_vm1, %v1777_v55, 0.0  ;;  %4891 = vmatpush3.bf16.msra.mxu0 %v4888_v11 }
 0xfd1   :  { %1782 = vadd.xlane.f32.xlu0 %v1781_v54  ;;  %4632 = vmatprep.subr.mxu0 %v5610_v56 }
0x105d   :  { %v1786_v58 = vpop.xlane.xlu1 %1785 }
0x105e   :  { %v1788_v60 = vmul.f32 0.03125, %v1786_v58  ;;  %v1783_v62 = vpop.xlane.xlu0 %1782  ;;  %v1917_v58 = vld [vmem:[%s6383_s10 + $0x10] sm:$0xff] }
0x105f   :  { %v1787_v63 = vmul.f32 0.03125, %v1783_v62 }
0x1060   :  { %v1790_v1 = vsub.f32 %v1778_v52, %v1788_v60  ;;  %v1918_v60 = vld [vmem:[%s6383_s10 + $0x18] sm:$0xff] }
0x1061   :  { %v1789_v4 = vsub.f32 %v1777_v55, %v1787_v63  ;;  %v4893_v62 = vpack.c.bf16 %v1918_v60, %v1917_v58 }
0x1062   :  { %v1792_v5 = vmul.f32 %v1790_v1, %v1790_v1 }
0x1063   :  { %v1791_v6 = vmul.f32 %v1789_v4, %v1789_v4 }
0x1064   :  { %v1796_v61 = vsel %vm406_vm1, %v1792_v5, 0.0 }
0x1065   :  { %1797 = vadd.xlane.f32.xlu1 %v1796_v61  ;;  %v1793_v0 = vsel %vm406_vm1, %v1791_v6, 0.0  ;;  %v1915_v6 = vld [vmem:[%s6383_s10] sm:$0xff]  ;;  %v1916_v61 = vld [vmem:[%s6383_s10 + $0x8] sm:$0xff] }
0x1066   :  { %1794 = vadd.xlane.f32.xlu0 %v1793_v0  ;;  %v6120_v7 = vpack.c.bf16 %v1916_v61, %v1915_v6 }
0x10f2   :  { %v1798_v12 = vpop.xlane.xlu1 %1797 }
0x10f3   :  { %v1800_v13 = vmul.f32 0.03125, %v1798_v12  ;;  %v1795_v14 = vpop.xlane.xlu0 %1794 }
0x10f4   :  { %v1799_v15 = vmul.f32 0.03125, %v1795_v14 }
0x10f5   :  { %v1802_v16 = vadd.f32 1e-12, %v1800_v13 }
0x10f6   :  { %v1801_v17 = vadd.f32 1e-12, %v1799_v15 }
0x10f7   :  { %5079 = vrsqrt.f32 %v1802_v16 }
0x10f8   :  { %5081 = vrsqrt.f32 %v1801_v17 }
0x1101   :  { %v5080_v18 = vpop.eup %5079 }
0x1102   :  { %v5082_v51 = vpop.eup %5081  ;;  %v1806_v20 = vmul.f32 %v5080_v18, %v1790_v1 }
0x1103   :  { %v1805_v21 = vmul.f32 %v5082_v51, %v1789_v4 }
0x1104   :  { %v1814_v23 = vmul.f32 %v4309_v19, %v1806_v20 }
0x1105   :  { %v1813_v24 = vmul.f32 %v4309_v19, %v1805_v21 }
0x1106   :  { %v6073_v26 = vadd.f32 %v4310_v22, %v1814_v23 }
0x1107   :  { %v6071_v25 = vadd.f32 %v4310_v22, %v1813_v24 }
0x1109   :  { %4629 = vmatprep.mubr.msk.f32.mxu0 %vm406_vm1, %v6071_v25 }
0x110a   :  { %4630 = vmatmul.mubr.msk.f32.vlgmr.msra.gmra.mrb[12].mxu0 %vm406_vm1, %v6073_v26 }
0x110b   :  { %4634 = vmatprep.mubr.msk.f32.mxu0 %vm5611_vm2, %v5610_v56 }
0x11dd   :  { %v4631_v27 = vpop.f32.mrb[12].mxu0 }
0x11de   :  { %v6082_v28 = vadd.f32 %v4631_v27, %v4311_v59  ;;  %v1906_v29 = vpop.f32.mrb[13].mxu0 }
0x11df   :  { %v1907_v30 = vadd.f32 %v4311_v59, %v1906_v29 }
0x11e1   :  { %2087 = vrot.lane.b32.xlu1 %v1907_v30, %s5613_s28  ;;  %1920 = vrot.lane.b32.xlu0 %v1907_v30, %s5612_s25 }
0x11e5   :  { %2085 = vrot.lane.b32.xlu1 %v1907_v30, %s5615_s1 }
0x1253   :  { %v1921_v31 = vpop.permute.xlu0 %1920  ;;  %v2088_v32 = vpop.permute.xlu1 %2087 }
0x1254   :  { %4633 = vmatpush3.xpose.msk.msra.mxu0 %vm550_vm3, %v1921_v31 }
0x1255   :  { %4642 = vmatprep.subr.mxu0 %v5610_v56 }
0x1257   :  { %4635 = vmatmul.mubr.msk.f32.vlgmr.msra.gmra.mrb[14].mxu0 %vm550_vm3, %v1907_v30  ;;  %v2086_v34 = vpop.permute.xlu1 %2085 }
0x1258   :  { %4643 = vmatpush3.xpose.msk.msra.mxu0 %vm550_vm3, %v2088_v32  ;;  %4644 = vmatprep.mubr.msk.f32.mxu0 %vm5611_vm2, %v5610_v56  ;;  %v4330_v32 = vld [vmem:[#allocation19] ss:$0 sm:$0xff] }
0x1259   :  { %4892 = vmatprep.subr.bf16.mxu0 %v5617_v33 }
0x125b   :  { %4645 = vmatmul.mubr.msk.f32.vlgmr.msra.gmra.mrb[16].mxu0 %vm550_vm3, %v2086_v34 }
0x125c   :  { %4656 = vmatprep.mubr.msk.f32.mxu0 %vm5611_vm2, %v5610_v56  ;;  %4894 = vmatpush3.bf16.msra.mxu0 %v4893_v62 }
0x125d   :  { %4666 = vmatprep.subr.mxu0 %v5610_v56 }
0x132a   :  { %v1992_v35 = vpop.f32.mrb[14].mxu0 }
0x132b   :  { %v1996_v36 = vmul.f32 0.25, %v1992_v35  ;;  %v4636_v37 = vpop.f32.mrb[15].mxu0 }
0x132d   :  { %v1997_v38 = vadd.f32 %v1996_v36, %v5951_v3 }
0x132e   :  { %v2159_v39 = vpop.f32.mrb[16].mxu0 }
0x132f   :  { %v2163_v40 = vmul.f32 0.25, %v2159_v39  ;;  %v4646_v41 = vpop.f32.mrb[17].mxu0  ;;  %v1998_v42 = vsel %vm631_vm4, %v1997_v38, -inf }
0x1330   :  { %1999 = vmax.xlane.f32.xlu1 %v1998_v42 }
0x1331   :  { %v2164_v43 = vadd.f32 %v2163_v40, %v5951_v3 }
0x1333   :  { %v2165_v44 = vsel %vm631_vm4, %v2164_v43, -inf }
0x1334   :  { %2166 = vmax.xlane.f32.xlu0 %v2165_v44 }
0x1341   :  { %2009 = vrot.lane.b32.xlu1 %v1907_v30, %s5614_s0 }
0x1345   :  { %2399 = vrot.lane.b32.xlu1 %v6082_v28, %s5612_s25 }
0x1349   :  { %2566 = vrot.lane.b32.xlu1 %v6082_v28, %s5613_s28 }
0x134d   :  { %2564 = vrot.lane.b32.xlu1 %v6082_v28, %s5615_s1 }
0x13bd   :  { %v2000_v45 = vpop.xlane.xlu1 %1999 }
0x13be   :  { %v2001_v46 = vsub.f32 %v1997_v38, %v2000_v45 }
0x13c0   :  { %v2002_v47 = vmul.f32 1.442695, %v2001_v46 }
0x13c1   :  { %v2010_v48 = vpop.permute.xlu1 %2009  ;;  %v2167_v3 = vpop.xlane.xlu0 %2166 }
0x13c2   :  { %5083 = vpow2.f32 %v2002_v47  ;;  %v2168_v49 = vsub.f32 %v2164_v43, %v2167_v3  ;;  %4638 = vmatpush3.msra.mxu1 %v2010_v48 }
0x13c3   :  { %4647 = vmatprep.subr.mxu1 %v5610_v56 }
0x13c4   :  { %v2169_v50 = vmul.f32 1.442695, %v2168_v49 }
0x13c5   :  { %v2400_v9 = vpop.permute.xlu1 %2399 }
0x13c6   :  { %5085 = vpow2.f32 %v2169_v50 }
0x13c9   :  { %v2567_v14 = vpop.permute.xlu1 %2566 }
0x13cc   :  { %v5084_v52 = vpop.eup %5083 }
0x13cd   :  { %v2004_v55 = vsel %vm631_vm4, %v5084_v52, 0.0  ;;  %v2565_v15 = vpop.permute.xlu1 %2564 }
0x13ce   :  { %2005 = vadd.xlane.f32.xlu0 %v2004_v55 }
0x13d0   :  { %v5086_v53 = vpop.eup %5085 }
0x13d1   :  { %v2171_v54 = vsel %vm631_vm4, %v5086_v53, 0.0 }
0x13d2   :  { %2172 = vadd.xlane.f32.xlu0 %v2171_v54 }
0x13e8   :  { %2176 = vrot.lane.b32.xlu0 %v1907_v30, %s5616_s27 }
0x145b   :  { %v2006_v63 = vpop.xlane.xlu0 %2005 }
0x145c   :  { %5087 = vrcp.f32 %v2006_v63 }
0x145f   :  { %v2173_v1 = vpop.xlane.xlu0 %2172 }
0x1460   :  { %5089 = vrcp.f32 %v2173_v1 }
0x1463   :  { %v2177_v0 = vpop.permute.xlu0 %2176 }
0x1466   :  { %v5088_v4 = vpop.eup %5087 }
0x1467   :  { %v2008_v5 = vmul.f32 %v5088_v4, %v5084_v52 }
0x1469   :  { %4640 = vmatmul.mubr.msk.f32.vlgmr.msra.gmra.mrb[18].mxu1 %vm631_vm4, %v2008_v5 }
0x146a   :  { %v5090_v2 = vpop.eup %5089  ;;  %4648 = vmatpush3.msra.mxu1 %v2177_v0  ;;  %4649 = vmatprep.mubr.msk.f32.mxu1 %vm5611_vm2, %v5610_v56 }
0x146b   :  { %v2175_v8 = vmul.f32 %v5090_v2, %v5086_v53  ;;  %4895 = vmatprep.subr.bf16.mxu1 %v5617_v33 }
0x146d   :  { %4650 = vmatmul.mubr.msk.f32.vlgmr.msra.gmra.mrb[20].mxu1 %vm631_vm4, %v2175_v8 }
0x146e   :  { %4897 = vmatpush3.bf16.msra.mxu1 %v6120_v7  ;;  %4663 = vmatprep.mubr.msk.f32.mxu1 %vm5611_vm2, %v5610_v56 }
0x146f   :  { %4671 = vmatprep.subr.mxu1 %v5610_v56 }
0x153c   :  { %v2081_v10 = vpop.f32.mrb[18].mxu1 }
0x153d   :  { %v4641_v11 = vpop.f32.mrb[19].mxu1  ;;  %4664 = vmatmul.mubr.msk.f32.vlgmr.msra.gmra.mrb[22].mxu1 %vm550_vm3, %v2081_v10 }
0x153e   :  { %4673 = vmatprep.mubr.msk.f32.mxu1 %vm5611_vm2, %v5610_v56 }
0x1540   :  { %v2248_v12 = vpop.f32.mrb[20].mxu1 }
0x1541   :  { %v4651_v13 = vpop.f32.mrb[21].mxu1  ;;  %4657 = vmatmul.mubr.msk.f32.vlgmr.msra.gmra.mrb[18].mxu0 %vm550_vm3, %v2248_v12 }
0x1542   :  { %4667 = vmatpush3.xpose.msk.msra.mxu0 %vm550_vm3, %v2400_v9  ;;  %4668 = vmatprep.mubr.msk.f32.mxu0 %vm5611_vm2, %v5610_v56 }
0x1543   :  { %4676 = vmatprep.subr.mxu0 %v5610_v56 }
0x1545   :  { %4669 = vmatmul.mubr.msk.f32.vlgmr.msra.gmra.mrb[20].mxu0 %vm550_vm3, %v6082_v28 }
0x1546   :  { %4677 = vmatpush3.xpose.msk.msra.mxu0 %vm550_vm3, %v2567_v14  ;;  %4678 = vmatprep.mubr.msk.f32.mxu0 %vm5611_vm2, %v5610_v56 }
0x1547   :  { %4898 = vmatprep.subr.bf16.mxu0 %v5617_v33 }
0x1549   :  { %4679 = vmatmul.mubr.msk.f32.vlgmr.msra.gmra.mrb[22].mxu0 %vm550_vm3, %v2565_v15 }
0x154a   :  { %4900 = vmatpush3.bf16.msra.mxu0 %v4893_v62  ;;  %4690 = vmatprep.mubr.msk.f32.mxu0 %vm5611_vm2, %v5610_v56 }
0x1610   :  { %v2394_v16 = vpop.f32.mrb[22].mxu1 }
0x1611   :  { %v4665_v17 = vpop.f32.mrb[23].mxu1 }
0x1612   :  { %v4331_v17 = vld [vmem:[#allocation20] ss:$0 sm:$0xff] }
0x1614   :  { %v2321_v18 = vpop.f32.mrb[18].mxu0 }
0x1615   :  { %v2395_v19 = vadd.f32 %v2394_v16, %v2321_v18  ;;  %v4658_v51 = vpop.f32.mrb[19].mxu0 }
0x1617   :  { %v2884_v34 = vadd.f32 %v4330_v32, %v2395_v19  ;;  %v4332_v19 = vld [vmem:[#allocation22] ss:$0 sm:$0xff] }
0x1618   :  { %v2471_v20 = vpop.f32.mrb[20].mxu0 }
0x1619   :  { %v2475_v21 = vmul.f32 0.25, %v2471_v20  ;;  %v4670_v22 = vpop.f32.mrb[21].mxu0  ;;  %v2886_v35 = vadd.f32 %v2884_v34, %v6071_v25 }
0x161a   :  { %v2933_v22 = vld [vmem:[%s6384_s11 + $0x8] sm:$0xff] }
0x161b   :  { %v2476_v23 = vadd.f32 %v2475_v21, %v6010_v57  ;;  %v2890_v36 = vsel %vm406_vm1, %v2886_v35, 0.0  ;;  %v2932_v21 = vld [vmem:[%s6384_s11] sm:$0xff] }
0x161c   :  { %v2638_v24 = vpop.f32.mrb[22].mxu0 }
0x161d   :  { %v2642_v59 = vmul.f32 0.25, %v2638_v24  ;;  %v4680_v27 = vpop.f32.mrb[23].mxu0  ;;  %v2477_v29 = vsel %vm631_vm4, %v2476_v23, -inf  ;;  %v2934_v24 = vld [vmem:[%s6384_s11 + $0x10] sm:$0xff] }
0x161e   :  { %2478 = vmax.xlane.f32.xlu0 %v2477_v29 }
0x161f   :  { %v2643_v30 = vadd.f32 %v2642_v59, %v6010_v57  ;;  %v2935_v59 = vld [vmem:[%s6384_s11 + $0x18] sm:$0xff] }
0x1620   :  { %v4908_v27 = vpack.c.bf16 %v2935_v59, %v2934_v24 }
0x1621   :  { %v2644_v31 = vsel %vm631_vm4, %v2643_v30, -inf }
0x1622   :  { %2645 = vmax.xlane.f32.xlu1 %v2644_v31 }
0x1633   :  { %2655 = vrot.lane.b32.xlu1 %v6082_v28, %s5616_s27 }
0x1657   :  { %2891 = vadd.xlane.f32.xlu1 %v2890_v36 }
0x16ab   :  { %v2479_v37 = vpop.xlane.xlu0 %2478 }
0x16ac   :  { %v2480_v38 = vsub.f32 %v2476_v23, %v2479_v37  ;;  %v4904_v23 = vpack.c.bf16 %v2933_v22, %v2932_v21  ;;  %v3042_v37 = vld [vmem:[%s6385_s15] sm:$0xff] }
0x16ae   :  { %v2481_v39 = vmul.f32 1.442695, %v2480_v38  ;;  %4905 = vmatprep.subr.bf16.mxu0 %v4904_v23  ;;  %v3043_v38 = vld [vmem:[%s6385_s15 + $0x8] sm:$0xff] }
0x16af   :  { %v2646_v40 = vpop.xlane.xlu1 %2645 }
0x16b0   :  { %5091 = vpow2.f32 %v2481_v39  ;;  %v2647_v41 = vsub.f32 %v2643_v30, %v2646_v40  ;;  %v4912_v39 = vpack.c.bf16 %v3043_v38, %v3042_v37  ;;  %v3044_v40 = vld [vmem:[%s6385_s15 + $0x10] sm:$0xff] }
0x16b1   :  { %v3278_v38 = vld [vmem:[%s6387_s3 + $0x10] sm:$0xff] }
0x16b2   :  { %v2648_v57 = vmul.f32 1.442695, %v2647_v41  ;;  %v3045_v41 = vld [vmem:[%s6385_s15 + $0x18] sm:$0xff] }
0x16b3   :  { %v2656_v49 = vpop.permute.xlu1 %2655 }
0x16b4   :  { %5093 = vpow2.f32 %v2648_v57  ;;  %v4916_v57 = vpack.c.bf16 %v3045_v41, %v3044_v40 }
0x16ba   :  { %v5092_v42 = vpop.eup %5091 }
0x16bb   :  { %v2483_v43 = vsel %vm631_vm4, %v5092_v42, 0.0 }
0x16bc   :  { %2484 = vadd.xlane.f32.xlu0 %v2483_v43  ;;  %v3047_v43 = vld [vmem:[%s6385_s15 + $0x28] sm:$0xff] }
0x16be   :  { %v5094_v44 = vpop.eup %5093 }
0x16bf   :  { %v2650_v45 = vsel %vm631_vm4, %v5094_v44, 0.0 }
0x16c0   :  { %2651 = vadd.xlane.f32.xlu0 %v2650_v45  ;;  %v3048_v45 = vld [vmem:[%s6385_s15 + $0x30] sm:$0xff] }
0x16d6   :  { %2488 = vrot.lane.b32.xlu0 %v6082_v28, %s5614_s0 }
0x16e4   :  { %v2892_v58 = vpop.xlane.xlu1 %2891 }
0x16e5   :  { %v2896_v63 = vmul.f32 0.03125, %v2892_v58 }
0x16e7   :  { %v2898_v6 = vsub.f32 %v2886_v35, %v2896_v63 }
0x1749   :  { %v2485_v25 = vpop.xlane.xlu0 %2484 }
0x174a   :  { %5095 = vrcp.f32 %v2485_v25  ;;  %v3049_v25 = vld [vmem:[%s6385_s15 + $0x38] sm:$0xff] }
0x174d   :  { %v2652_v46 = vpop.xlane.xlu0 %2651 }
0x174e   :  { %5097 = vrcp.f32 %v2652_v46  ;;  %v4924_v46 = vpack.c.bf16 %v3049_v25, %v3048_v45 }
0x1751   :  { %v2489_v47 = vpop.permute.xlu0 %2488 }
0x1752   :  { %4672 = vmatpush3.msra.mxu1 %v2489_v47  ;;  %v4333_v47 = vld [vmem:[#allocation23] ss:$0 sm:$0xff] }
0x1753   :  { %4681 = vmatprep.subr.mxu1 %v5610_v56 }
0x1754   :  { %v5096_v48 = vpop.eup %5095 }
0x1755   :  { %v2487_v3 = vmul.f32 %v5096_v48, %v5092_v42  ;;  %v3046_v42 = vld [vmem:[%s6385_s15 + $0x20] sm:$0xff] }
0x1757   :  { %4674 = vmatmul.mubr.msk.f32.vlgmr.msra.gmra.mrb[24].mxu1 %vm631_vm4, %v2487_v3 }
0x1758   :  { %v5098_v50 = vpop.eup %5097  ;;  %4682 = vmatpush3.msra.mxu1 %v2656_v49  ;;  %4683 = vmatprep.mubr.msk.f32.mxu1 %vm5611_vm2, %v5610_v56 }
0x1759   :  { %v2654_v52 = vmul.f32 %v5098_v50, %v5094_v44  ;;  %4901 = vmatprep.subr.bf16.mxu1 %v5617_v33  ;;  %v4920_v44 = vpack.c.bf16 %v3047_v43, %v3046_v42 }
0x175b   :  { %4684 = vmatmul.mubr.msk.f32.vlgmr.msra.gmra.mrb[26].mxu1 %vm631_vm4, %v2654_v52 }
0x175c   :  { %4903 = vmatpush3.bf16.msra.mxu1 %v6120_v7  ;;  %4697 = vmatprep.mubr.msk.f32.mxu1 %vm5611_vm2, %v5610_v56  ;;  %v2900_v7 = vmul.f32 %v2898_v6, %v2898_v6 }
0x175d   :  { %4913 = vmatprep.subr.bf16.mxu1 %v4912_v39 }
0x175e   :  { %v2902_v8 = vsel %vm406_vm1, %v2900_v7, 0.0 }
0x182a   :  { %v2560_v28 = vpop.f32.mrb[24].mxu1 }
0x182b   :  { %v4675_v55 = vpop.f32.mrb[25].mxu1  ;;  %4698 = vmatmul.mubr.msk.f32.vlgmr.msra.gmra.mrb[28].mxu1 %vm550_vm3, %v2560_v28 }
0x182c   :  { %4915 = vmatpush3.bf16.msra.mxu1 %v4912_v39  ;;  %v3279_v39 = vld [vmem:[%s6387_s3 + $0x18] sm:$0xff] }
0x182d   :  { %4917 = vmatprep.subr.bf16.mxu1 %v4916_v57  ;;  %v6212_v40 = vpack.c.bf16 %v3279_v39, %v3278_v38 }
0x182e   :  { %v2727_v53 = vpop.f32.mrb[26].mxu1 }
0x182f   :  { %v4685_v54 = vpop.f32.mrb[27].mxu1  ;;  %4691 = vmatmul.mubr.msk.f32.vlgmr.msra.gmra.mrb[24].mxu0 %vm550_vm3, %v2727_v53 }
0x1830   :  { %4907 = vmatpush3.bf16.msra.mxu0 %v4904_v23  ;;  %4919 = vmatpush3.bf16.msra.mxu1 %v4916_v57 }
0x1831   :  { %4909 = vmatprep.subr.bf16.mxu0 %v4908_v27  ;;  %4921 = vmatprep.subr.bf16.mxu1 %v4920_v44 }
0x1834   :  { %4911 = vmatpush3.bf16.msra.mxu0 %v4908_v27  ;;  %4923 = vmatpush3.bf16.msra.mxu1 %v4920_v44  ;;  %v3184_v27 = vld [vmem:[%s6386_s4] sm:$0xff] }
0x1835   :  { %4925 = vmatprep.subr.bf16.mxu1 %v4924_v46 }
0x1838   :  { %4927 = vmatpush3.bf16.msra.mxu1 %v4924_v46  ;;  %v4339_v46 = vld [vmem:[%s6388_s30] ss:$0 sm:$0xff] }
0x1839   :  { %4942 = vmatprep.subr.bf16.mxu1 %v5617_v33 }
0x18fe   :  { %v2873_v60 = vpop.f32.mrb[28].mxu1 }
0x18ff   :  { %v4699_v62 = vpop.f32.mrb[29].mxu1 }
0x1902   :  { %v2800_v1 = vpop.f32.mrb[24].mxu0 }
0x1903   :  { %v2874_v4 = vadd.f32 %v2873_v60, %v2800_v1  ;;  %v4692_v5 = vpop.f32.mrb[25].mxu0 }
0x1905   :  { %v2885_v61 = vadd.f32 %v4330_v32, %v2874_v4 }
0x1907   :  { %v2887_v0 = vadd.f32 %v2885_v61, %v6073_v26 }
0x1909   :  { %v2893_v2 = vsel %vm406_vm1, %v2887_v0, 0.0 }
0x190a   :  { %2894 = vadd.xlane.f32.xlu0 %v2893_v2 }
0x190e   :  { %2903 = vadd.xlane.f32.xlu0 %v2902_v8 }
0x1997   :  { %v2895_v9 = vpop.xlane.xlu0 %2894 }
0x1998   :  { %v2897_v10 = vmul.f32 0.03125, %v2895_v9  ;;  %v4336_v9 = vld [vmem:[#allocation25] ss:$0 sm:$0xff] }
0x199a   :  { %v2899_v11 = vsub.f32 %v2887_v0, %v2897_v10 }
0x199b   :  { %v2904_v12 = vpop.xlane.xlu0 %2903 }
0x199c   :  { %v2908_v13 = vmul.f32 0.03125, %v2904_v12  ;;  %v2901_v14 = vmul.f32 %v2899_v11, %v2899_v11 }
0x199e   :  { %v2910_v15 = vadd.f32 1e-12, %v2908_v13  ;;  %v2905_v16 = vsel %vm406_vm1, %v2901_v14, 0.0 }
0x199f   :  { %2906 = vadd.xlane.f32.xlu1 %v2905_v16 }
0x19a0   :  { %5099 = vrsqrt.f32 %v2910_v15 }
0x19aa   :  { %v5100_v26 = vpop.eup %5099 }
0x19ab   :  { %v2914_v18 = vmul.f32 %v5100_v26, %v2898_v6 }
0x19ad   :  { %v2922_v51 = vmul.f32 %v4331_v17, %v2914_v18 }
0x19af   :  { %v6172_v20 = vadd.f32 %v4332_v19, %v2922_v51 }
0x19b1   :  { %4708 = vmatprep.mubr.msk.f32.mxu0 %vm406_vm1, %v6172_v20 }
0x1a2c   :  { %v2907_v29 = vpop.xlane.xlu1 %2906 }
0x1a2d   :  { %v2909_v30 = vmul.f32 0.03125, %v2907_v29  ;;  %v3185_v29 = vld [vmem:[%s6386_s4 + $0x8] sm:$0xff] }
0x1a2f   :  { %v2911_v31 = vadd.f32 1e-12, %v2909_v30  ;;  %v4928_v30 = vpack.c.bf16 %v3185_v29, %v3184_v27 }
0x1a31   :  { %5101 = vrsqrt.f32 %v2911_v31  ;;  %4929 = vmatprep.subr.bf16.mxu0 %v4928_v30  ;;  %v3186_v31 = vld [vmem:[%s6386_s4 + $0x10] sm:$0xff] }
0x1a3b   :  { %v5102_v32 = vpop.eup %5101 }
0x1a3c   :  { %v2915_v34 = vmul.f32 %v5102_v32, %v2899_v11  ;;  %v3187_v32 = vld [vmem:[%s6386_s4 + $0x18] sm:$0xff] }
0x1a3e   :  { %v2923_v35 = vmul.f32 %v4331_v17, %v2915_v34  ;;  %v4932_v34 = vpack.c.bf16 %v3187_v32, %v3186_v31 }
0x1a40   :  { %v2931_v36 = vadd.f32 %v4332_v19, %v2923_v35  ;;  %v3276_v35 = vld [vmem:[%s6387_s3] sm:$0xff] }
0x1a42   :  { %4709 = vmatmul.mubr.msk.f32.vlgmr.msra.gmra.mrb[26].mxu0 %vm406_vm1, %v2931_v36 }
0x1a43   :  { %4931 = vmatpush3.bf16.msra.mxu0 %v4928_v30 }
0x1a44   :  { %4933 = vmatprep.subr.bf16.mxu0 %v4932_v34 }
0x1a47   :  { %4935 = vmatpush3.bf16.msra.mxu0 %v4932_v34 }
0x1a48   :  { %4936 = vmatprep.subr.bf16.mxu0 %v5617_v33 }
0x1b15   :  { %v4710_v48 = vpop.f32.mrb[26].mxu0 }
0x1b16   :  { %v3021_v3 = vadd.f32 %v4710_v48, %v4333_v47  ;;  %v3015_v49 = vpop.f32.mrb[27].mxu0 }
0x1b17   :  { %v3016_v50 = vadd.f32 %v4333_v47, %v3015_v49  ;;  %v4340_v49 = vld [vmem:[#allocation26] ss:$0 sm:$0xff] }
0x1b18   :  { %v3027_v52 = vmul.f32 0.044715, %v3021_v3  ;;  %v3025_v2 = vmul.f32 0.5, %v3021_v3 }
0x1b19   :  { %v3026_v28 = vmul.f32 0.044715, %v3016_v50  ;;  %v3024_v61 = vmul.f32 0.5, %v3016_v50 }
0x1b1a   :  { %v3029_v55 = vmul.f32 %v3027_v52, %v3021_v3 }
0x1b1b   :  { %v3028_v53 = vmul.f32 %v3026_v28, %v3016_v50 }
0x1b1c   :  { %v3031_v54 = vmul.f32 %v3029_v55, %v3021_v3 }
0x1b1d   :  { %v3030_v58 = vmul.f32 %v3028_v53, %v3016_v50  ;;  %v4341_v53 = vld [vmem:[%s5788_s8] ss:$0 sm:$0xff]  ;;  %s5618_s8 = smov 32  }
0x1b1e   :  { %v3033_v60 = vadd.f32 %v3031_v54, %v3021_v3 }
0x1b1f   :  { %v3032_v62 = vadd.f32 %v3030_v58, %v3016_v50 }
0x1b20   :  { %v3035_v63 = vmul.f32 0.7978846, %v3033_v60 }
0x1b21   :  { %v3034_v1 = vmul.f32 0.7978846, %v3032_v62 }
0x1b22   :  { %5103 = vtanh.f32 %v3035_v63 }
0x1b23   :  { %5105 = vtanh.f32 %v3034_v1 }
0x1b2c   :  { %v5104_v4 = vpop.eup %5103 }
0x1b2d   :  { %v5106_v5 = vpop.eup %5105  ;;  %v3039_v6 = vadd.f32 1.0, %v5104_v4 }
0x1b2e   :  { %v3038_v0 = vadd.f32 1.0, %v5106_v5 }
0x1b2f   :  { %v3041_v8 = vmul.f32 %v3039_v6, %v3025_v2 }
0x1b30   :  { %v3040_v7 = vmul.f32 %v3038_v0, %v3024_v61 }
0x1b32   :  { %4727 = vmatprep.mubr.msk.f32.mxu1 %vm1695_vm5, %v3040_v7 }
0x1b33   :  { %4728 = vmatmul.mubr.msk.f32.vlgmr.msra.gmra.mrb[30].mxu1 %vm1695_vm5, %v3041_v8 }
0x1b34   :  { %4760 = vmatprep.mubr.msk.f32.mxu1 %vm5611_vm2, %v5610_v56 }
0x1c06   :  { %v4729_v10 = vpop.f32.mrb[30].mxu1 }
0x1c07   :  { %v3135_v11 = vadd.f32 %v4729_v10, %v4336_v9  ;;  %v3129_v12 = vpop.f32.mrb[31].mxu1 }
0x1c08   :  { %v3130_v13 = vadd.f32 %v4336_v9, %v3129_v12 }
0x1c09   :  { %v3139_v14 = vadd.f32 %v3135_v11, %v2931_v36  ;;  %v3277_v36 = vld [vmem:[%s6387_s3 + $0x8] sm:$0xff] }
0x1c0a   :  { %v3138_v15 = vadd.f32 %v3130_v13, %v6172_v20  ;;  %v6206_v37 = vpack.c.bf16 %v3277_v36, %v3276_v35 }
0x1c0b   :  { %v3145_v16 = vsel %vm406_vm1, %v3139_v14, 0.0 }
0x1c0c   :  { %3146 = vadd.xlane.f32.xlu1 %v3145_v16  ;;  %v3142_v26 = vsel %vm406_vm1, %v3138_v15, 0.0  ;;  %4944 = vmatpush3.bf16.msra.mxu1 %v6206_v37 }
0x1c0d   :  { %3143 = vadd.xlane.f32.xlu0 %v3142_v26  ;;  %4945 = vmatprep.subr.bf16.mxu1 %v5617_v33 }
0x1c10   :  { %4947 = vmatpush3.bf16.msra.mxu1 %v6212_v40 }
0x1c11   :  { %4954 = vmatprep.subr.bf16.mxu1 %v5617_v33 }
0x1c99   :  { %v3147_v17 = vpop.xlane.xlu1 %3146 }
0x1c9a   :  { %v3149_v18 = vmul.f32 0.03125, %v3147_v17  ;;  %v3144_v19 = vpop.xlane.xlu0 %3143 }
0x1c9b   :  { %v3148_v51 = vmul.f32 0.03125, %v3144_v19 }
0x1c9c   :  { %v3151_v21 = vsub.f32 %v3139_v14, %v3149_v18 }
0x1c9d   :  { %v3150_v22 = vsub.f32 %v3138_v15, %v3148_v51 }
0x1c9e   :  { %v3153_v23 = vmul.f32 %v3151_v21, %v3151_v21 }
0x1c9f   :  { %v3152_v24 = vmul.f32 %v3150_v22, %v3150_v22 }
0x1ca0   :  { %v3157_v20 = vsel %vm406_vm1, %v3153_v23, 0.0 }
0x1ca1   :  { %3158 = vadd.xlane.f32.xlu1 %v3157_v20  ;;  %v3154_v59 = vsel %vm406_vm1, %v3152_v24, 0.0 }
0x1ca2   :  { %3155 = vadd.xlane.f32.xlu0 %v3154_v59 }
0x1d2e   :  { %v3159_v41 = vpop.xlane.xlu1 %3158 }
0x1d2f   :  { %v3161_v57 = vmul.f32 0.03125, %v3159_v41  ;;  %v3156_v42 = vpop.xlane.xlu0 %3155 }
0x1d30   :  { %v3160_v43 = vmul.f32 0.03125, %v3156_v42 }
0x1d31   :  { %v3163_v44 = vadd.f32 1e-12, %v3161_v57 }
0x1d32   :  { %v3162_v45 = vadd.f32 1e-12, %v3160_v43 }
0x1d33   :  { %5107 = vrsqrt.f32 %v3163_v44 }
0x1d34   :  { %5109 = vrsqrt.f32 %v3162_v45 }
0x1d3d   :  { %v5108_v25 = vpop.eup %5107 }
0x1d3e   :  { %v5110_v47 = vpop.eup %5109  ;;  %v3167_v48 = vmul.f32 %v5108_v25, %v3151_v21 }
0x1d3f   :  { %v3166_v3 = vmul.f32 %v5110_v47, %v3150_v22 }
0x1d40   :  { %v3175_v50 = vmul.f32 %v4339_v46, %v3167_v48 }
0x1d41   :  { %v3174_v52 = vmul.f32 %v4339_v46, %v3166_v3 }
0x1d42   :  { %v3183_v55 = vadd.f32 %v4340_v49, %v3175_v50 }
0x1d43   :  { %v3182_v28 = vadd.f32 %v4340_v49, %v3174_v52 }
0x1d45   :  { %4738 = vmatprep.mubr.msk.f32.mxu0 %vm406_vm1, %v3182_v28 }
0x1d46   :  { %4739 = vmatmul.mubr.msk.f32.vlgmr.msra.gmra.mrb[28].mxu0 %vm406_vm1, %v3183_v55 }
0x1d47   :  { %4938 = vmatpush3.bf16.msra.mxu0 %v6206_v37  ;;  %4749 = vmatprep.mubr.msk.f32.mxu0 %vm5611_vm2, %v5610_v56 }
0x1d48   :  { %4939 = vmatprep.subr.bf16.mxu0 %v5617_v33 }
0x1d4b   :  { %4941 = vmatpush3.bf16.msra.mxu0 %v6212_v40 }
0x1d4c   :  { %4948 = vmatprep.subr.bf16.mxu0 %v5617_v33 }
0x1d4e   :  { %4750 = vmatmul.mubr.f32.vlgmr.msra.gmra.mrb[30].mxu0 %v5610_v56 }
0x1d4f   :  { %4950 = vmatpush3.bf16.msra.mxu0 %v6206_v37  ;;  %4771 = vmatprep.mubr.msk.f32.mxu0 %vm5611_vm2, %v5610_v56 }
0x1d50   :  { %4951 = vmatprep.subr.bf16.mxu0 %v5617_v33 }
0x1d53   :  { %4953 = vmatpush3.bf16.msra.mxu0 %v6212_v40 }
0x1d54   :  { %4960 = vmatprep.subr.bf16.mxu0 %v5617_v33 }
0x1e19   :  { %v4740_v54 = vpop.f32.mrb[28].mxu0 }
0x1e1a   :  { %v3273_v58 = vadd.f32 %v4740_v54, %v4341_v53  ;;  %v3267_v60 = vpop.f32.mrb[29].mxu0 }
0x1e1b   :  { %v3268_v62 = vadd.f32 %v4341_v53, %v3267_v60 }
0x1e1c   :  { %v3282_v63 = vrot.slane %v3273_v58, 7  ;;  %v3489_v1 = vrot.slane %v3273_v58, 1  ;;  %v3592_v4 = vrot.slane %v3273_v58, 2  ;;  %v3695_v5 = vrot.slane %v3273_v58, 3 }
0x1e1d   :  { %v3386_v6 = vrot.slane %v3268_v62, 1  ;;  %v3488_v61 = vrot.slane %v3268_v62, 2  ;;  %v3591_v0 = vrot.slane %v3268_v62, 3  ;;  %v3694_v2 = vrot.slane %v3268_v62, 4 }
0x1e1e   :  { %v3284_v7 = vsel %vm3283_vm6, %v3282_v63, %v3268_v62  ;;  %v3797_v8 = vrot.slane %v3268_v62, 5  ;;  %v3798_v9 = vrot.slane %v3273_v58, 4  ;;  %v3900_v10 = vrot.slane %v3268_v62, 6 }
0x1e1f   :  { %v3387_v11 = vsel %vm3283_vm6, %v3273_v58, %v3386_v6  ;;  %v6236_v12 = vsel %vm3283_vm6, %v3489_v1, %v3488_v61  ;;  %v6239_v13 = vsel %vm3283_vm6, %v3592_v4, %v3591_v0  ;;  %v6242_v14 = vsel %vm3283_vm6, %v3695_v5, %v3694_v2 }
0x1e20   :  { %v6245_v15 = vsel %vm3283_vm6, %v3798_v9, %v3797_v8  ;;  %v3901_v16 = vrot.slane %v3273_v58, 5  ;;  %v4003_v26 = vrot.slane %v3268_v62, 7  ;;  %v4004_v17 = vrot.slane %v3273_v58, 6 }
0x1e21   :  { %v3355_v18 = vpop.f32.mrb[30].mxu0 }
0x1e22   :  { %v3356_v19 = vadd.f32 %v3355_v18, %v3284_v7  ;;  %v4751_v51 = vpop.f32.mrb[31].mxu0  ;;  %v6248_v21 = vsel %vm3283_vm6, %v3901_v16, %v3900_v10  ;;  %v6251_v22 = vsel %vm3283_vm6, %v4004_v17, %v4003_v26 }
0x1e24   :  { %5111 = vtanh.f32 %v3356_v19  ;;  %v4344_v24 = vmul.f32 -1.442695, %v3356_v19 }
0x1e26   :  { %5113 = vpow2.f32 %v4344_v24 }
0x1e2e   :  { %v5112_v23 = vpop.eup %5111 }
0x1e2f   :  { %3368 = vrot.lane.b32.xlu0 %v5112_v23, %s5613_s28 }
0x1e30   :  { %v5114_v20 = vpop.eup %5113 }
0x1e31   :  { %v3362_v59 = vadd.f32 1.0, %v5114_v20 }
0x1e33   :  { %5115 = vrcp.f32 %v3362_v59 }
0x1e3d   :  { %v5116_v27 = vpop.eup %5115 }
0x1e3e   :  { %v3366_v31 = vmul.f32 0.0, %v5116_v27 }
0x1ea1   :  { %v3369_v29 = vpop.permute.xlu0 %3368 }
0x1ea2   :  { %v3371_v30 = vmul.f32 %v5116_v27, %v3369_v29 }
0x1ea4   :  { %3373 = vrot.lane.b32.xlu1 %v3371_v30, %s5618_s8 }
0x1f16   :  { %v3374_v32 = vpop.permute.xlu1 %3373 }
0x1f17   :  { %v3376_v34 = vadd.f32 %v3374_v32, %v3366_v31 }
0x1f19   :  { %5117 = vtanh.f32 %v3376_v34 }
0x1f23   :  { %v5118_v35 = vpop.eup %5117 }
0x1f24   :  { %3379 = vrot.lane.b32.xlu1 %v5118_v35, %s5613_s28 }
0x1f96   :  { %v3380_v36 = vpop.permute.xlu1 %3379 }
0x1f97   :  { %v3382_v38 = vmul.f32 %v5116_v27, %v3380_v36 }
0x1f99   :  { %3384 = vrot.lane.b32.xlu1 %v3382_v38, %s5618_s8 }
0x200b   :  { %v3385_v39 = vpop.permute.xlu1 %3384 }
0x200c   :  { %4761 = vmatmul.mubr.msk.f32.vlgmr.msra.gmra.mrb[32].mxu1 %vm406_vm1, %v3385_v39 }
0x200d   :  { %4956 = vmatpush3.bf16.msra.mxu1 %v6206_v37  ;;  %4782 = vmatprep.mubr.msk.f32.mxu1 %vm5611_vm2, %v5610_v56 }
0x200e   :  { %4957 = vmatprep.subr.bf16.mxu1 %v5617_v33 }
0x2011   :  { %4959 = vmatpush3.bf16.msra.mxu1 %v6212_v40 }
0x2012   :  { %4966 = vmatprep.subr.bf16.mxu1 %v5617_v33 }
0x20df   :  { %v3457_v41 = vpop.f32.mrb[32].mxu1 }
0x20e0   :  { %v3458_v57 = vadd.f32 %v3457_v41, %v3387_v11  ;;  %v4762_v42 = vpop.f32.mrb[33].mxu1 }
0x20e2   :  { %5119 = vtanh.f32 %v3458_v57  ;;  %v4346_v44 = vmul.f32 -1.442695, %v3458_v57 }
0x20e4   :  { %5121 = vpow2.f32 %v4346_v44 }
0x20ec   :  { %v5120_v43 = vpop.eup %5119 }
0x20ed   :  { %3470 = vrot.lane.b32.xlu0 %v5120_v43, %s5613_s28 }
0x20ee   :  { %v5122_v45 = vpop.eup %5121 }
0x20ef   :  { %v3464_v25 = vadd.f32 1.0, %v5122_v45 }
0x20f1   :  { %5123 = vrcp.f32 %v3464_v25 }
0x20fb   :  { %v5124_v46 = vpop.eup %5123 }
0x20fc   :  { %v3468_v3 = vmul.f32 %v5124_v46, %v3376_v34 }
0x215f   :  { %v3471_v47 = vpop.permute.xlu0 %3470 }
0x2160   :  { %v3473_v48 = vmul.f32 %v5124_v46, %v3471_v47 }
0x2162   :  { %3475 = vrot.lane.b32.xlu1 %v3473_v48, %s5618_s8 }
0x21d4   :  { %v3476_v49 = vpop.permute.xlu1 %3475 }
0x21d5   :  { %v3478_v50 = vadd.f32 %v3476_v49, %v3468_v3 }
0x21d7   :  { %5125 = vtanh.f32 %v3478_v50 }
0x21e1   :  { %v5126_v52 = vpop.eup %5125 }
0x21e2   :  { %3481 = vrot.lane.b32.xlu0 %v5126_v52, %s5613_s28 }
0x2254   :  { %v3482_v28 = vpop.permute.xlu0 %3481 }
0x2255   :  { %v3484_v55 = vmul.f32 %v5124_v46, %v3482_v28 }
0x2257   :  { %3486 = vrot.lane.b32.xlu1 %v3484_v55, %s5618_s8 }
0x22c9   :  { %v3487_v53 = vpop.permute.xlu1 %3486 }
0x22ca   :  { %4772 = vmatmul.mubr.msk.f32.vlgmr.msra.gmra.mrb[32].mxu0 %vm406_vm1, %v3487_v53 }
0x22cb   :  { %4962 = vmatpush3.bf16.msra.mxu0 %v6206_v37  ;;  %4793 = vmatprep.mubr.msk.f32.mxu0 %vm5611_vm2, %v5610_v56 }
0x22cc   :  { %4963 = vmatprep.subr.bf16.mxu0 %v5617_v33 }
0x22cf   :  { %4965 = vmatpush3.bf16.msra.mxu0 %v6212_v40 }
0x22d0   :  { %4972 = vmatprep.subr.bf16.mxu0 %v5617_v33 }
0x239d   :  { %v3560_v54 = vpop.f32.mrb[32].mxu0 }
0x239e   :  { %v3561_v58 = vadd.f32 %v3560_v54, %v6236_v12  ;;  %v4773_v60 = vpop.f32.mrb[33].mxu0 }
0x23a0   :  { %5127 = vtanh.f32 %v3561_v58  ;;  %v4348_v63 = vmul.f32 -1.442695, %v3561_v58 }
0x23a2   :  { %5129 = vpow2.f32 %v4348_v63 }
0x23aa   :  { %v5128_v62 = vpop.eup %5127 }
0x23ab   :  { %3573 = vrot.lane.b32.xlu0 %v5128_v62, %s5613_s28 }
0x23ac   :  { %v5130_v1 = vpop.eup %5129 }
0x23ad   :  { %v3567_v4 = vadd.f32 1.0, %v5130_v1 }
0x23af   :  { %5131 = vrcp.f32 %v3567_v4 }
0x23b9   :  { %v5132_v5 = vpop.eup %5131 }
0x23ba   :  { %v3571_v0 = vmul.f32 %v5132_v5, %v3478_v50 }
0x241d   :  { %v3574_v6 = vpop.permute.xlu0 %3573 }
0x241e   :  { %v3576_v61 = vmul.f32 %v5132_v5, %v3574_v6 }
0x2420   :  { %3578 = vrot.lane.b32.xlu1 %v3576_v61, %s5618_s8 }
0x2492   :  { %v3579_v2 = vpop.permute.xlu1 %3578 }
0x2493   :  { %v3581_v7 = vadd.f32 %v3579_v2, %v3571_v0 }
0x2495   :  { %5133 = vtanh.f32 %v3581_v7 }
0x249f   :  { %v5134_v8 = vpop.eup %5133 }
0x24a0   :  { %3584 = vrot.lane.b32.xlu0 %v5134_v8, %s5613_s28 }
0x2512   :  { %v3585_v9 = vpop.permute.xlu0 %3584 }
0x2513   :  { %v3587_v10 = vmul.f32 %v5132_v5, %v3585_v9 }
0x2515   :  { %3589 = vrot.lane.b32.xlu1 %v3587_v10, %s5618_s8 }
0x2587   :  { %v3590_v11 = vpop.permute.xlu1 %3589 }
0x2588   :  { %4783 = vmatmul.mubr.msk.f32.vlgmr.msra.gmra.mrb[34].mxu1 %vm406_vm1, %v3590_v11 }
0x2589   :  { %4968 = vmatpush3.bf16.msra.mxu1 %v6206_v37  ;;  %4804 = vmatprep.mubr.msk.f32.mxu1 %vm5611_vm2, %v5610_v56 }
0x258a   :  { %4969 = vmatprep.subr.bf16.mxu1 %v5617_v33 }
0x258d   :  { %4971 = vmatpush3.bf16.msra.mxu1 %v6212_v40 }
0x258e   :  { %4978 = vmatprep.subr.bf16.mxu1 %v5617_v33 }
0x265b   :  { %v3663_v12 = vpop.f32.mrb[34].mxu1 }
0x265c   :  { %v3664_v16 = vadd.f32 %v3663_v12, %v6239_v13  ;;  %v4784_v26 = vpop.f32.mrb[35].mxu1 }
0x265e   :  { %5135 = vtanh.f32 %v3664_v16  ;;  %v4350_v18 = vmul.f32 -1.442695, %v3664_v16 }
0x2660   :  { %5137 = vpow2.f32 %v4350_v18 }
0x2668   :  { %v5136_v17 = vpop.eup %5135 }
0x2669   :  { %3676 = vrot.lane.b32.xlu0 %v5136_v17, %s5613_s28 }
0x266a   :  { %v5138_v19 = vpop.eup %5137 }
0x266b   :  { %v3670_v51 = vadd.f32 1.0, %v5138_v19 }
0x266d   :  { %5139 = vrcp.f32 %v3670_v51 }
0x2677   :  { %v5140_v23 = vpop.eup %5139 }
0x2678   :  { %v3674_v59 = vmul.f32 %v5140_v23, %v3581_v7 }
0x26db   :  { %v3677_v24 = vpop.permute.xlu0 %3676 }
0x26dc   :  { %v3679_v20 = vmul.f32 %v5140_v23, %v3677_v24 }
0x26de   :  { %3681 = vrot.lane.b32.xlu1 %v3679_v20, %s5618_s8 }
0x2750   :  { %v3682_v27 = vpop.permute.xlu1 %3681 }
0x2751   :  { %v3684_v29 = vadd.f32 %v3682_v27, %v3674_v59 }
0x2753   :  { %5141 = vtanh.f32 %v3684_v29 }
0x275d   :  { %v5142_v13 = vpop.eup %5141 }
0x275e   :  { %3687 = vrot.lane.b32.xlu0 %v5142_v13, %s5613_s28 }
0x27d0   :  { %v3688_v30 = vpop.permute.xlu0 %3687 }
0x27d1   :  { %v3690_v31 = vmul.f32 %v5140_v23, %v3688_v30 }
0x27d3   :  { %3692 = vrot.lane.b32.xlu1 %v3690_v31, %s5618_s8 }
0x2845   :  { %v3693_v32 = vpop.permute.xlu1 %3692 }
0x2846   :  { %4794 = vmatmul.mubr.msk.f32.vlgmr.msra.gmra.mrb[34].mxu0 %vm406_vm1, %v3693_v32 }
0x2847   :  { %4974 = vmatpush3.bf16.msra.mxu0 %v6206_v37  ;;  %4815 = vmatprep.mubr.msk.f32.mxu0 %vm5611_vm2, %v5610_v56 }
0x2848   :  { %4975 = vmatprep.subr.bf16.mxu0 %v5617_v33 }
0x284b   :  { %4977 = vmatpush3.bf16.msra.mxu0 %v6212_v40 }
0x284c   :  { %4984 = vmatprep.subr.bf16.mxu0 %v5617_v33 }
0x2919   :  { %v3766_v34 = vpop.f32.mrb[34].mxu0 }
0x291a   :  { %v3767_v35 = vadd.f32 %v3766_v34, %v6242_v14  ;;  %v4795_v36 = vpop.f32.mrb[35].mxu0 }
0x291b   :  { %v4104_v36 = vld [vmem:[%s5793_s29 + $0x8] sm:$0xff] }
0x291c   :  { %5143 = vtanh.f32 %v3767_v35  ;;  %v4352_v39 = vmul.f32 -1.442695, %v3767_v35  ;;  %v4103_v35 = vld [vmem:[%s5793_s29] sm:$0xff] }
0x291e   :  { %5145 = vpow2.f32 %v4352_v39  ;;  %v4985_v39 = vpack.c.bf16 %v4104_v36, %v4103_v35 }
0x2926   :  { %v5144_v38 = vpop.eup %5143 }
0x2927   :  { %3779 = vrot.lane.b32.xlu0 %v5144_v38, %s5613_s28  ;;  %v4105_v38 = vld [vmem:[%s5793_s29 + $0x10] sm:$0xff] }
0x2928   :  { %v5146_v41 = vpop.eup %5145 }
0x2929   :  { %v3773_v57 = vadd.f32 1.0, %v5146_v41  ;;  %v4106_v41 = vld [vmem:[%s5793_s29 + $0x18] sm:$0xff]  ;;  %s5517_s29 = scalar_lea.vmem %s4197_s16, 32 }
0x292a   :  { %p5518_p13 = scmp.ne.s32.totalorder %s4197_s16, %s5517_s29  ;;  %p5523_p1 = scmp.lt.s32.totalorder %s5517_s29, %s5517_s29 }
0x292b   :  { %5147 = vrcp.f32 %v3773_v57  ;;  %v4988_v57 = vpack.c.bf16 %v4106_v41, %v4105_v38 }
0x292c   :  { %p5524_p2 = por %p5523_p1, %p5522_p0 }
0x292e   :  { %p5525_p3 = pnand %p5524_p2, %p5518_p13 }
0x2935   :  { %v5148_v42 = vpop.eup %5147 }
0x2936   :  { %v3777_v45 = vmul.f32 %v5148_v42, %v3684_v29 }
0x2999   :  { %v3780_v43 = vpop.permute.xlu0 %3779 }
0x299a   :  { %v3782_v44 = vmul.f32 %v5148_v42, %v3780_v43 }
0x299c   :  { %3784 = vrot.lane.b32.xlu1 %v3782_v44, %s5618_s8 }
0x2a0e   :  { %v3785_v25 = vpop.permute.xlu1 %3784 }
0x2a0f   :  { %v3787_v46 = vadd.f32 %v3785_v25, %v3777_v45  ;;  %v4359_v25 = vld [vmem:[#allocation28] ss:$0 sm:$0xff] }
0x2a11   :  { %5149 = vtanh.f32 %v3787_v46 }
0x2a1b   :  { %v5150_v14 = vpop.eup %5149 }
0x2a1c   :  { %3790 = vrot.lane.b32.xlu0 %v5150_v14, %s5613_s28 }
0x2a8e   :  { %v3791_v47 = vpop.permute.xlu0 %3790 }
0x2a8f   :  { %v3793_v48 = vmul.f32 %v5148_v42, %v3791_v47 }
0x2a91   :  { %3795 = vrot.lane.b32.xlu1 %v3793_v48, %s5618_s8 }
0x2b03   :  { %v3796_v3 = vpop.permute.xlu1 %3795 }
0x2b04   :  { %4805 = vmatmul.mubr.msk.f32.vlgmr.msra.gmra.mrb[36].mxu1 %vm406_vm1, %v3796_v3 }
0x2b05   :  { %4980 = vmatpush3.bf16.msra.mxu1 %v6206_v37  ;;  %4826 = vmatprep.mubr.msk.f32.mxu1 %vm5611_vm2, %v5610_v56 }
0x2b06   :  { %4981 = vmatprep.subr.bf16.mxu1 %v5617_v33 }
0x2b09   :  { %4983 = vmatpush3.bf16.msra.mxu1 %v6212_v40 }
0x2bd7   :  { %v3869_v49 = vpop.f32.mrb[36].mxu1 }
0x2bd8   :  { %v3870_v50 = vadd.f32 %v3869_v49, %v6245_v15  ;;  %v4806_v52 = vpop.f32.mrb[37].mxu1 }
0x2bda   :  { %5151 = vtanh.f32 %v3870_v50  ;;  %v4354_v55 = vmul.f32 -1.442695, %v3870_v50 }
0x2bdc   :  { %5153 = vpow2.f32 %v4354_v55 }
0x2be4   :  { %v5152_v28 = vpop.eup %5151 }
0x2be5   :  { %3882 = vrot.lane.b32.xlu0 %v5152_v28, %s5613_s28 }
0x2be6   :  { %v5154_v53 = vpop.eup %5153 }
0x2be7   :  { %v3876_v54 = vadd.f32 1.0, %v5154_v53 }
0x2be9   :  { %5155 = vrcp.f32 %v3876_v54 }
0x2bf3   :  { %v5156_v37 = vpop.eup %5155 }
0x2bf4   :  { %v3880_v62 = vmul.f32 %v5156_v37, %v3787_v46 }
0x2c57   :  { %v3883_v58 = vpop.permute.xlu0 %3882 }
0x2c58   :  { %v3885_v60 = vmul.f32 %v5156_v37, %v3883_v58 }
0x2c5a   :  { %3887 = vrot.lane.b32.xlu1 %v3885_v60, %s5618_s8 }
0x2ccc   :  { %v3888_v40 = vpop.permute.xlu1 %3887 }
0x2ccd   :  { %v3890_v63 = vadd.f32 %v3888_v40, %v3880_v62 }
0x2ccf   :  { %5157 = vtanh.f32 %v3890_v63 }
0x2cd9   :  { %v5158_v15 = vpop.eup %5157 }
0x2cda   :  { %3893 = vrot.lane.b32.xlu0 %v5158_v15, %s5613_s28 }
0x2d4c   :  { %v3894_v1 = vpop.permute.xlu0 %3893 }
0x2d4d   :  { %v3896_v4 = vmul.f32 %v5156_v37, %v3894_v1 }
0x2d4f   :  { %3898 = vrot.lane.b32.xlu1 %v3896_v4, %s5618_s8 }
0x2dc1   :  { %v3899_v5 = vpop.permute.xlu1 %3898 }
0x2dc2   :  { %4816 = vmatmul.mubr.msk.f32.vlgmr.msra.gmra.mrb[36].mxu0 %vm406_vm1, %v3899_v5 }
0x2dc3   :  { %4837 = vmatprep.mubr.msk.f32.mxu0 %vm5611_vm2, %v5610_v56  ;;  %4986 = vmatpush3.bf16.msra.mxu0 %v4985_v39 }
0x2dc4   :  { %4987 = vmatprep.subr.bf16.mxu0 %v5617_v33 }
0x2dc7   :  { %4989 = vmatpush3.bf16.msra.mxu0 %v4988_v57 }
0x2e95   :  { %v3972_v6 = vpop.f32.mrb[36].mxu0 }
0x2e96   :  { %v3973_v61 = vadd.f32 %v3972_v6, %v6248_v21  ;;  %v4817_v0 = vpop.f32.mrb[37].mxu0 }
0x2e98   :  { %5159 = vtanh.f32 %v3973_v61  ;;  %v4356_v7 = vmul.f32 -1.442695, %v3973_v61 }
0x2e9a   :  { %5161 = vpow2.f32 %v4356_v7 }
0x2ea2   :  { %v5160_v2 = vpop.eup %5159 }
0x2ea3   :  { %3985 = vrot.lane.b32.xlu0 %v5160_v2, %s5613_s28 }
0x2ea4   :  { %v5162_v8 = vpop.eup %5161 }
0x2ea5   :  { %v3979_v9 = vadd.f32 1.0, %v5162_v8 }
0x2ea7   :  { %5163 = vrcp.f32 %v3979_v9 }
0x2eb1   :  { %v5164_v10 = vpop.eup %5163 }
0x2eb2   :  { %v3983_v16 = vmul.f32 %v5164_v10, %v3890_v63 }
0x2f15   :  { %v3986_v11 = vpop.permute.xlu0 %3985 }
0x2f16   :  { %v3988_v12 = vmul.f32 %v5164_v10, %v3986_v11 }
0x2f18   :  { %3990 = vrot.lane.b32.xlu1 %v3988_v12, %s5618_s8 }
0x2f8a   :  { %v3991_v56 = vpop.permute.xlu1 %3990 }
0x2f8b   :  { %v3993_v26 = vadd.f32 %v3991_v56, %v3983_v16 }
0x2f8d   :  { %5165 = vtanh.f32 %v3993_v26 }
0x2f97   :  { %v5166_v21 = vpop.eup %5165 }
0x2f98   :  { %3996 = vrot.lane.b32.xlu0 %v5166_v21, %s5613_s28 }
0x300a   :  { %v3997_v17 = vpop.permute.xlu0 %3996 }
0x300b   :  { %v3999_v18 = vmul.f32 %v5164_v10, %v3997_v17 }
0x300d   :  { %4001 = vrot.lane.b32.xlu1 %v3999_v18, %s5618_s8 }
0x307f   :  { %v4002_v19 = vpop.permute.xlu1 %4001 }
0x3080   :  { %4827 = vmatmul.mubr.msk.f32.vlgmr.msra.gmra.mrb[38].mxu1 %vm406_vm1, %v4002_v19 }
0x3153   :  { %v4075_v51 = vpop.f32.mrb[38].mxu1 }
0x3154   :  { %v4076_v23 = vadd.f32 %v4075_v51, %v6251_v22  ;;  %v4828_v24 = vpop.f32.mrb[39].mxu1 }
0x3156   :  { %5167 = vtanh.f32 %v4076_v23  ;;  %v4358_v59 = vmul.f32 -1.442695, %v4076_v23 }
0x3158   :  { %5169 = vpow2.f32 %v4358_v59 }
0x3160   :  { %v5168_v20 = vpop.eup %5167 }
0x3161   :  { %4088 = vrot.lane.b32.xlu0 %v5168_v20, %s5613_s28 }
0x3162   :  { %v5170_v27 = vpop.eup %5169 }
0x3163   :  { %v4082_v29 = vadd.f32 1.0, %v5170_v27 }
0x3165   :  { %5171 = vrcp.f32 %v4082_v29 }
0x316f   :  { %v5172_v13 = vpop.eup %5171 }
0x3170   :  { %v4086_v22 = vmul.f32 %v5172_v13, %v3993_v26 }
0x31d3   :  { %v4089_v30 = vpop.permute.xlu0 %4088 }
0x31d4   :  { %v4091_v31 = vmul.f32 %v5172_v13, %v4089_v30 }
0x31d6   :  { %4093 = vrot.lane.b32.xlu1 %v4091_v31, %s5618_s8 }
0x3248   :  { %v4094_v32 = vpop.permute.xlu1 %4093 }
0x3249   :  { %v4096_v34 = vadd.f32 %v4094_v32, %v4086_v22 }
0x324b   :  { %5173 = vtanh.f32 %v4096_v34 }
0x3255   :  { %v5174_v42 = vpop.eup %5173 }
0x3256   :  { %4099 = vrot.lane.b32.xlu0 %v5174_v42, %s5613_s28 }
0x32c8   :  { %v4100_v43 = vpop.permute.xlu0 %4099 }
0x32c9   :  { %v4102_v44 = vmul.f32 %v5172_v13, %v4100_v43 }
0x32cb   :  { %4115 = vrot.lane.b32.xlu1 %v4102_v44, %s5618_s8 }
0x333d   :  { %v4116_v45 = vpop.permute.xlu1 %4115 }
0x333e   :  { %4838 = vmatmul.mubr.msk.f32.vlgmr.msra.gmra.mrb[38].mxu0 %vm406_vm1, %v4116_v45 }
0x3411   :  { %v4185_v46 = vpop.f32.mrb[38].mxu0 }
0x3412   :  { %v4186_v14 = vadd.f32 %v4359_v25, %v4185_v46  ;;  %v4839_v47 = vpop.f32.mrb[39].mxu0 }
0x3414   :  { %4189 = vst [vmem:[#allocation29] sm:$0x3] %v4186_v14 }
0x3415   :  { %5528 = shalt.err (!%p5525_p3)
}
0x3416   :  { %s5529_s21 = scalar_lea.hbm %s5803_s13, 32 }
0x3417   :  { %p5530_p4 = scmp.ne.s32.totalorder %s5803_s13, %s5529_s21  ;;  %p5533_p5 = scmp.lt.u32.totalorder %s5529_s21, %s5803_s13 }
0x3419   :  { %p5535_p6 = pnand %p5533_p5, %p5530_p4 }
0x341b   :  { %5538 = shalt.err (!%p5535_p6)
}
0x341c   :  { %4199 = dma.vmem_to_hbm [thread:$0]  %s4197_s16, 32, %s5803_s13, [#allocation5]  }
0x341d   :  { %5557 = dma.done.wait [#allocation5], 32  }
0x341e   :  { %5558 = vsyncadd [#allocation5], 4294967264 }
0x341f   :  { %4203 = vsyncpa [#allocation4], 1 }
0x3420   :  { %4204 = vsyncpa [#allocation9], 1 }
0x3421   :  { %4205 = vsyncpa [#allocation12], 1 }
0x3422   :  { %4206 = vsyncpa [#allocation15], 1 }
0x3423   :  { %4207 = vsyncpa [#allocation18], 1 }
0x3424   :  { %4208 = vsyncpa [#allocation21], 1 }
0x3425   :  { %4209 = vsyncpa [#allocation24], 1 }
0x3426   :  { %4210 = vsyncpa [#allocation27], 1 }
0x3427   :  { %4211 = vsyncpa [#allocation5], 1 }
0x3428   :  { %4212 = vsyncpa [#allocation6], 1 }

</bundles_post_ra>
